<compile_context>
chip_gen: v6e
topology: v6e:2x2x1
jax: 0.10.0
libtpu: 0.0.40
codegen_flags: <defaults>
</compile_context>

<pallas_src>
import jax
import jax.numpy as jnp
from jax.experimental import pallas as pl
from jax.experimental.pallas import tpu as pltpu

CHAR_EMBED = 50
MAX_WORD_LEN = 21
KERNEL_SIZE = 5
T_OUT = MAX_WORD_LEN - KERNEL_SIZE + 1   # 17 valid conv positions
L_PAD = 32                               # word-length axis padded (tile-aligned)


def _round_up(x, m):
    return ((x + m - 1) // m) * m


def _char_cnn_kernel(ids_ref, g2_ref, bconv_ref, whw_ref, bhw_ref, out_ref):
    # ids_ref  : (L_PAD, TN)            int32   char ids, words on lanes
    # g2_ref   : (T_OUT*F_pad, Vp*L_PAD) bf16   fused gather+conv table
    # bconv_ref: (F_pad, 1)             f32
    # whw_ref  : (2*F_pad, F_pad)       bf16    [proj ; gate] fused highway weight
    # bhw_ref  : (2*F_pad, 1)           f32
    # out_ref  : (F_pad, TN)            f32
    l_pad, tn = ids_ref.shape
    f_pad = bconv_ref.shape[0]
    rows, rv = g2_ref.shape
    vp = rv // l_pad
    t_out = rows // f_pad

    ids = ids_ref[...]                                              # (L_PAD, TN) int32

    # --- in-kernel gather: one-hot over the char vocab (v major, l minor) ---
    onehot = jnp.concatenate(
        [jnp.where(ids == v, 1.0, 0.0).astype(jnp.bfloat16) for v in range(vp)],
        axis=0)                                                     # (Vp*L_PAD, TN) bf16

    # --- gather + all conv taps + VALID structure in ONE MXU matmul ---
    conv = jnp.dot(g2_ref[...], onehot,
                   preferred_element_type=jnp.float32)              # (T_OUT*F_pad, TN) f32
    conv = conv.reshape(t_out, f_pad, tn)                           # tile-aligned (free)

    # max over time, then bias + ReLU (hoist is valid: ReLU/bias-add are monotone)
    pooled = jnp.maximum(jnp.max(conv, axis=0) + bconv_ref[...], 0.0)   # (F_pad, TN)

    # --- Highway: fused [proj ; gate] matmul, split on an 8-aligned row boundary ---
    hw = jnp.dot(whw_ref[...], pooled.astype(whw_ref.dtype),
                 preferred_element_type=jnp.float32) + bhw_ref[...]     # (2*F_pad, TN)
    proj = jnp.maximum(hw[:f_pad, :], 0.0)
    gate = jax.nn.sigmoid(hw[f_pad:, :])
    out = gate * proj + (1.0 - gate) * pooled

    # TODO(synk): nn.Dropout(p=0.3) is identity in eval mode; training-mode PRNG masking omitted.
    out_ref[...] = out.astype(out_ref.dtype)


def model_embeddings_forward(char_ids, params, *, tile_words=128):
    """char_ids: int32 (sent_len, batch, max_word_len) -> (sent_len, batch, F)."""
    emb_table = params["char_emb"]           # (V, C), padding-char row is zero
    w_conv = params["w_conv"]                # (F, C, K)
    sent_len, batch, L = char_ids.shape
    assert L == MAX_WORD_LEN
    N = sent_len * batch
    V, C = emb_table.shape
    F, _, K = w_conv.shape
    assert C == CHAR_EMBED and K == KERNEL_SIZE

    F_pad = _round_up(F, 16)                  # sublane-aligned filters (bf16-safe)
    Vp = _round_up(max(V, 4), 4)              # Vp*L_PAD is a multiple of 128 (lane-dense G2)
    RV = Vp * L_PAD
    TN = max(128, _round_up(tile_words, 128))  # words per grid step (lane tile)
    N_pad = _round_up(N, TN)

    # --- ids glue: (sent, batch, 21) -> transposed (L_PAD, N_pad) int32, ~128 B/word ---
    ids = char_ids.reshape(N, MAX_WORD_LEN).astype(jnp.int32)
    ids = jnp.pad(ids, ((0, N_pad - N), (0, L_PAD - MAX_WORD_LEN)))
    ids_t = ids.T                                                   # (L_PAD, N_pad)

    # --- fused gather+conv table G2[(t,f),(v,l)] = emb[v] . Wconv[f,:,l-t] ---
    tap = jnp.einsum('vc,fck->vkf', emb_table.astype(jnp.float32),
                     w_conv.astype(jnp.float32))                    # (V, K, F)
    t_idx = jnp.arange(T_OUT)
    l_idx = jnp.arange(L_PAD)
    k_rel = l_idx[None, :] - t_idx[:, None]                         # (T_OUT, L_PAD)
    valid = (k_rel >= 0) & (k_rel < KERNEL_SIZE)
    k_safe = jnp.clip(k_rel, 0, KERNEL_SIZE - 1)
    core = tap[:, k_safe, :] * valid[None, :, :, None].astype(jnp.float32)  # (V, T_OUT, L_PAD, F)
    core = jnp.transpose(core, (1, 3, 0, 2))                        # (T_OUT, F, V, L_PAD)
    g2 = jnp.zeros((T_OUT, F_pad, Vp, L_PAD), jnp.float32)
    g2 = g2.at[:, :F, :V, :].set(core)
    g2 = g2.reshape(T_OUT * F_pad, RV).astype(jnp.bfloat16)

    bconv = jnp.zeros((F_pad, 1), jnp.float32).at[:F, 0].set(params["b_conv"])

    # highway: fused [proj ; gate] weight (2*F_pad, F_pad) and bias (2*F_pad, 1)
    whw = jnp.zeros((2 * F_pad, F_pad), jnp.float32)
    whw = whw.at[:F, :F].set(params["w_proj"]).at[F_pad:F_pad + F, :F].set(params["w_gate"])
    whw = whw.astype(jnp.bfloat16)
    bhw = jnp.zeros((2 * F_pad, 1), jnp.float32)
    bhw = bhw.at[:F, 0].set(params["b_proj"]).at[F_pad:F_pad + F, 0].set(params["b_gate"])

    grid = (N_pad // TN,)
    out_t = pl.pallas_call(
        _char_cnn_kernel,
        out_shape=jax.ShapeDtypeStruct((F_pad, N_pad), jnp.float32),
        grid_spec=pltpu.PrefetchScalarGridSpec(
            num_scalar_prefetch=0,
            grid=grid,
            in_specs=[
                pl.BlockSpec((L_PAD, TN), lambda i: (0, i)),            # per-step ids tile
                pl.BlockSpec((T_OUT * F_pad, RV), lambda i: (0, 0)),    # VMEM-resident table
                pl.BlockSpec((F_pad, 1), lambda i: (0, 0)),
                pl.BlockSpec((2 * F_pad, F_pad), lambda i: (0, 0)),
                pl.BlockSpec((2 * F_pad, 1), lambda i: (0, 0)),
            ],
            out_specs=pl.BlockSpec((F_pad, TN), lambda i: (0, i)),
        ),
        compiler_params=pltpu.CompilerParams(
            dimension_semantics=("parallel",),
        ),
    )(ids_t, g2, bconv, whw, bhw)

    # kernel output is transposed (F_pad, N_pad); slice away padding and restore layout
    return out_t[:F, :N].T.reshape(sent_len, batch, F)


def reference_forward(char_ids, params):
    """Pure-JAX f32 reference mirroring the PyTorch module (eval mode)."""
    emb_table = params["char_emb"]
    sent_len, batch, L = char_ids.shape
    emb = emb_table[char_ids].reshape(sent_len * batch, L, CHAR_EMBED)
    x = jnp.transpose(emb, (0, 2, 1))                      # (N, C, L)  (NCW, like PyTorch)
    conv = jax.lax.conv_general_dilated(
        x, params["w_conv"], window_strides=(1,), padding="VALID",
        dimension_numbers=("NCH", "OIH", "NCH"))
    conv = conv + params["b_conv"][None, :, None]
    pooled = jnp.max(jax.nn.relu(conv), axis=-1)           # (N, F)
    proj = jax.nn.relu(pooled @ params["w_proj"].T + params["b_proj"])
    gate = jax.nn.sigmoid(pooled @ params["w_gate"].T + params["b_gate"])
    out = gate * proj + (1.0 - gate) * pooled
    return out.reshape(sent_len, batch, -1)


if __name__ == "__main__":
    sent_len, batch = 4, 2
    word_embed_size = 32           # F (num CNN filters / output embed size)
    vocab_size = 30                # len(vocab.char2id)
    pad_idx = 0                    # vocab.char2id['∏']

    key = jax.random.PRNGKey(0)
    k_emb, k_wc, k_bc, k_wp, k_bp, k_wg, k_bg, k_ids = jax.random.split(key, 8)

    char_emb = 0.1 * jax.random.normal(k_emb, (vocab_size, CHAR_EMBED), jnp.float32)
    char_emb = char_emb.at[pad_idx].set(0.0)   # padding_idx row is zero (as in nn.Embedding)

    params = {
        "char_emb": char_emb,
        "w_conv": 0.05 * jax.random.normal(k_wc, (word_embed_size, CHAR_EMBED, KERNEL_SIZE), jnp.float32),
        "b_conv": 0.05 * jax.random.normal(k_bc, (word_embed_size,), jnp.float32),
        "w_proj": 0.1 * jax.random.normal(k_wp, (word_embed_size, word_embed_size), jnp.float32),
        "b_proj": 0.1 * jax.random.normal(k_bp, (word_embed_size,), jnp.float32),
        "w_gate": 0.1 * jax.random.normal(k_wg, (word_embed_size, word_embed_size), jnp.float32),
        "b_gate": 0.1 * jax.random.normal(k_bg, (word_embed_size,), jnp.float32),
    }

    char_ids = jax.random.randint(k_ids, (sent_len, batch, MAX_WORD_LEN), 0, vocab_size, jnp.int32)

    out = model_embeddings_forward(char_ids, params)
    out = jax.block_until_ready(out)

    ref = reference_forward(char_ids, params)
    assert out.shape == (sent_len, batch, word_embed_size), out.shape
    # bf16 MXU inputs (f32 accumulation) -> compare with a bf16-appropriate tolerance
    max_err = float(jnp.max(jnp.abs(out - ref)))
    assert jnp.allclose(out, ref, atol=2e-2, rtol=2e-2), max_err

    print("KERNEL_OK")
</pallas_src>

<mosaic_0001>
module attributes {stable_mosaic.version = 11 : i64} {
  func.func @_char_cnn_kernel(%arg0: i32, %arg1: memref<32x128xi32, #tpu.memory_space<vmem>>, %arg2: memref<544x1024xbf16, #tpu.memory_space<vmem>>, %arg3: memref<32x1xf32, #tpu.memory_space<vmem>>, %arg4: memref<64x32xbf16, #tpu.memory_space<vmem>>, %arg5: memref<64x1xf32, #tpu.memory_space<vmem>>, %arg6: memref<32x128xf32, #tpu.memory_space<vmem>>) attributes {dimension_semantics = [#tpu.dimension_semantics<parallel>], iteration_bounds = array<i64: 1>, scalar_prefetch = 0 : i64, scratch_operands = 0 : i64, tpu.core_type = #tpu.core_type<tc>, window_params = [{transform_indices = @transform_0, window_bounds = array<i64: 32, 128>}, {pipeline_mode = #tpu.pipeline_mode<synchronous>, transform_indices = @transform_1, window_bounds = array<i64: 544, 1024>}, {pipeline_mode = #tpu.pipeline_mode<synchronous>, transform_indices = @transform_2, window_bounds = array<i64: 32, 1>}, {pipeline_mode = #tpu.pipeline_mode<synchronous>, transform_indices = @transform_3, window_bounds = array<i64: 64, 32>}, {pipeline_mode = #tpu.pipeline_mode<synchronous>, transform_indices = @transform_4, window_bounds = array<i64: 64, 1>}, {transform_indices = @transform_5, window_bounds = array<i64: 32, 128>}]} {
    %c0 = arith.constant 0 : index
    %c0_0 = arith.constant 0 : index
    %0 = vector.load %arg1[%c0, %c0_0] : memref<32x128xi32, #tpu.memory_space<vmem>>, vector<32x128xi32>
    %c0_i32 = arith.constant 0 : i32
    %1 = vector.broadcast %c0_i32 : i32 to vector<32x128xi32>
    %2 = arith.cmpi eq, %0, %1 : vector<32x128xi32>
    %cst = arith.constant 1.000000e+00 : f32
    %cst_1 = arith.constant 0.000000e+00 : f32
    %3 = vector.broadcast %cst : f32 to vector<32x128xf32>
    %4 = vector.broadcast %cst_1 : f32 to vector<32x128xf32>
    %5 = arith.select %2, %3, %4 : vector<32x128xi1>, vector<32x128xf32>
    %6 = arith.truncf %5 : vector<32x128xf32> to vector<32x128xbf16>
    %c1_i32 = arith.constant 1 : i32
    %7 = vector.broadcast %c1_i32 : i32 to vector<32x128xi32>
    %8 = arith.cmpi eq, %0, %7 : vector<32x128xi32>
    %cst_2 = arith.constant 1.000000e+00 : f32
    %cst_3 = arith.constant 0.000000e+00 : f32
    %9 = vector.broadcast %cst_2 : f32 to vector<32x128xf32>
    %10 = vector.broadcast %cst_3 : f32 to vector<32x128xf32>
    %11 = arith.select %8, %9, %10 : vector<32x128xi1>, vector<32x128xf32>
    %12 = arith.truncf %11 : vector<32x128xf32> to vector<32x128xbf16>
    %c2_i32 = arith.constant 2 : i32
    %13 = vector.broadcast %c2_i32 : i32 to vector<32x128xi32>
    %14 = arith.cmpi eq, %0, %13 : vector<32x128xi32>
    %cst_4 = arith.constant 1.000000e+00 : f32
    %cst_5 = arith.constant 0.000000e+00 : f32
    %15 = vector.broadcast %cst_4 : f32 to vector<32x128xf32>
    %16 = vector.broadcast %cst_5 : f32 to vector<32x128xf32>
    %17 = arith.select %14, %15, %16 : vector<32x128xi1>, vector<32x128xf32>
    %18 = arith.truncf %17 : vector<32x128xf32> to vector<32x128xbf16>
    %c3_i32 = arith.constant 3 : i32
    %19 = vector.broadcast %c3_i32 : i32 to vector<32x128xi32>
    %20 = arith.cmpi eq, %0, %19 : vector<32x128xi32>
    %cst_6 = arith.constant 1.000000e+00 : f32
    %cst_7 = arith.constant 0.000000e+00 : f32
    %21 = vector.broadcast %cst_6 : f32 to vector<32x128xf32>
    %22 = vector.broadcast %cst_7 : f32 to vector<32x128xf32>
    %23 = arith.select %20, %21, %22 : vector<32x128xi1>, vector<32x128xf32>
    %24 = arith.truncf %23 : vector<32x128xf32> to vector<32x128xbf16>
    %c4_i32 = arith.constant 4 : i32
    %25 = vector.broadcast %c4_i32 : i32 to vector<32x128xi32>
    %26 = arith.cmpi eq, %0, %25 : vector<32x128xi32>
    %cst_8 = arith.constant 1.000000e+00 : f32
    %cst_9 = arith.constant 0.000000e+00 : f32
    %27 = vector.broadcast %cst_8 : f32 to vector<32x128xf32>
    %28 = vector.broadcast %cst_9 : f32 to vector<32x128xf32>
    %29 = arith.select %26, %27, %28 : vector<32x128xi1>, vector<32x128xf32>
    %30 = arith.truncf %29 : vector<32x128xf32> to vector<32x128xbf16>
    %c5_i32 = arith.constant 5 : i32
    %31 = vector.broadcast %c5_i32 : i32 to vector<32x128xi32>
    %32 = arith.cmpi eq, %0, %31 : vector<32x128xi32>
    %cst_10 = arith.constant 1.000000e+00 : f32
    %cst_11 = arith.constant 0.000000e+00 : f32
    %33 = vector.broadcast %cst_10 : f32 to vector<32x128xf32>
    %34 = vector.broadcast %cst_11 : f32 to vector<32x128xf32>
    %35 = arith.select %32, %33, %34 : vector<32x128xi1>, vector<32x128xf32>
    %36 = arith.truncf %35 : vector<32x128xf32> to vector<32x128xbf16>
    %c6_i32 = arith.constant 6 : i32
    %37 = vector.broadcast %c6_i32 : i32 to vector<32x128xi32>
    %38 = arith.cmpi eq, %0, %37 : vector<32x128xi32>
    %cst_12 = arith.constant 1.000000e+00 : f32
    %cst_13 = arith.constant 0.000000e+00 : f32
    %39 = vector.broadcast %cst_12 : f32 to vector<32x128xf32>
    %40 = vector.broadcast %cst_13 : f32 to vector<32x128xf32>
    %41 = arith.select %38, %39, %40 : vector<32x128xi1>, vector<32x128xf32>
    %42 = arith.truncf %41 : vector<32x128xf32> to vector<32x128xbf16>
    %c7_i32 = arith.constant 7 : i32
    %43 = vector.broadcast %c7_i32 : i32 to vector<32x128xi32>
    %44 = arith.cmpi eq, %0, %43 : vector<32x128xi32>
    %cst_14 = arith.constant 1.000000e+00 : f32
    %cst_15 = arith.constant 0.000000e+00 : f32
    %45 = vector.broadcast %cst_14 : f32 to vector<32x128xf32>
    %46 = vector.broadcast %cst_15 : f32 to vector<32x128xf32>
    %47 = arith.select %44, %45, %46 : vector<32x128xi1>, vector<32x128xf32>
    %48 = arith.truncf %47 : vector<32x128xf32> to vector<32x128xbf16>
    %c8_i32 = arith.constant 8 : i32
    %49 = vector.broadcast %c8_i32 : i32 to vector<32x128xi32>
    %50 = arith.cmpi eq, %0, %49 : vector<32x128xi32>
    %cst_16 = arith.constant 1.000000e+00 : f32
    %cst_17 = arith.constant 0.000000e+00 : f32
    %51 = vector.broadcast %cst_16 : f32 to vector<32x128xf32>
    %52 = vector.broadcast %cst_17 : f32 to vector<32x128xf32>
    %53 = arith.select %50, %51, %52 : vector<32x128xi1>, vector<32x128xf32>
    %54 = arith.truncf %53 : vector<32x128xf32> to vector<32x128xbf16>
    %c9_i32 = arith.constant 9 : i32
    %55 = vector.broadcast %c9_i32 : i32 to vector<32x128xi32>
    %56 = arith.cmpi eq, %0, %55 : vector<32x128xi32>
    %cst_18 = arith.constant 1.000000e+00 : f32
    %cst_19 = arith.constant 0.000000e+00 : f32
    %57 = vector.broadcast %cst_18 : f32 to vector<32x128xf32>
    %58 = vector.broadcast %cst_19 : f32 to vector<32x128xf32>
    %59 = arith.select %56, %57, %58 : vector<32x128xi1>, vector<32x128xf32>
    %60 = arith.truncf %59 : vector<32x128xf32> to vector<32x128xbf16>
    %c10_i32 = arith.constant 10 : i32
    %61 = vector.broadcast %c10_i32 : i32 to vector<32x128xi32>
    %62 = arith.cmpi eq, %0, %61 : vector<32x128xi32>
    %cst_20 = arith.constant 1.000000e+00 : f32
    %cst_21 = arith.constant 0.000000e+00 : f32
    %63 = vector.broadcast %cst_20 : f32 to vector<32x128xf32>
    %64 = vector.broadcast %cst_21 : f32 to vector<32x128xf32>
    %65 = arith.select %62, %63, %64 : vector<32x128xi1>, vector<32x128xf32>
    %66 = arith.truncf %65 : vector<32x128xf32> to vector<32x128xbf16>
    %c11_i32 = arith.constant 11 : i32
    %67 = vector.broadcast %c11_i32 : i32 to vector<32x128xi32>
    %68 = arith.cmpi eq, %0, %67 : vector<32x128xi32>
    %cst_22 = arith.constant 1.000000e+00 : f32
    %cst_23 = arith.constant 0.000000e+00 : f32
    %69 = vector.broadcast %cst_22 : f32 to vector<32x128xf32>
    %70 = vector.broadcast %cst_23 : f32 to vector<32x128xf32>
    %71 = arith.select %68, %69, %70 : vector<32x128xi1>, vector<32x128xf32>
    %72 = arith.truncf %71 : vector<32x128xf32> to vector<32x128xbf16>
    %c12_i32 = arith.constant 12 : i32
    %73 = vector.broadcast %c12_i32 : i32 to vector<32x128xi32>
    %74 = arith.cmpi eq, %0, %73 : vector<32x128xi32>
    %cst_24 = arith.constant 1.000000e+00 : f32
    %cst_25 = arith.constant 0.000000e+00 : f32
    %75 = vector.broadcast %cst_24 : f32 to vector<32x128xf32>
    %76 = vector.broadcast %cst_25 : f32 to vector<32x128xf32>
    %77 = arith.select %74, %75, %76 : vector<32x128xi1>, vector<32x128xf32>
    %78 = arith.truncf %77 : vector<32x128xf32> to vector<32x128xbf16>
    %c13_i32 = arith.constant 13 : i32
    %79 = vector.broadcast %c13_i32 : i32 to vector<32x128xi32>
    %80 = arith.cmpi eq, %0, %79 : vector<32x128xi32>
    %cst_26 = arith.constant 1.000000e+00 : f32
    %cst_27 = arith.constant 0.000000e+00 : f32
    %81 = vector.broadcast %cst_26 : f32 to vector<32x128xf32>
    %82 = vector.broadcast %cst_27 : f32 to vector<32x128xf32>
    %83 = arith.select %80, %81, %82 : vector<32x128xi1>, vector<32x128xf32>
    %84 = arith.truncf %83 : vector<32x128xf32> to vector<32x128xbf16>
    %c14_i32 = arith.constant 14 : i32
    %85 = vector.broadcast %c14_i32 : i32 to vector<32x128xi32>
    %86 = arith.cmpi eq, %0, %85 : vector<32x128xi32>
    %cst_28 = arith.constant 1.000000e+00 : f32
    %cst_29 = arith.constant 0.000000e+00 : f32
    %87 = vector.broadcast %cst_28 : f32 to vector<32x128xf32>
    %88 = vector.broadcast %cst_29 : f32 to vector<32x128xf32>
    %89 = arith.select %86, %87, %88 : vector<32x128xi1>, vector<32x128xf32>
    %90 = arith.truncf %89 : vector<32x128xf32> to vector<32x128xbf16>
    %c15_i32 = arith.constant 15 : i32
    %91 = vector.broadcast %c15_i32 : i32 to vector<32x128xi32>
    %92 = arith.cmpi eq, %0, %91 : vector<32x128xi32>
    %cst_30 = arith.constant 1.000000e+00 : f32
    %cst_31 = arith.constant 0.000000e+00 : f32
    %93 = vector.broadcast %cst_30 : f32 to vector<32x128xf32>
    %94 = vector.broadcast %cst_31 : f32 to vector<32x128xf32>
    %95 = arith.select %92, %93, %94 : vector<32x128xi1>, vector<32x128xf32>
    %96 = arith.truncf %95 : vector<32x128xf32> to vector<32x128xbf16>
    %c16_i32 = arith.constant 16 : i32
    %97 = vector.broadcast %c16_i32 : i32 to vector<32x128xi32>
    %98 = arith.cmpi eq, %0, %97 : vector<32x128xi32>
    %cst_32 = arith.constant 1.000000e+00 : f32
    %cst_33 = arith.constant 0.000000e+00 : f32
    %99 = vector.broadcast %cst_32 : f32 to vector<32x128xf32>
    %100 = vector.broadcast %cst_33 : f32 to vector<32x128xf32>
    %101 = arith.select %98, %99, %100 : vector<32x128xi1>, vector<32x128xf32>
    %102 = arith.truncf %101 : vector<32x128xf32> to vector<32x128xbf16>
    %c17_i32 = arith.constant 17 : i32
    %103 = vector.broadcast %c17_i32 : i32 to vector<32x128xi32>
    %104 = arith.cmpi eq, %0, %103 : vector<32x128xi32>
    %cst_34 = arith.constant 1.000000e+00 : f32
    %cst_35 = arith.constant 0.000000e+00 : f32
    %105 = vector.broadcast %cst_34 : f32 to vector<32x128xf32>
    %106 = vector.broadcast %cst_35 : f32 to vector<32x128xf32>
    %107 = arith.select %104, %105, %106 : vector<32x128xi1>, vector<32x128xf32>
    %108 = arith.truncf %107 : vector<32x128xf32> to vector<32x128xbf16>
    %c18_i32 = arith.constant 18 : i32
    %109 = vector.broadcast %c18_i32 : i32 to vector<32x128xi32>
    %110 = arith.cmpi eq, %0, %109 : vector<32x128xi32>
    %cst_36 = arith.constant 1.000000e+00 : f32
    %cst_37 = arith.constant 0.000000e+00 : f32
    %111 = vector.broadcast %cst_36 : f32 to vector<32x128xf32>
    %112 = vector.broadcast %cst_37 : f32 to vector<32x128xf32>
    %113 = arith.select %110, %111, %112 : vector<32x128xi1>, vector<32x128xf32>
    %114 = arith.truncf %113 : vector<32x128xf32> to vector<32x128xbf16>
    %c19_i32 = arith.constant 19 : i32
    %115 = vector.broadcast %c19_i32 : i32 to vector<32x128xi32>
    %116 = arith.cmpi eq, %0, %115 : vector<32x128xi32>
    %cst_38 = arith.constant 1.000000e+00 : f32
    %cst_39 = arith.constant 0.000000e+00 : f32
    %117 = vector.broadcast %cst_38 : f32 to vector<32x128xf32>
    %118 = vector.broadcast %cst_39 : f32 to vector<32x128xf32>
    %119 = arith.select %116, %117, %118 : vector<32x128xi1>, vector<32x128xf32>
    %120 = arith.truncf %119 : vector<32x128xf32> to vector<32x128xbf16>
    %c20_i32 = arith.constant 20 : i32
    %121 = vector.broadcast %c20_i32 : i32 to vector<32x128xi32>
    %122 = arith.cmpi eq, %0, %121 : vector<32x128xi32>
    %cst_40 = arith.constant 1.000000e+00 : f32
    %cst_41 = arith.constant 0.000000e+00 : f32
    %123 = vector.broadcast %cst_40 : f32 to vector<32x128xf32>
    %124 = vector.broadcast %cst_41 : f32 to vector<32x128xf32>
    %125 = arith.select %122, %123, %124 : vector<32x128xi1>, vector<32x128xf32>
    %126 = arith.truncf %125 : vector<32x128xf32> to vector<32x128xbf16>
    %c21_i32 = arith.constant 21 : i32
    %127 = vector.broadcast %c21_i32 : i32 to vector<32x128xi32>
    %128 = arith.cmpi eq, %0, %127 : vector<32x128xi32>
    %cst_42 = arith.constant 1.000000e+00 : f32
    %cst_43 = arith.constant 0.000000e+00 : f32
    %129 = vector.broadcast %cst_42 : f32 to vector<32x128xf32>
    %130 = vector.broadcast %cst_43 : f32 to vector<32x128xf32>
    %131 = arith.select %128, %129, %130 : vector<32x128xi1>, vector<32x128xf32>
    %132 = arith.truncf %131 : vector<32x128xf32> to vector<32x128xbf16>
    %c22_i32 = arith.constant 22 : i32
    %133 = vector.broadcast %c22_i32 : i32 to vector<32x128xi32>
    %134 = arith.cmpi eq, %0, %133 : vector<32x128xi32>
    %cst_44 = arith.constant 1.000000e+00 : f32
    %cst_45 = arith.constant 0.000000e+00 : f32
    %135 = vector.broadcast %cst_44 : f32 to vector<32x128xf32>
    %136 = vector.broadcast %cst_45 : f32 to vector<32x128xf32>
    %137 = arith.select %134, %135, %136 : vector<32x128xi1>, vector<32x128xf32>
    %138 = arith.truncf %137 : vector<32x128xf32> to vector<32x128xbf16>
    %c23_i32 = arith.constant 23 : i32
    %139 = vector.broadcast %c23_i32 : i32 to vector<32x128xi32>
    %140 = arith.cmpi eq, %0, %139 : vector<32x128xi32>
    %cst_46 = arith.constant 1.000000e+00 : f32
    %cst_47 = arith.constant 0.000000e+00 : f32
    %141 = vector.broadcast %cst_46 : f32 to vector<32x128xf32>
    %142 = vector.broadcast %cst_47 : f32 to vector<32x128xf32>
    %143 = arith.select %140, %141, %142 : vector<32x128xi1>, vector<32x128xf32>
    %144 = arith.truncf %143 : vector<32x128xf32> to vector<32x128xbf16>
    %c24_i32 = arith.constant 24 : i32
    %145 = vector.broadcast %c24_i32 : i32 to vector<32x128xi32>
    %146 = arith.cmpi eq, %0, %145 : vector<32x128xi32>
    %cst_48 = arith.constant 1.000000e+00 : f32
    %cst_49 = arith.constant 0.000000e+00 : f32
    %147 = vector.broadcast %cst_48 : f32 to vector<32x128xf32>
    %148 = vector.broadcast %cst_49 : f32 to vector<32x128xf32>
    %149 = arith.select %146, %147, %148 : vector<32x128xi1>, vector<32x128xf32>
    %150 = arith.truncf %149 : vector<32x128xf32> to vector<32x128xbf16>
    %c25_i32 = arith.constant 25 : i32
    %151 = vector.broadcast %c25_i32 : i32 to vector<32x128xi32>
    %152 = arith.cmpi eq, %0, %151 : vector<32x128xi32>
    %cst_50 = arith.constant 1.000000e+00 : f32
    %cst_51 = arith.constant 0.000000e+00 : f32
    %153 = vector.broadcast %cst_50 : f32 to vector<32x128xf32>
    %154 = vector.broadcast %cst_51 : f32 to vector<32x128xf32>
    %155 = arith.select %152, %153, %154 : vector<32x128xi1>, vector<32x128xf32>
    %156 = arith.truncf %155 : vector<32x128xf32> to vector<32x128xbf16>
    %c26_i32 = arith.constant 26 : i32
    %157 = vector.broadcast %c26_i32 : i32 to vector<32x128xi32>
    %158 = arith.cmpi eq, %0, %157 : vector<32x128xi32>
    %cst_52 = arith.constant 1.000000e+00 : f32
    %cst_53 = arith.constant 0.000000e+00 : f32
    %159 = vector.broadcast %cst_52 : f32 to vector<32x128xf32>
    %160 = vector.broadcast %cst_53 : f32 to vector<32x128xf32>
    %161 = arith.select %158, %159, %160 : vector<32x128xi1>, vector<32x128xf32>
    %162 = arith.truncf %161 : vector<32x128xf32> to vector<32x128xbf16>
    %c27_i32 = arith.constant 27 : i32
    %163 = vector.broadcast %c27_i32 : i32 to vector<32x128xi32>
    %164 = arith.cmpi eq, %0, %163 : vector<32x128xi32>
    %cst_54 = arith.constant 1.000000e+00 : f32
    %cst_55 = arith.constant 0.000000e+00 : f32
    %165 = vector.broadcast %cst_54 : f32 to vector<32x128xf32>
    %166 = vector.broadcast %cst_55 : f32 to vector<32x128xf32>
    %167 = arith.select %164, %165, %166 : vector<32x128xi1>, vector<32x128xf32>
    %168 = arith.truncf %167 : vector<32x128xf32> to vector<32x128xbf16>
    %c28_i32 = arith.constant 28 : i32
    %169 = vector.broadcast %c28_i32 : i32 to vector<32x128xi32>
    %170 = arith.cmpi eq, %0, %169 : vector<32x128xi32>
    %cst_56 = arith.constant 1.000000e+00 : f32
    %cst_57 = arith.constant 0.000000e+00 : f32
    %171 = vector.broadcast %cst_56 : f32 to vector<32x128xf32>
    %172 = vector.broadcast %cst_57 : f32 to vector<32x128xf32>
    %173 = arith.select %170, %171, %172 : vector<32x128xi1>, vector<32x128xf32>
    %174 = arith.truncf %173 : vector<32x128xf32> to vector<32x128xbf16>
    %c29_i32 = arith.constant 29 : i32
    %175 = vector.broadcast %c29_i32 : i32 to vector<32x128xi32>
    %176 = arith.cmpi eq, %0, %175 : vector<32x128xi32>
    %cst_58 = arith.constant 1.000000e+00 : f32
    %cst_59 = arith.constant 0.000000e+00 : f32
    %177 = vector.broadcast %cst_58 : f32 to vector<32x128xf32>
    %178 = vector.broadcast %cst_59 : f32 to vector<32x128xf32>
    %179 = arith.select %176, %177, %178 : vector<32x128xi1>, vector<32x128xf32>
    %180 = arith.truncf %179 : vector<32x128xf32> to vector<32x128xbf16>
    %c30_i32 = arith.constant 30 : i32
    %181 = vector.broadcast %c30_i32 : i32 to vector<32x128xi32>
    %182 = arith.cmpi eq, %0, %181 : vector<32x128xi32>
    %cst_60 = arith.constant 1.000000e+00 : f32
    %cst_61 = arith.constant 0.000000e+00 : f32
    %183 = vector.broadcast %cst_60 : f32 to vector<32x128xf32>
    %184 = vector.broadcast %cst_61 : f32 to vector<32x128xf32>
    %185 = arith.select %182, %183, %184 : vector<32x128xi1>, vector<32x128xf32>
    %186 = arith.truncf %185 : vector<32x128xf32> to vector<32x128xbf16>
    %c31_i32 = arith.constant 31 : i32
    %187 = vector.broadcast %c31_i32 : i32 to vector<32x128xi32>
    %188 = arith.cmpi eq, %0, %187 : vector<32x128xi32>
    %cst_62 = arith.constant 1.000000e+00 : f32
    %cst_63 = arith.constant 0.000000e+00 : f32
    %189 = vector.broadcast %cst_62 : f32 to vector<32x128xf32>
    %190 = vector.broadcast %cst_63 : f32 to vector<32x128xf32>
    %191 = arith.select %188, %189, %190 : vector<32x128xi1>, vector<32x128xf32>
    %192 = arith.truncf %191 : vector<32x128xf32> to vector<32x128xbf16>
    %193 = tpu.concatenate %6, %12, %18, %24, %30, %36, %42, %48, %54, %60, %66, %72, %78, %84, %90, %96 in 0 : vector<32x128xbf16>, vector<32x128xbf16>, vector<32x128xbf16>, vector<32x128xbf16>, vector<32x128xbf16>, vector<32x128xbf16>, vector<32x128xbf16>, vector<32x128xbf16>, vector<32x128xbf16>, vector<32x128xbf16>, vector<32x128xbf16>, vector<32x128xbf16>, vector<32x128xbf16>, vector<32x128xbf16>, vector<32x128xbf16>, vector<32x128xbf16> -> vector<512x128xbf16>
    %194 = tpu.concatenate %102, %108, %114, %120, %126, %132, %138, %144, %150, %156, %162, %168, %174, %180, %186, %192 in 0 : vector<32x128xbf16>, vector<32x128xbf16>, vector<32x128xbf16>, vector<32x128xbf16>, vector<32x128xbf16>, vector<32x128xbf16>, vector<32x128xbf16>, vector<32x128xbf16>, vector<32x128xbf16>, vector<32x128xbf16>, vector<32x128xbf16>, vector<32x128xbf16>, vector<32x128xbf16>, vector<32x128xbf16>, vector<32x128xbf16>, vector<32x128xbf16> -> vector<512x128xbf16>
    %195 = tpu.concatenate %193, %194 in 0 : vector<512x128xbf16>, vector<512x128xbf16> -> vector<1024x128xbf16>
    %c0_64 = arith.constant 0 : index
    %c0_65 = arith.constant 0 : index
    %196 = vector.load %arg2[%c0_64, %c0_65] : memref<544x1024xbf16, #tpu.memory_space<vmem>>, vector<544x1024xbf16>
    %cst_66 = arith.constant dense<0.000000e+00> : vector<544x128xf32>
    %197 = tpu.matmul %196, %195, %cst_66 {dimension_numbers = #tpu.dot_dimension_numbers<[1], [0], [0], [1], [0, 0, 1, 1], [], []>} : vector<544x1024xbf16>, vector<1024x128xbf16>, vector<544x128xf32> -> vector<544x128xf32>
    %198 = vector.shape_cast %197 : vector<544x128xf32> to vector<17x32x128xf32>
    %cst_67 = arith.constant dense<0xFF800000> : vector<32x128xf32>
    %199 = vector.multi_reduction <maximumf>, %198, %cst_67 [0] : vector<17x32x128xf32> to vector<32x128xf32>
    %c0_68 = arith.constant 0 : index
    %c0_69 = arith.constant 0 : index
    %200 = vector.load %arg3[%c0_68, %c0_69] : memref<32x1xf32, #tpu.memory_space<vmem>>, vector<32x1xf32>
    %201 = vector.broadcast %200 : vector<32x1xf32> to vector<32x128xf32>
    %202 = arith.addf %199, %201 : vector<32x128xf32>
    %cst_70 = arith.constant 0.000000e+00 : f32
    %203 = vector.broadcast %cst_70 : f32 to vector<32x128xf32>
    %204 = arith.maximumf %202, %203 : vector<32x128xf32>
    %c0_71 = arith.constant 0 : index
    %c0_72 = arith.constant 0 : index
    %205 = vector.load %arg4[%c0_71, %c0_72] : memref<64x32xbf16, #tpu.memory_space<vmem>>, vector<64x32xbf16>
    %206 = arith.truncf %204 : vector<32x128xf32> to vector<32x128xbf16>
    %cst_73 = arith.constant dense<0.000000e+00> : vector<64x128xf32>
    %207 = tpu.matmul %205, %206, %cst_73 {dimension_numbers = #tpu.dot_dimension_numbers<[1], [0], [0], [1], [0, 0, 1, 1], [], []>} : vector<64x32xbf16>, vector<32x128xbf16>, vector<64x128xf32> -> vector<64x128xf32>
    %c0_74 = arith.constant 0 : index
    %c0_75 = arith.constant 0 : index
    %208 = vector.load %arg5[%c0_74, %c0_75] : memref<64x1xf32, #tpu.memory_space<vmem>>, vector<64x1xf32>
    %209 = vector.broadcast %208 : vector<64x1xf32> to vector<64x128xf32>
    %210 = arith.addf %207, %209 : vector<64x128xf32>
    %211 = vector.extract_strided_slice %210 {offsets = [0, 0], sizes = [32, 128], strides = [1, 1]} : vector<64x128xf32> to vector<32x128xf32>
    %cst_76 = arith.constant 0.000000e+00 : f32
    %212 = vector.broadcast %cst_76 : f32 to vector<32x128xf32>
    %213 = arith.maximumf %211, %212 : vector<32x128xf32>
    %214 = vector.extract_strided_slice %210 {offsets = [32, 0], sizes = [32, 128], strides = [1, 1]} : vector<64x128xf32> to vector<32x128xf32>
    %215 = arith.negf %214 : vector<32x128xf32>
    %216 = math.exp %215 : vector<32x128xf32>
    %cst_77 = arith.constant 1.000000e+00 : f32
    %217 = vector.broadcast %cst_77 : f32 to vector<32x128xf32>
    %218 = arith.addf %217, %216 : vector<32x128xf32>
    %219 = arith.divf %217, %218 : vector<32x128xf32>
    %220 = arith.mulf %219, %213 : vector<32x128xf32>
    %cst_78 = arith.constant 1.000000e+00 : f32
    %221 = vector.broadcast %cst_78 : f32 to vector<32x128xf32>
    %222 = arith.subf %221, %219 : vector<32x128xf32>
    %223 = arith.mulf %222, %204 : vector<32x128xf32>
    %224 = arith.addf %220, %223 : vector<32x128xf32>
    %c0_79 = arith.constant 0 : index
    %c0_80 = arith.constant 0 : index
    %225 = vector.load %arg6[%c0_79, %c0_80] : memref<32x128xf32, #tpu.memory_space<vmem>>, vector<32x128xf32>
    tpu.vector_store %arg6[%c0_79, %c0_80], %224 {strides = array<i32>} : memref<32x128xf32, #tpu.memory_space<vmem>>, vector<32x128xf32>,
    return
  }
  func.func @transform_0(%arg0: i32) -> (i32, i32) {
    %c0_i32 = arith.constant 0 : i32
    %c0_i32_0 = arith.constant 0 : i32
    return %c0_i32, %arg0 : i32, i32
  }
  func.func @transform_1(%arg0: i32) -> (i32, i32) {
    %c0_i32 = arith.constant 0 : i32
    %c0_i32_0 = arith.constant 0 : i32
    %c0_i32_1 = arith.constant 0 : i32
    return %c0_i32, %c0_i32_0 : i32, i32
  }
  func.func @transform_2(%arg0: i32) -> (i32, i32) {
    %c0_i32 = arith.constant 0 : i32
    %c0_i32_0 = arith.constant 0 : i32
    %c0_i32_1 = arith.constant 0 : i32
    return %c0_i32, %c0_i32_0 : i32, i32
  }
  func.func @transform_3(%arg0: i32) -> (i32, i32) {
    %c0_i32 = arith.constant 0 : i32
    %c0_i32_0 = arith.constant 0 : i32
    %c0_i32_1 = arith.constant 0 : i32
    return %c0_i32, %c0_i32_0 : i32, i32
  }
  func.func @transform_4(%arg0: i32) -> (i32, i32) {
    %c0_i32 = arith.constant 0 : i32
    %c0_i32_0 = arith.constant 0 : i32
    %c0_i32_1 = arith.constant 0 : i32
    return %c0_i32, %c0_i32_0 : i32, i32
  }
  func.func @transform_5(%arg0: i32) -> (i32, i32) {
    %c0_i32 = arith.constant 0 : i32
    %c0_i32_0 = arith.constant 0 : i32
    return %c0_i32, %arg0 : i32, i32
  }
}

</mosaic_0001>

<bundles_post_ra>
// kernel: tpu_custom_call.1
= control target key start
LH: loop header
LB: loop body
LE: loop exit
PB: predicated region body
PF: predicated region fallthrough
CT: control target
= control target key end

     0   :  { %10 = vsyncpa [#allocation3], 0  ;;  %s4714_s0 = inlined_call_operand.hbm [shape: s32[32,128], index: 0, kind: input, shape index: {}]   ;;  %s4715_s1 = inlined_call_operand.hbm [shape: bf16[544,1024], index: 1, kind: input, shape index: {}]   ;;  %s4716_s2 = inlined_call_operand.vmem [shape: f32[32,1], index: 2, kind: input, shape index: {}]   ;;  %s4717_s3 = inlined_call_operand.vmem [shape: bf16[64,32], index: 3, kind: input, shape index: {}]   ;;  %s4718_s4 = inlined_call_operand.vmem [shape: f32[64,1], index: 4, kind: input, shape index: {}]   ;;  %s4719_s5 = inlined_call_operand.hbm [shape: f32[32,128], index: 5, kind: output, shape index: {}]  }
   0x1   :  { %11 = vsyncpa [#allocation6], 0 }
   0x2   :  { %12 = vsyncpa [#allocation4], 0  ;;  %s4079_s18 = smov [#allocation2]  }
   0x3   :  { %s18_s19 = sshll.u32 %s4079_s18, 4  ;;  %s19_s19 = int_to_ptr.vmem [resolvable:$true] %s18_s19 }
   0x4   :  { %s4021_s20 = scalar_lea.vmem %s19_s19, 512  ;;  %p4026_p1 = scmp.lt.s32.totalorder %s19_s19, %s19_s19 }
   0x5   :  { %p4022_p0 = scmp.ne.s32.totalorder %s19_s19, %s4021_s20  ;;  %p4027_p2 = scmp.lt.s32.totalorder %s4021_s20, %s4021_s20 }
   0x7   :  { %p4028_p3 = por %p4027_p2, %p4026_p1 }
   0x9   :  { %p4029_p4 = pnand %p4028_p3, %p4022_p0 }
   0xb   :  { %4032 = shalt.err (!%p4029_p4)
}
   0xc   :  { %s4080_s21 = smov 128   ;;  %s4081_s22 = smov 8  }
   0xd   :  { %24 = dma.hbm_to_vmem [thread:$0]  %s4714_s0, 512, %s19_s19, [#allocation3], %s4080_s21, %s4080_s21, %s4081_s22  }
   0xe   :  { %s4082_s25 = smov [#allocation5]  }
   0xf   :  { %s30_s26 = sshll.u32 %s4082_s25, 4  ;;  %s31_s26 = int_to_ptr.vmem [resolvable:$true] %s30_s26 }
  0x10   :  { %s4041_s27 = scalar_lea.vmem %s31_s26, 34816  ;;  %p4046_p6 = scmp.lt.s32.totalorder %s31_s26, %s31_s26 }
  0x11   :  { %p4042_p5 = scmp.ne.s32.totalorder %s31_s26, %s4041_s27  ;;  %p4047_p7 = scmp.lt.s32.totalorder %s4041_s27, %s4041_s27 }
  0x13   :  { %p4048_p8 = por %p4047_p7, %p4046_p6 }
  0x15   :  { %p4049_p9 = pnand %p4048_p8, %p4042_p5 }
  0x17   :  { %4052 = shalt.err (!%p4049_p9)
}
  0x18   :  { %s4083_s28 = smov 512   ;;  %s4084_s29 = smov 32  }
  0x19   :  { %36 = dma.hbm_to_vmem [thread:$0]  %s4715_s1, 34816, %s31_s26, [#allocation6], %s4083_s28, %s4083_s28, %s4084_s29  }
  0x1a   :  { %4073 = dma.done.wait [#allocation3], 512  }
  0x1b   :  { %4074 = vsyncadd [#allocation3], 4294966784 }
  0x1c   :  { %4075 = dma.done.wait [#allocation6], 34816  }
  0x1d   :  { %4076 = vsyncadd [#allocation6], 4294932480  ;;  %v4085_v0 = vmov 0   ;;  %v4131_v1 = vld [vmem:[#allocation2 + $0x10] sm:$0xff]  ;;  %v4133_v2 = vld [vmem:[#allocation2 + $0x18] sm:$0xff] }
  0x1e   :  { %2006 = vmatprep.subr.bf16.mxu0 %v4085_v0  ;;  %2311 = vmatprep.subr.bf16.mxu1 %v4085_v0  ;;  %v4135_v3 = vld [vmem:[#allocation2] sm:$0xff]  ;;  %vm86_vm0 = vcmp.eq.s32.totalorder %v4131_v1, 3  ;;  %vm87_vm1 = vcmp.eq.s32.totalorder %v4133_v2, 3  ;;  %vm166_vm2 = vcmp.eq.s32.totalorder %v4131_v1, 11  ;;  %vm167_vm3 = vcmp.eq.s32.totalorder %v4133_v2, 11  ;;  %v4141_v4 = vld [vmem:[#allocation2 + $0x8] sm:$0xff] }
  0x1f   :  { %3987 = vset.pattern.permute.xlu0 %v4085_v0  ;;  %3988 = vset.pattern.permute.xlu1 %v4085_v0  ;;  %vm3816_vm4 = vmpackc.low %vm87_vm1, %vm86_vm0  ;;  %vm84_vm5 = vcmp.eq.s32.totalorder %v4135_v3, 3  ;;  %vm85_vm6 = vcmp.eq.s32.totalorder %v4141_v4, 3  ;;  %vm164_vm7 = vcmp.eq.s32.totalorder %v4135_v3, 11  ;;  %vm165_vm8 = vcmp.eq.s32.totalorder %v4141_v4, 11  ;;  %v4169_v6 = vld [vmem:[#allocation5] sm:$0xff]  ;;  %v4175_v8 = vld [vmem:[#allocation5 + $0x8] sm:$0xff] }
  0x20   :  { %v4086_v5 = vmov 1.0|1.0   ;;  %vm3848_vm9 = vmpackc.low %vm167_vm3, %vm166_vm2  ;;  %vm76_vm12 = vcmp.eq.s32.totalorder %v4131_v1, 2  ;;  %vm77_vm13 = vcmp.eq.s32.totalorder %v4133_v2, 2  ;;  %vm156_vm14 = vcmp.eq.s32.totalorder %v4131_v1, 10  ;;  %v4173_v7 = vld [vmem:[#allocation5 + $0x20] sm:$0xff] }
  0x21   :  { %3817 = vmatpush1.bf16.msk.msra.mxu0 %vm3816_vm4, %v4086_v5  ;;  %3849 = vmatpush1.bf16.msk.msra.mxu1 %vm3848_vm9, %v4086_v5  ;;  %vm3818_vm10 = vmpackc.low %vm85_vm6, %vm84_vm5  ;;  %vm157_vm15 = vcmp.eq.s32.totalorder %v4133_v2, 10  ;;  %vm74_vm2 = vcmp.eq.s32.totalorder %v4135_v3, 2  ;;  %vm75_vm3 = vcmp.eq.s32.totalorder %v4141_v4, 2  ;;  %vm154_vm4 = vcmp.eq.s32.totalorder %v4135_v3, 10  ;;  %v4177_v9 = vld [vmem:[#allocation5 + $0x28] sm:$0xff]  ;;  %v382_v12 = vld [vmem:[#allocation5 + $0x40] sm:$0xff] }
  0x22   :  { %2008 = vmatprep.subr.bf16.mxu0 %v4085_v0  ;;  %2313 = vmatprep.subr.bf16.mxu1 %v4085_v0  ;;  %vm3850_vm11 = vmpackc.low %vm165_vm8, %vm164_vm7  ;;  %vm155_vm5 = vcmp.eq.s32.totalorder %v4141_v4, 10  ;;  %vm66_vm8 = vcmp.eq.s32.totalorder %v4131_v1, 1  ;;  %vm67_vm9 = vcmp.eq.s32.totalorder %v4133_v2, 1  ;;  %v3545_v10 = vcombine.high %v4169_v6, %v4173_v7  ;;  %v386_v13 = vld [vmem:[#allocation5 + $0x60] sm:$0xff]  ;;  %v383_v14 = vld [vmem:[#allocation5 + $0x48] sm:$0xff] }
  0x23   :  { %vm3820_vm0 = vmpackc.low %vm77_vm13, %vm76_vm12  ;;  %v3547_v11 = vcombine.high %v4175_v8, %v4177_v9  ;;  %v387_v15 = vld [vmem:[#allocation5 + $0x68] sm:$0xff]  ;;  %v3544_v16 = vcombine.low %v4169_v6, %v4173_v7  ;;  %v3546_v17 = vcombine.low %v4175_v8, %v4177_v9  ;;  %v3553_v18 = vcombine.high %v382_v12, %v386_v13  ;;  %v390_v20 = vld [vmem:[#allocation5 + $0x80] sm:$0xff] }
  0x24   :  { %vm3852_vm1 = vmpackc.low %vm157_vm15, %vm156_vm14  ;;  %vm64_vm14 = vcmp.eq.s32.totalorder %v4135_v3, 1  ;;  %vm65_vm15 = vcmp.eq.s32.totalorder %v4141_v4, 1  ;;  %2038 = vmatprep.mubr.bf16.mxu0 %v3545_v10  ;;  %v3555_v19 = vcombine.high %v383_v14, %v387_v15  ;;  %v394_v21 = vld [vmem:[#allocation5 + $0xa0] sm:$0xff]  ;;  %v391_v22 = vld [vmem:[#allocation5 + $0x88] sm:$0xff]  ;;  %v3552_v24 = vcombine.low %v382_v12, %v386_v13 }
  0x25   :  { %3819 = vmatpush1.bf16.msk.msra.mxu0 %vm3818_vm10, %v4086_v5  ;;  %3851 = vmatpush1.bf16.msk.msra.mxu1 %vm3850_vm11, %v4086_v5  ;;  %vm3822_vm6 = vmpackc.low %vm75_vm3, %vm74_vm2  ;;  %vm146_vm10 = vcmp.eq.s32.totalorder %v4131_v1, 9  ;;  %vm147_vm11 = vcmp.eq.s32.totalorder %v4133_v2, 9  ;;  %v395_v23 = vld [vmem:[#allocation5 + $0xa8] sm:$0xff]  ;;  %v3554_v25 = vcombine.low %v383_v14, %v387_v15  ;;  %v3561_v26 = vcombine.high %v390_v20, %v394_v21  ;;  %v398_v28 = vld [vmem:[#allocation5 + $0xc0] sm:$0xff] }
  0x26   :  { %2010 = vmatprep.subr.bf16.mxu0 %v4085_v0  ;;  %2315 = vmatprep.subr.bf16.mxu1 %v4085_v0  ;;  %vm3854_vm7 = vmpackc.low %vm155_vm5, %vm154_vm4  ;;  %vm56_vm4 = vcmp.eq.s32.totalorder %v4131_v1, 0  ;;  %vm57_vm5 = vcmp.eq.s32.totalorder %v4133_v2, 0  ;;  %v3563_v27 = vcombine.high %v391_v22, %v395_v23  ;;  %v402_v29 = vld [vmem:[#allocation5 + $0xe0] sm:$0xff]  ;;  %v399_v30 = vld [vmem:[#allocation5 + $0xc8] sm:$0xff]  ;;  %v3560_v32 = vcombine.low %v390_v20, %v394_v21 }
  0x27   :  { %vm3824_vm12 = vmpackc.low %vm67_vm9, %vm66_vm8  ;;  %2343 = vmatprep.mubr.bf16.mxu1 %v3547_v11  ;;  %v403_v31 = vld [vmem:[#allocation5 + $0xe8] sm:$0xff]  ;;  %v3562_v33 = vcombine.low %v391_v22, %v395_v23  ;;  %v3569_v34 = vcombine.high %v398_v28, %v402_v29  ;;  %v406_v36 = vld [vmem:[#allocation5 + $0x100] sm:$0xff]  ;;  %v3568_v40 = vcombine.low %v398_v28, %v402_v29 }
  0x28   :  { %vm3856_vm13 = vmpackc.low %vm147_vm11, %vm146_vm10  ;;  %vm54_vm10 = vcmp.eq.s32.totalorder %v4135_v3, 0  ;;  %vm55_vm11 = vcmp.eq.s32.totalorder %v4141_v4, 0  ;;  %v3571_v35 = vcombine.high %v399_v30, %v403_v31  ;;  %v410_v37 = vld [vmem:[#allocation5 + $0x120] sm:$0xff]  ;;  %v407_v38 = vld [vmem:[#allocation5 + $0x108] sm:$0xff]  ;;  %v3570_v41 = vcombine.low %v399_v30, %v403_v31 }
  0x29   :  { %3821 = vmatpush1.bf16.msk.msra.mxu0 %vm3820_vm0, %v4086_v5  ;;  %3853 = vmatpush1.bf16.msk.msra.mxu1 %vm3852_vm1, %v4086_v5  ;;  %vm144_vm0 = vcmp.eq.s32.totalorder %v4135_v3, 9  ;;  %vm145_vm1 = vcmp.eq.s32.totalorder %v4141_v4, 9  ;;  %vm3826_vm2 = vmpackc.low %vm65_vm15, %vm64_vm14  ;;  %v411_v39 = vld [vmem:[#allocation5 + $0x128] sm:$0xff]  ;;  %v3577_v42 = vcombine.high %v406_v36, %v410_v37  ;;  %v414_v44 = vld [vmem:[#allocation5 + $0x140] sm:$0xff]  ;;  %v3576_v48 = vcombine.low %v406_v36, %v410_v37 }
  0x2a   :  { %2012 = vmatprep.subr.bf16.mxu0 %v4085_v0  ;;  %2317 = vmatprep.subr.bf16.mxu1 %v4085_v0  ;;  %vm3858_vm3 = vmpackc.low %vm145_vm1, %vm144_vm0  ;;  %vm126_vm0 = vcmp.eq.s32.totalorder %v4131_v1, 7  ;;  %vm127_vm1 = vcmp.eq.s32.totalorder %v4133_v2, 7  ;;  %v3579_v43 = vcombine.high %v407_v38, %v411_v39  ;;  %v418_v45 = vld [vmem:[#allocation5 + $0x160] sm:$0xff]  ;;  %v415_v46 = vld [vmem:[#allocation5 + $0x148] sm:$0xff]  ;;  %v3578_v49 = vcombine.low %v407_v38, %v411_v39 }
  0x2b   :  { %vm3828_vm8 = vmpackc.low %vm57_vm5, %vm56_vm4  ;;  %v419_v47 = vld [vmem:[#allocation5 + $0x168] sm:$0xff]  ;;  %v3585_v50 = vcombine.high %v414_v44, %v418_v45  ;;  %v422_v52 = vld [vmem:[#allocation5 + $0x180] sm:$0xff]  ;;  %v3584_v56 = vcombine.low %v414_v44, %v418_v45 }
  0x2c   :  { %vm3830_vm14 = vmpackc.low %vm55_vm11, %vm54_vm10  ;;  %v3587_v51 = vcombine.high %v415_v46, %v419_v47  ;;  %v426_v53 = vld [vmem:[#allocation5 + $0x1a0] sm:$0xff]  ;;  %v423_v54 = vld [vmem:[#allocation5 + $0x188] sm:$0xff]  ;;  %v3586_v57 = vcombine.low %v415_v46, %v419_v47 }
  0x2d   :  { %3823 = vmatpush1.bf16.msk.msra.mxu0 %vm3822_vm6, %v4086_v5  ;;  %3855 = vmatpush1.bf16.msk.msra.mxu1 %vm3854_vm7, %v4086_v5  ;;  %vm136_vm6 = vcmp.eq.s32.totalorder %v4131_v1, 8  ;;  %vm137_vm7 = vcmp.eq.s32.totalorder %v4133_v2, 8  ;;  %vm3832_vm4 = vmpackc.low %vm127_vm1, %vm126_vm0  ;;  %v427_v55 = vld [vmem:[#allocation5 + $0x1a8] sm:$0xff]  ;;  %v3593_v58 = vcombine.high %v422_v52, %v426_v53  ;;  %v430_v60 = vld [vmem:[#allocation5 + $0x1c0] sm:$0xff]  ;;  %v3592_v6 = vcombine.low %v422_v52, %v426_v53 }
  0x2e   :  { %2014 = vmatprep.subr.bf16.mxu0 %v4085_v0  ;;  %2319 = vmatprep.subr.bf16.mxu1 %v4085_v0  ;;  %vm3860_vm9 = vmpackc.low %vm137_vm7, %vm136_vm6  ;;  %vm124_vm6 = vcmp.eq.s32.totalorder %v4135_v3, 7  ;;  %vm125_vm7 = vcmp.eq.s32.totalorder %v4141_v4, 7  ;;  %v3595_v59 = vcombine.high %v423_v54, %v427_v55  ;;  %v434_v61 = vld [vmem:[#allocation5 + $0x1e0] sm:$0xff]  ;;  %v431_v62 = vld [vmem:[#allocation5 + $0x1c8] sm:$0xff]  ;;  %v3594_v7 = vcombine.low %v423_v54, %v427_v55 }
  0x2f   :  { %vm3834_vm10 = vmpackc.low %vm125_vm7, %vm124_vm6  ;;  %v435_v63 = vld [vmem:[#allocation5 + $0x1e8] sm:$0xff]  ;;  %v3601_v8 = vcombine.high %v430_v60, %v434_v61  ;;  %v438_v10 = vld [vmem:[#allocation5 + $0x200] sm:$0xff]  ;;  %v3600_v14 = vcombine.low %v430_v60, %v434_v61 }
  0x30   :  { %v3603_v9 = vcombine.high %v431_v62, %v435_v63  ;;  %v442_v11 = vld [vmem:[#allocation5 + $0x220] sm:$0xff]  ;;  %v439_v12 = vld [vmem:[#allocation5 + $0x208] sm:$0xff]  ;;  %v3602_v15 = vcombine.low %v431_v62, %v435_v63 }
  0x31   :  { %3825 = vmatpush1.bf16.msk.msra.mxu0 %vm3824_vm12, %v4086_v5  ;;  %3857 = vmatpush1.bf16.msk.msra.mxu1 %vm3856_vm13, %v4086_v5  ;;  %vm134_vm12 = vcmp.eq.s32.totalorder %v4135_v3, 8  ;;  %vm135_vm13 = vcmp.eq.s32.totalorder %v4141_v4, 8  ;;  %v443_v13 = vld [vmem:[#allocation5 + $0x228] sm:$0xff]  ;;  %v3608_v22 = vcombine.low %v438_v10, %v442_v11 }
  0x32   :  { %2016 = vmatprep.subr.bf16.mxu0 %v4085_v0  ;;  %2321 = vmatprep.subr.bf16.mxu1 %v4085_v0  ;;  %vm3862_vm15 = vmpackc.low %vm135_vm13, %vm134_vm12  ;;  %vm116_vm12 = vcmp.eq.s32.totalorder %v4131_v1, 6  ;;  %vm117_vm13 = vcmp.eq.s32.totalorder %v4133_v2, 6  ;;  %v447_v20 = vld [vmem:[#allocation5 + $0x248] sm:$0xff]  ;;  %v3610_v23 = vcombine.low %v439_v12, %v443_v13 }
  0x33   :  { %vm3836_vm0 = vmpackc.low %vm117_vm13, %vm116_vm12  ;;  %v451_v21 = vld [vmem:[#allocation5 + $0x268] sm:$0xff] }
  0x34   :  { %v455_v28 = vld [vmem:[#allocation5 + $0x288] sm:$0xff]  ;;  %v3618_v31 = vcombine.low %v447_v20, %v451_v21 }
  0x35   :  { %3827 = vmatpush1.bf16.msk.msra.mxu0 %vm3826_vm2, %v4086_v5  ;;  %3859 = vmatpush1.bf16.msk.msra.mxu1 %vm3858_vm3, %v4086_v5  ;;  %vm206_vm2 = vcmp.eq.s32.totalorder %v4131_v1, 15  ;;  %vm207_vm3 = vcmp.eq.s32.totalorder %v4133_v2, 15  ;;  %v459_v29 = vld [vmem:[#allocation5 + $0x2a8] sm:$0xff] }
  0x36   :  { %2018 = vmatprep.subr.bf16.mxu0 %v4085_v0  ;;  %2323 = vmatprep.subr.bf16.mxu1 %v4085_v0  ;;  %vm3864_vm5 = vmpackc.low %vm207_vm3, %vm206_vm2  ;;  %vm114_vm2 = vcmp.eq.s32.totalorder %v4135_v3, 6  ;;  %vm115_vm3 = vcmp.eq.s32.totalorder %v4141_v4, 6  ;;  %v463_v36 = vld [vmem:[#allocation5 + $0x2c8] sm:$0xff]  ;;  %v3626_v39 = vcombine.low %v455_v28, %v459_v29 }
  0x37   :  { %vm3838_vm6 = vmpackc.low %vm115_vm3, %vm114_vm2  ;;  %v467_v37 = vld [vmem:[#allocation5 + $0x2e8] sm:$0xff] }
  0x38   :  { %v471_v45 = vld [vmem:[#allocation5 + $0x308] sm:$0xff]  ;;  %v3634_v47 = vcombine.low %v463_v36, %v467_v37 }
  0x39   :  { %3829 = vmatpush1.bf16.msk.msra.mxu0 %vm3828_vm8, %v4086_v5  ;;  %3861 = vmatpush1.bf16.msk.msra.mxu1 %vm3860_vm9, %v4086_v5  ;;  %vm204_vm8 = vcmp.eq.s32.totalorder %v4135_v3, 15  ;;  %vm205_vm9 = vcmp.eq.s32.totalorder %v4141_v4, 15  ;;  %v475_v46 = vld [vmem:[#allocation5 + $0x328] sm:$0xff] }
  0x3a   :  { %2020 = vmatprep.subr.bf16.mxu0 %v4085_v0  ;;  %2325 = vmatprep.subr.bf16.mxu1 %v4085_v0  ;;  %vm3866_vm11 = vmpackc.low %vm205_vm9, %vm204_vm8  ;;  %vm106_vm8 = vcmp.eq.s32.totalorder %v4131_v1, 5  ;;  %vm107_vm9 = vcmp.eq.s32.totalorder %v4133_v2, 5  ;;  %v479_v53 = vld [vmem:[#allocation5 + $0x348] sm:$0xff]  ;;  %v3642_v55 = vcombine.low %v471_v45, %v475_v46 }
  0x3b   :  { %vm3840_vm12 = vmpackc.low %vm107_vm9, %vm106_vm8  ;;  %v483_v54 = vld [vmem:[#allocation5 + $0x368] sm:$0xff] }
  0x3c   :  { %v487_v61 = vld [vmem:[#allocation5 + $0x388] sm:$0xff]  ;;  %v3650_v63 = vcombine.low %v479_v53, %v483_v54 }
  0x3d   :  { %3831 = vmatpush1.bf16.msk.msra.mxu0 %vm3830_vm14, %v4086_v5  ;;  %3863 = vmatpush1.bf16.msk.msra.mxu1 %vm3862_vm15, %v4086_v5  ;;  %vm196_vm14 = vcmp.eq.s32.totalorder %v4131_v1, 14  ;;  %vm197_vm15 = vcmp.eq.s32.totalorder %v4133_v2, 14  ;;  %v491_v62 = vld [vmem:[#allocation5 + $0x3a8] sm:$0xff] }
  0x3e   :  { %2022 = vmatprep.subr.bf16.mxu0 %v4085_v0  ;;  %2327 = vmatprep.subr.bf16.mxu1 %v4085_v0  ;;  %vm3868_vm1 = vmpackc.low %vm197_vm15, %vm196_vm14  ;;  %vm104_vm14 = vcmp.eq.s32.totalorder %v4135_v3, 5  ;;  %vm105_vm15 = vcmp.eq.s32.totalorder %v4141_v4, 5 }
  0x3f   :  { %vm3842_vm2 = vmpackc.low %vm105_vm15, %vm104_vm14 }
  0x41   :  { %3833 = vmatpush2.bf16.msk.msra.mxu0 %vm3832_vm4, %v4086_v5  ;;  %3865 = vmatpush2.bf16.msk.msra.mxu1 %vm3864_vm5, %v4086_v5  ;;  %vm194_vm4 = vcmp.eq.s32.totalorder %v4135_v3, 14  ;;  %vm195_vm5 = vcmp.eq.s32.totalorder %v4141_v4, 14 }
  0x42   :  { %2024 = vmatprep.subr.bf16.mxu0 %v4085_v0  ;;  %2329 = vmatprep.subr.bf16.mxu1 %v4085_v0  ;;  %vm3870_vm7 = vmpackc.low %vm195_vm5, %vm194_vm4  ;;  %vm96_vm4 = vcmp.eq.s32.totalorder %v4131_v1, 4  ;;  %vm97_vm5 = vcmp.eq.s32.totalorder %v4133_v2, 4 }
  0x43   :  { %vm3844_vm8 = vmpackc.low %vm97_vm5, %vm96_vm4 }
  0x45   :  { %3835 = vmatpush2.bf16.msk.msra.mxu0 %vm3834_vm10, %v4086_v5  ;;  %3867 = vmatpush2.bf16.msk.msra.mxu1 %vm3866_vm11, %v4086_v5  ;;  %vm186_vm10 = vcmp.eq.s32.totalorder %v4131_v1, 13  ;;  %vm187_vm11 = vcmp.eq.s32.totalorder %v4133_v2, 13 }
  0x46   :  { %2026 = vmatprep.subr.bf16.mxu0 %v4085_v0  ;;  %2331 = vmatprep.subr.bf16.mxu1 %v4085_v0  ;;  %vm3872_vm13 = vmpackc.low %vm187_vm11, %vm186_vm10  ;;  %vm94_vm10 = vcmp.eq.s32.totalorder %v4135_v3, 4  ;;  %vm95_vm11 = vcmp.eq.s32.totalorder %v4141_v4, 4 }
  0x47   :  { %vm3846_vm14 = vmpackc.low %vm95_vm11, %vm94_vm10 }
  0x49   :  { %3837 = vmatpush2.bf16.msk.msra.mxu0 %vm3836_vm0, %v4086_v5  ;;  %3869 = vmatpush2.bf16.msk.msra.mxu1 %vm3868_vm1, %v4086_v5  ;;  %vm184_vm0 = vcmp.eq.s32.totalorder %v4135_v3, 13  ;;  %vm185_vm1 = vcmp.eq.s32.totalorder %v4141_v4, 13 }
  0x4a   :  { %2028 = vmatprep.subr.bf16.mxu0 %v4085_v0  ;;  %2333 = vmatprep.subr.bf16.mxu1 %v4085_v0  ;;  %vm3874_vm3 = vmpackc.low %vm185_vm1, %vm184_vm0  ;;  %vm246_vm0 = vcmp.eq.s32.totalorder %v4131_v1, 19  ;;  %vm247_vm1 = vcmp.eq.s32.totalorder %v4133_v2, 19 }
  0x4b   :  { %vm3880_vm4 = vmpackc.low %vm247_vm1, %vm246_vm0 }
  0x4d   :  { %3839 = vmatpush2.bf16.msk.msra.mxu0 %vm3838_vm6, %v4086_v5  ;;  %3871 = vmatpush2.bf16.msk.msra.mxu1 %vm3870_vm7, %v4086_v5  ;;  %vm176_vm6 = vcmp.eq.s32.totalorder %v4131_v1, 12  ;;  %vm177_vm7 = vcmp.eq.s32.totalorder %v4133_v2, 12 }
  0x4e   :  { %2030 = vmatprep.subr.bf16.mxu0 %v4085_v0  ;;  %2335 = vmatprep.subr.bf16.mxu1 %v4085_v0  ;;  %vm3876_vm9 = vmpackc.low %vm177_vm7, %vm176_vm6  ;;  %vm244_vm6 = vcmp.eq.s32.totalorder %v4135_v3, 19  ;;  %vm245_vm7 = vcmp.eq.s32.totalorder %v4141_v4, 19 }
  0x4f   :  { %vm3882_vm10 = vmpackc.low %vm245_vm7, %vm244_vm6 }
  0x51   :  { %3841 = vmatpush2.bf16.msk.msra.mxu0 %vm3840_vm12, %v4086_v5  ;;  %3873 = vmatpush2.bf16.msk.msra.mxu1 %vm3872_vm13, %v4086_v5  ;;  %vm174_vm12 = vcmp.eq.s32.totalorder %v4135_v3, 12  ;;  %vm175_vm13 = vcmp.eq.s32.totalorder %v4141_v4, 12 }
  0x52   :  { %2032 = vmatprep.subr.bf16.mxu0 %v4085_v0  ;;  %2337 = vmatprep.subr.bf16.mxu1 %v4085_v0  ;;  %vm3878_vm15 = vmpackc.low %vm175_vm13, %vm174_vm12  ;;  %vm236_vm12 = vcmp.eq.s32.totalorder %v4131_v1, 18  ;;  %vm237_vm13 = vcmp.eq.s32.totalorder %v4133_v2, 18 }
  0x53   :  { %vm3884_vm0 = vmpackc.low %vm237_vm13, %vm236_vm12 }
  0x55   :  { %3843 = vmatpush2.bf16.msk.msra.mxu0 %vm3842_vm2, %v4086_v5  ;;  %3875 = vmatpush2.bf16.msk.msra.mxu1 %vm3874_vm3, %v4086_v5  ;;  %vm326_vm2 = vcmp.eq.s32.totalorder %v4131_v1, 27  ;;  %vm327_vm3 = vcmp.eq.s32.totalorder %v4133_v2, 27 }
  0x56   :  { %2034 = vmatprep.subr.bf16.mxu0 %v4085_v0  ;;  %2339 = vmatprep.subr.bf16.mxu1 %v4085_v0  ;;  %vm3912_vm5 = vmpackc.low %vm327_vm3, %vm326_vm2  ;;  %vm234_vm2 = vcmp.eq.s32.totalorder %v4135_v3, 18  ;;  %vm235_vm3 = vcmp.eq.s32.totalorder %v4141_v4, 18 }
  0x57   :  { %vm3886_vm6 = vmpackc.low %vm235_vm3, %vm234_vm2 }
  0x59   :  { %3845 = vmatpush2.bf16.msk.msra.mxu0 %vm3844_vm8, %v4086_v5  ;;  %3877 = vmatpush2.bf16.msk.msra.mxu1 %vm3876_vm9, %v4086_v5  ;;  %vm324_vm8 = vcmp.eq.s32.totalorder %v4135_v3, 27  ;;  %vm325_vm9 = vcmp.eq.s32.totalorder %v4141_v4, 27 }
  0x5a   :  { %2036 = vmatprep.subr.bf16.mxu0 %v4085_v0  ;;  %2341 = vmatprep.subr.bf16.mxu1 %v4085_v0  ;;  %vm3914_vm11 = vmpackc.low %vm325_vm9, %vm324_vm8  ;;  %vm226_vm8 = vcmp.eq.s32.totalorder %v4131_v1, 17  ;;  %vm227_vm9 = vcmp.eq.s32.totalorder %v4133_v2, 17 }
  0x5b   :  { %vm3888_vm12 = vmpackc.low %vm227_vm9, %vm226_vm8 }
  0x5d   :  { %3847 = vmatpush2.bf16.msk.msra.mxu0 %vm3846_vm14, %v4086_v5  ;;  %3879 = vmatpush2.bf16.msk.msra.mxu1 %vm3878_vm15, %v4086_v5  ;;  %vm316_vm14 = vcmp.eq.s32.totalorder %v4131_v1, 26  ;;  %vm317_vm15 = vcmp.eq.s32.totalorder %v4133_v2, 26 }
  0x5e   :  { %2616 = vmatprep.subr.bf16.mxu0 %v4085_v0  ;;  %2921 = vmatprep.subr.bf16.mxu1 %v4085_v0  ;;  %vm3916_vm1 = vmpackc.low %vm317_vm15, %vm316_vm14  ;;  %vm224_vm14 = vcmp.eq.s32.totalorder %v4135_v3, 17  ;;  %vm225_vm15 = vcmp.eq.s32.totalorder %v4141_v4, 17 }
  0x5f   :  { %vm3890_vm2 = vmpackc.low %vm225_vm15, %vm224_vm14 }
  0x60   :  { %2039 = vmatmul.mubr.bf16.vlgmr.msra.gmra.mxu0 %v3544_v16  ;;  %2344 = vmatmul.mubr.bf16.vlgmr.msra.gmra.mxu1 %v3546_v17  ;;  %v3609_v16 = vcombine.high %v438_v10, %v442_v11  ;;  %v3611_v17 = vcombine.high %v439_v12, %v443_v13  ;;  %v495_v11 = vld [vmem:[#allocation5 + $0x3c8] sm:$0xff]  ;;  %v3658_v13 = vcombine.low %v487_v61, %v491_v62 }
  0x61   :  { %2046 = vmatprep.mubr.bf16.mxu0 %v3553_v18  ;;  %2351 = vmatprep.mubr.bf16.mxu1 %v3555_v19  ;;  %v446_v18 = vld [vmem:[#allocation5 + $0x240] sm:$0xff]  ;;  %v499_v12 = vld [vmem:[#allocation5 + $0x3e8] sm:$0xff] }
  0x62   :  { %v450_v19 = vld [vmem:[#allocation5 + $0x260] sm:$0xff]  ;;  %3881 = vmatpush1.bf16.msk.msra.mxu0 %vm3880_vm4, %v4086_v5  ;;  %3913 = vmatpush1.bf16.msk.msra.mxu1 %vm3912_vm5, %v4086_v5  ;;  %vm314_vm4 = vcmp.eq.s32.totalorder %v4135_v3, 26  ;;  %vm315_vm5 = vcmp.eq.s32.totalorder %v4141_v4, 26 }
  0x63   :  { %v3616_v30 = vcombine.low %v446_v18, %v450_v19  ;;  %2618 = vmatprep.subr.bf16.mxu0 %v4085_v0  ;;  %2923 = vmatprep.subr.bf16.mxu1 %v4085_v0  ;;  %vm3918_vm7 = vmpackc.low %vm315_vm5, %vm314_vm4  ;;  %vm216_vm4 = vcmp.eq.s32.totalorder %v4131_v1, 16  ;;  %vm217_vm5 = vcmp.eq.s32.totalorder %v4133_v2, 16 }
  0x64   :  { %vm3892_vm8 = vmpackc.low %vm217_vm5, %vm216_vm4 }
  0x66   :  { %3883 = vmatpush1.bf16.msk.msra.mxu0 %vm3882_vm10, %v4086_v5  ;;  %3915 = vmatpush1.bf16.msk.msra.mxu1 %vm3914_vm11, %v4086_v5  ;;  %vm306_vm10 = vcmp.eq.s32.totalorder %v4131_v1, 25  ;;  %vm307_vm11 = vcmp.eq.s32.totalorder %v4133_v2, 25 }
  0x67   :  { %2620 = vmatprep.subr.bf16.mxu0 %v4085_v0  ;;  %2925 = vmatprep.subr.bf16.mxu1 %v4085_v0  ;;  %vm3920_vm13 = vmpackc.low %vm307_vm11, %vm306_vm10  ;;  %vm214_vm10 = vcmp.eq.s32.totalorder %v4135_v3, 16  ;;  %vm215_vm11 = vcmp.eq.s32.totalorder %v4141_v4, 16 }
  0x68   :  { %2047 = vmatmul.mubr.bf16.gmra.mxu0 %v3552_v24  ;;  %2352 = vmatmul.mubr.bf16.gmra.mxu1 %v3554_v25  ;;  %v3617_v24 = vcombine.high %v446_v18, %v450_v19  ;;  %v3619_v25 = vcombine.high %v447_v20, %v451_v21  ;;  %vm3894_vm14 = vmpackc.low %vm215_vm11, %vm214_vm10  ;;  %v503_v19 = vld [vmem:[#allocation5 + $0x408] sm:$0xff]  ;;  %v3666_v21 = vcombine.low %v495_v11, %v499_v12 }
  0x69   :  { %2054 = vmatprep.mubr.bf16.mxu0 %v3561_v26  ;;  %2359 = vmatprep.mubr.bf16.mxu1 %v3563_v27  ;;  %v454_v26 = vld [vmem:[#allocation5 + $0x280] sm:$0xff]  ;;  %v507_v20 = vld [vmem:[#allocation5 + $0x428] sm:$0xff] }
  0x6a   :  { %v458_v27 = vld [vmem:[#allocation5 + $0x2a0] sm:$0xff]  ;;  %3885 = vmatpush1.bf16.msk.msra.mxu0 %vm3884_vm0, %v4086_v5  ;;  %3917 = vmatpush1.bf16.msk.msra.mxu1 %vm3916_vm1, %v4086_v5  ;;  %vm304_vm0 = vcmp.eq.s32.totalorder %v4135_v3, 25  ;;  %vm305_vm1 = vcmp.eq.s32.totalorder %v4141_v4, 25 }
  0x6b   :  { %v3624_v38 = vcombine.low %v454_v26, %v458_v27  ;;  %2622 = vmatprep.subr.bf16.mxu0 %v4085_v0  ;;  %2927 = vmatprep.subr.bf16.mxu1 %v4085_v0  ;;  %vm3922_vm3 = vmpackc.low %vm305_vm1, %vm304_vm0  ;;  %vm286_vm0 = vcmp.eq.s32.totalorder %v4131_v1, 23  ;;  %vm287_vm1 = vcmp.eq.s32.totalorder %v4133_v2, 23 }
  0x6c   :  { %vm3896_vm4 = vmpackc.low %vm287_vm1, %vm286_vm0 }
  0x6e   :  { %3887 = vmatpush1.bf16.msk.msra.mxu0 %vm3886_vm6, %v4086_v5  ;;  %3919 = vmatpush1.bf16.msk.msra.mxu1 %vm3918_vm7, %v4086_v5  ;;  %vm296_vm6 = vcmp.eq.s32.totalorder %v4131_v1, 24  ;;  %vm297_vm7 = vcmp.eq.s32.totalorder %v4133_v2, 24 }
  0x6f   :  { %2624 = vmatprep.subr.bf16.mxu0 %v4085_v0  ;;  %2929 = vmatprep.subr.bf16.mxu1 %v4085_v0  ;;  %vm3924_vm9 = vmpackc.low %vm297_vm7, %vm296_vm6  ;;  %vm284_vm6 = vcmp.eq.s32.totalorder %v4135_v3, 23  ;;  %vm285_vm7 = vcmp.eq.s32.totalorder %v4141_v4, 23 }
  0x70   :  { %2055 = vmatmul.mubr.bf16.gmra.mxu0 %v3560_v32  ;;  %2360 = vmatmul.mubr.bf16.gmra.mxu1 %v3562_v33  ;;  %v3625_v32 = vcombine.high %v454_v26, %v458_v27  ;;  %v3627_v33 = vcombine.high %v455_v28, %v459_v29  ;;  %vm3898_vm10 = vmpackc.low %vm285_vm7, %vm284_vm6  ;;  %v511_v27 = vld [vmem:[#allocation5 + $0x448] sm:$0xff]  ;;  %v3674_v29 = vcombine.low %v503_v19, %v507_v20 }
  0x71   :  { %2062 = vmatprep.mubr.bf16.mxu0 %v3569_v34  ;;  %2367 = vmatprep.mubr.bf16.mxu1 %v3571_v35  ;;  %v462_v34 = vld [vmem:[#allocation5 + $0x2c0] sm:$0xff]  ;;  %v515_v28 = vld [vmem:[#allocation5 + $0x468] sm:$0xff] }
  0x72   :  { %v466_v35 = vld [vmem:[#allocation5 + $0x2e0] sm:$0xff]  ;;  %3889 = vmatpush1.bf16.msk.msra.mxu0 %vm3888_vm12, %v4086_v5  ;;  %3921 = vmatpush1.bf16.msk.msra.mxu1 %vm3920_vm13, %v4086_v5  ;;  %vm294_vm12 = vcmp.eq.s32.totalorder %v4135_v3, 24  ;;  %vm295_vm13 = vcmp.eq.s32.totalorder %v4141_v4, 24 }
  0x73   :  { %v3632_v44 = vcombine.low %v462_v34, %v466_v35  ;;  %2626 = vmatprep.subr.bf16.mxu0 %v4085_v0  ;;  %2931 = vmatprep.subr.bf16.mxu1 %v4085_v0  ;;  %vm3926_vm15 = vmpackc.low %vm295_vm13, %vm294_vm12  ;;  %vm276_vm12 = vcmp.eq.s32.totalorder %v4131_v1, 22  ;;  %vm277_vm13 = vcmp.eq.s32.totalorder %v4133_v2, 22 }
  0x74   :  { %vm3900_vm0 = vmpackc.low %vm277_vm13, %vm276_vm12 }
  0x76   :  { %3891 = vmatpush1.bf16.msk.msra.mxu0 %vm3890_vm2, %v4086_v5  ;;  %3923 = vmatpush1.bf16.msk.msra.mxu1 %vm3922_vm3, %v4086_v5  ;;  %vm366_vm2 = vcmp.eq.s32.totalorder %v4131_v1, 31  ;;  %vm367_vm3 = vcmp.eq.s32.totalorder %v4133_v2, 31 }
  0x77   :  { %2628 = vmatprep.subr.bf16.mxu0 %v4085_v0  ;;  %2933 = vmatprep.subr.bf16.mxu1 %v4085_v0  ;;  %vm3928_vm5 = vmpackc.low %vm367_vm3, %vm366_vm2  ;;  %vm274_vm2 = vcmp.eq.s32.totalorder %v4135_v3, 22  ;;  %vm275_vm3 = vcmp.eq.s32.totalorder %v4141_v4, 22 }
  0x78   :  { %2063 = vmatmul.mubr.bf16.gmra.mxu0 %v3568_v40  ;;  %2368 = vmatmul.mubr.bf16.gmra.mxu1 %v3570_v41  ;;  %v3633_v40 = vcombine.high %v462_v34, %v466_v35  ;;  %v3635_v41 = vcombine.high %v463_v36, %v467_v37  ;;  %vm3902_vm6 = vmpackc.low %vm275_vm3, %vm274_vm2  ;;  %v523_v34 = vld [vmem:[#allocation5 + $0x4a8] sm:$0xff]  ;;  %v3682_v35 = vcombine.low %v511_v27, %v515_v28 }
  0x79   :  { %2070 = vmatprep.mubr.bf16.mxu0 %v3577_v42  ;;  %2375 = vmatprep.mubr.bf16.mxu1 %v3579_v43  ;;  %v470_v42 = vld [vmem:[#allocation5 + $0x300] sm:$0xff] }
  0x7a   :  { %v474_v43 = vld [vmem:[#allocation5 + $0x320] sm:$0xff]  ;;  %3893 = vmatpush1.bf16.msk.msra.mxu0 %vm3892_vm8, %v4086_v5  ;;  %3925 = vmatpush1.bf16.msk.msra.mxu1 %vm3924_vm9, %v4086_v5  ;;  %vm364_vm8 = vcmp.eq.s32.totalorder %v4135_v3, 31  ;;  %vm365_vm9 = vcmp.eq.s32.totalorder %v4141_v4, 31 }
  0x7b   :  { %v3640_v52 = vcombine.low %v470_v42, %v474_v43  ;;  %2630 = vmatprep.subr.bf16.mxu0 %v4085_v0  ;;  %2935 = vmatprep.subr.bf16.mxu1 %v4085_v0  ;;  %vm3930_vm11 = vmpackc.low %vm365_vm9, %vm364_vm8  ;;  %vm266_vm8 = vcmp.eq.s32.totalorder %v4131_v1, 21  ;;  %vm267_vm9 = vcmp.eq.s32.totalorder %v4133_v2, 21 }
  0x7c   :  { %vm3904_vm12 = vmpackc.low %vm267_vm9, %vm266_vm8 }
  0x7e   :  { %3895 = vmatpush1.bf16.msk.msra.mxu0 %vm3894_vm14, %v4086_v5  ;;  %3927 = vmatpush1.bf16.msk.msra.mxu1 %vm3926_vm15, %v4086_v5  ;;  %vm356_vm14 = vcmp.eq.s32.totalorder %v4131_v1, 30  ;;  %vm357_vm15 = vcmp.eq.s32.totalorder %v4133_v2, 30 }
  0x7f   :  { %2632 = vmatprep.subr.bf16.mxu0 %v4085_v0  ;;  %2937 = vmatprep.subr.bf16.mxu1 %v4085_v0  ;;  %vm3932_vm1 = vmpackc.low %vm357_vm15, %vm356_vm14 }
  0x80   :  { %2071 = vmatmul.mubr.bf16.gmra.mxu0 %v3576_v48  ;;  %2376 = vmatmul.mubr.bf16.gmra.mxu1 %v3578_v49  ;;  %v3641_v48 = vcombine.high %v470_v42, %v474_v43  ;;  %v3643_v49 = vcombine.high %v471_v45, %v475_v46  ;;  %v527_v43 = vld [vmem:[#allocation5 + $0x4c8] sm:$0xff] }
  0x81   :  { %2078 = vmatprep.mubr.bf16.mxu0 %v3585_v50  ;;  %2383 = vmatprep.mubr.bf16.mxu1 %v3587_v51  ;;  %v478_v50 = vld [vmem:[#allocation5 + $0x340] sm:$0xff] }
  0x82   :  { %v482_v51 = vld [vmem:[#allocation5 + $0x360] sm:$0xff]  ;;  %3897 = vmatpush2.bf16.msk.msra.mxu0 %vm3896_vm4, %v4086_v5  ;;  %3929 = vmatpush2.bf16.msk.msra.mxu1 %vm3928_vm5, %v4086_v5  ;;  %vm354_vm4 = vcmp.eq.s32.totalorder %v4135_v3, 30  ;;  %vm355_vm5 = vcmp.eq.s32.totalorder %v4141_v4, 30 }
  0x83   :  { %v3648_v60 = vcombine.low %v478_v50, %v482_v51  ;;  %2634 = vmatprep.subr.bf16.mxu0 %v4085_v0  ;;  %2939 = vmatprep.subr.bf16.mxu1 %v4085_v0  ;;  %vm3934_vm7 = vmpackc.low %vm355_vm5, %vm354_vm4  ;;  %v518_v3 = vld [vmem:[#allocation5 + $0x480] sm:$0xff] }
  0x84   :  { %v522_v4 = vld [vmem:[#allocation5 + $0x4a0] sm:$0xff] }
  0x85   :  { %v3689_v36 = vcombine.high %v518_v3, %v522_v4  ;;  %v3688_v42 = vcombine.low %v518_v3, %v522_v4 }
  0x86   :  { %3899 = vmatpush2.bf16.msk.msra.mxu0 %vm3898_vm10, %v4086_v5  ;;  %3931 = vmatpush2.bf16.msk.msra.mxu1 %vm3930_vm11, %v4086_v5  ;;  %vm346_vm10 = vcmp.eq.s32.totalorder %v4131_v1, 29  ;;  %vm347_vm11 = vcmp.eq.s32.totalorder %v4133_v2, 29  ;;  %v4009_v1 = vld [vmem:[#allocation2] sm:$0xff]  ;;  %v4010_v2 = vld [vmem:[#allocation2 + $0x8] sm:$0xff] }
  0x87   :  { %2636 = vmatprep.subr.bf16.mxu0 %v4085_v0  ;;  %2941 = vmatprep.subr.bf16.mxu1 %v4085_v0  ;;  %vm3936_vm13 = vmpackc.low %vm347_vm11, %vm346_vm10  ;;  %vm264_vm14 = vcmp.eq.s32.totalorder %v4009_v1, 21  ;;  %vm265_vm15 = vcmp.eq.s32.totalorder %v4010_v2, 21  ;;  %vm254_vm10 = vcmp.eq.s32.totalorder %v4009_v1, 20  ;;  %vm255_vm11 = vcmp.eq.s32.totalorder %v4010_v2, 20 }
  0x88   :  { %2079 = vmatmul.mubr.bf16.gmra.mxu0 %v3584_v56  ;;  %2384 = vmatmul.mubr.bf16.gmra.mxu1 %v3586_v57  ;;  %v3649_v56 = vcombine.high %v478_v50, %v482_v51  ;;  %v3651_v57 = vcombine.high %v479_v53, %v483_v54  ;;  %vm3906_vm2 = vmpackc.low %vm265_vm15, %vm264_vm14  ;;  %v539_v50 = vld [vmem:[#allocation5 + $0x528] sm:$0xff] }
  0x89   :  { %2086 = vmatprep.mubr.bf16.mxu0 %v3593_v58  ;;  %2391 = vmatprep.mubr.bf16.mxu1 %v3595_v59  ;;  %v486_v58 = vld [vmem:[#allocation5 + $0x380] sm:$0xff]  ;;  %vm3910_vm14 = vmpackc.low %vm255_vm11, %vm254_vm10 }
  0x8a   :  { %v490_v59 = vld [vmem:[#allocation5 + $0x3a0] sm:$0xff]  ;;  %3901 = vmatpush2.bf16.msk.msra.mxu0 %vm3900_vm0, %v4086_v5  ;;  %3933 = vmatpush2.bf16.msk.msra.mxu1 %vm3932_vm1, %v4086_v5  ;;  %vm344_vm0 = vcmp.eq.s32.totalorder %v4009_v1, 29  ;;  %vm345_vm1 = vcmp.eq.s32.totalorder %v4010_v2, 29 }
  0x8b   :  { %v3656_v10 = vcombine.low %v486_v58, %v490_v59  ;;  %2638 = vmatprep.subr.bf16.mxu0 %v4085_v0  ;;  %2943 = vmatprep.subr.bf16.mxu1 %v4085_v0  ;;  %vm3938_vm3 = vmpackc.low %vm345_vm1, %vm344_vm0  ;;  %vm3400_vm0 = vcmask 261120  }
  0x8e   :  { %3903 = vmatpush2.bf16.msk.msra.mxu0 %vm3902_vm6, %v4086_v5  ;;  %3935 = vmatpush2.bf16.msk.msra.mxu1 %vm3934_vm7, %v4086_v5 }
  0x8f   :  { %2640 = vmatprep.subr.bf16.mxu0 %v4085_v0  ;;  %2945 = vmatprep.subr.bf16.mxu1 %v4085_v0 }
  0x90   :  { %2087 = vmatmul.mubr.bf16.gmra.mxu0 %v3592_v6  ;;  %2392 = vmatmul.mubr.bf16.gmra.mxu1 %v3594_v7  ;;  %v3657_v6 = vcombine.high %v486_v58, %v490_v59  ;;  %v3659_v7 = vcombine.high %v487_v61, %v491_v62  ;;  %v550_v62 = vld [vmem:[#allocation5 + $0x580] sm:$0xff] }
  0x91   :  { %2094 = vmatprep.mubr.bf16.mxu0 %v3601_v8  ;;  %2399 = vmatprep.mubr.bf16.mxu1 %v3603_v9  ;;  %v494_v8 = vld [vmem:[#allocation5 + $0x3c0] sm:$0xff] }
  0x92   :  { %v498_v9 = vld [vmem:[#allocation5 + $0x3e0] sm:$0xff]  ;;  %3905 = vmatpush2.bf16.msk.msra.mxu0 %vm3904_vm12, %v4086_v5  ;;  %3937 = vmatpush2.bf16.msk.msra.mxu1 %vm3936_vm13, %v4086_v5  ;;  %vm334_vm12 = vcmp.eq.s32.totalorder %v4009_v1, 28  ;;  %vm335_vm13 = vcmp.eq.s32.totalorder %v4010_v2, 28 }
  0x93   :  { %v3664_v18 = vcombine.low %v494_v8, %v498_v9  ;;  %2642 = vmatprep.subr.bf16.mxu0 %v4085_v0  ;;  %2947 = vmatprep.subr.bf16.mxu1 %v4085_v0  ;;  %vm3942_vm15 = vmpackc.low %vm335_vm13, %vm334_vm12 }
  0x96   :  { %3907 = vmatpush2.bf16.msk.msra.mxu0 %vm3906_vm2, %v4086_v5  ;;  %3939 = vmatpush2.bf16.msk.msra.mxu1 %vm3938_vm3, %v4086_v5 }
  0x97   :  { %2644 = vmatprep.subr.bf16.mxu0 %v4085_v0  ;;  %2949 = vmatprep.subr.bf16.mxu1 %v4085_v0 }
  0x98   :  { %2095 = vmatmul.mubr.bf16.gmra.mxu0 %v3600_v14  ;;  %2400 = vmatmul.mubr.bf16.gmra.mxu1 %v3602_v15  ;;  %v3665_v14 = vcombine.high %v494_v8, %v498_v9  ;;  %v3667_v15 = vcombine.high %v495_v11, %v499_v12  ;;  %v558_v12 = vld [vmem:[#allocation5 + $0x5c0] sm:$0xff] }
  0x99   :  { %2102 = vmatprep.mubr.bf16.mxu0 %v3609_v16  ;;  %2407 = vmatprep.mubr.bf16.mxu1 %v3611_v17  ;;  %v502_v16 = vld [vmem:[#allocation5 + $0x400] sm:$0xff] }
  0x9a   :  { %v506_v17 = vld [vmem:[#allocation5 + $0x420] sm:$0xff] }
  0x9b   :  { %v3672_v26 = vcombine.low %v502_v16, %v506_v17 }
  0xa0   :  { %2103 = vmatmul.mubr.bf16.gmra.mxu0 %v3608_v22  ;;  %2408 = vmatmul.mubr.bf16.gmra.mxu1 %v3610_v23  ;;  %v3673_v22 = vcombine.high %v502_v16, %v506_v17  ;;  %v3675_v23 = vcombine.high %v503_v19, %v507_v20  ;;  %v566_v20 = vld [vmem:[#allocation5 + $0x600] sm:$0xff] }
  0xa1   :  { %2110 = vmatprep.mubr.bf16.mxu0 %v3617_v24  ;;  %2415 = vmatprep.mubr.bf16.mxu1 %v3619_v25  ;;  %v510_v24 = vld [vmem:[#allocation5 + $0x440] sm:$0xff] }
  0xa2   :  { %v514_v25 = vld [vmem:[#allocation5 + $0x460] sm:$0xff] }
  0xa8   :  { %2111 = vmatmul.mubr.bf16.gmra.mxu0 %v3616_v30  ;;  %2416 = vmatmul.mubr.bf16.gmra.mxu1 %v3618_v31  ;;  %v3681_v30 = vcombine.high %v510_v24, %v514_v25  ;;  %v3683_v31 = vcombine.high %v511_v27, %v515_v28  ;;  %v574_v28 = vld [vmem:[#allocation5 + $0x640] sm:$0xff] }
  0xa9   :  { %2118 = vmatprep.mubr.bf16.mxu0 %v3625_v32  ;;  %2423 = vmatprep.mubr.bf16.mxu1 %v3627_v33  ;;  %v3680_v32 = vcombine.low %v510_v24, %v514_v25  ;;  %v519_v33 = vld [vmem:[#allocation5 + $0x488] sm:$0xff] }
  0xaa   :  { %v3691_v37 = vcombine.high %v519_v33, %v523_v34  ;;  %v3690_v45 = vcombine.low %v519_v33, %v523_v34 }
  0xb0   :  { %2119 = vmatmul.mubr.bf16.gmra.mxu0 %v3624_v38  ;;  %2424 = vmatmul.mubr.bf16.gmra.mxu1 %v3626_v39  ;;  %v4011_v38 = vld [vmem:[#allocation2 + $0x10] sm:$0xff]  ;;  %v4012_v39 = vld [vmem:[#allocation2 + $0x18] sm:$0xff] }
  0xb1   :  { %2126 = vmatprep.mubr.bf16.mxu0 %v3633_v40  ;;  %2431 = vmatprep.mubr.bf16.mxu1 %v3635_v41  ;;  %vm256_vm4 = vcmp.eq.s32.totalorder %v4011_v38, 20  ;;  %vm257_vm5 = vcmp.eq.s32.totalorder %v4012_v39, 20  ;;  %vm336_vm6 = vcmp.eq.s32.totalorder %v4011_v38, 28  ;;  %vm337_vm7 = vcmp.eq.s32.totalorder %v4012_v39, 28  ;;  %v526_v40 = vld [vmem:[#allocation5 + $0x4c0] sm:$0xff]  ;;  %v583_v39 = vld [vmem:[#allocation5 + $0x688] sm:$0xff] }
  0xb2   :  { %vm3908_vm8 = vmpackc.low %vm257_vm5, %vm256_vm4  ;;  %v530_v41 = vld [vmem:[#allocation5 + $0x4e0] sm:$0xff] }
  0xb3   :  { %3909 = vmatpush2.bf16.msk.msra.mxu0 %vm3908_vm8, %v4086_v5  ;;  %vm3940_vm9 = vmpackc.low %vm337_vm7, %vm336_vm6  ;;  %v3697_v46 = vcombine.high %v526_v40, %v530_v41  ;;  %v3696_v51 = vcombine.low %v526_v40, %v530_v41  ;;  %v587_v40 = vld [vmem:[#allocation5 + $0x6a8] sm:$0xff] }
  0xb4   :  { %3941 = vmatpush2.bf16.msk.msra.mxu1 %vm3940_vm9, %v4086_v5  ;;  %2646 = vmatprep.subr.bf16.mxu0 %v4085_v0 }
  0xb5   :  { %2951 = vmatprep.subr.bf16.mxu1 %v4085_v0  ;;  %v535_v0 = vld [vmem:[#allocation5 + $0x508] sm:$0xff] }
  0xb6   :  { %v3707_v54 = vcombine.high %v535_v0, %v539_v50  ;;  %v3706_v59 = vcombine.low %v535_v0, %v539_v50 }
  0xb7   :  { %3911 = vmatpush2.bf16.msk.msra.mxu0 %vm3910_vm14, %v4086_v5 }
  0xb8   :  { %2127 = vmatmul.mubr.bf16.gmra.mxu0 %v3632_v44  ;;  %2432 = vmatmul.mubr.bf16.gmra.mxu1 %v3634_v47  ;;  %v531_v44 = vld [vmem:[#allocation5 + $0x4e8] sm:$0xff] }
  0xb9   :  { %2134 = vmatprep.mubr.bf16.mxu0 %v3641_v48  ;;  %2439 = vmatprep.mubr.bf16.mxu1 %v3643_v49  ;;  %v3699_v47 = vcombine.high %v527_v43, %v531_v44  ;;  %v534_v48 = vld [vmem:[#allocation5 + $0x500] sm:$0xff] }
  0xba   :  { %3943 = vmatpush2.bf16.msk.msra.mxu1 %vm3942_vm15, %v4086_v5  ;;  %v538_v49 = vld [vmem:[#allocation5 + $0x520] sm:$0xff]  ;;  %v547_v5 = vld [vmem:[#allocation5 + $0x568] sm:$0xff] }
  0xbb   :  { %v3705_v53 = vcombine.high %v534_v48, %v538_v49  ;;  %v3704_v58 = vcombine.low %v534_v48, %v538_v49  ;;  %v3755_v48 = vcombine.high %v583_v39, %v587_v40 }
  0xc0   :  { %2135 = vmatmul.mubr.bf16.gmra.mxu0 %v3640_v52  ;;  %2440 = vmatmul.mubr.bf16.gmra.mxu1 %v3642_v55  ;;  %v3698_v52 = vcombine.low %v527_v43, %v531_v44  ;;  %v542_v55 = vld [vmem:[#allocation5 + $0x540] sm:$0xff] }
  0xc1   :  { %2142 = vmatprep.mubr.bf16.mxu0 %v3649_v56  ;;  %2447 = vmatprep.mubr.bf16.mxu1 %v3651_v57  ;;  %v546_v56 = vld [vmem:[#allocation5 + $0x560] sm:$0xff]  ;;  %v543_v57 = vld [vmem:[#allocation5 + $0x548] sm:$0xff] }
  0xc2   :  { %v3715_v61 = vcombine.high %v543_v57, %v547_v5  ;;  %v3712_v8 = vcombine.low %v542_v55, %v546_v56  ;;  %v3714_v9 = vcombine.low %v543_v57, %v547_v5  ;;  %v595_v57 = vld [vmem:[#allocation5 + $0x6e8] sm:$0xff] }
  0xc8   :  { %2143 = vmatmul.mubr.bf16.gmra.mxu0 %v3648_v60  ;;  %2448 = vmatmul.mubr.bf16.gmra.mxu1 %v3650_v63  ;;  %v3713_v60 = vcombine.high %v542_v55, %v546_v56  ;;  %v554_v63 = vld [vmem:[#allocation5 + $0x5a0] sm:$0xff]  ;;  %v591_v56 = vld [vmem:[#allocation5 + $0x6c8] sm:$0xff] }
  0xc9   :  { %2150 = vmatprep.mubr.bf16.mxu0 %v3657_v6  ;;  %2455 = vmatprep.mubr.bf16.mxu1 %v3659_v7  ;;  %v551_v6 = vld [vmem:[#allocation5 + $0x588] sm:$0xff]  ;;  %v3720_v16 = vcombine.low %v550_v62, %v554_v63 }
  0xca   :  { %v555_v7 = vld [vmem:[#allocation5 + $0x5a8] sm:$0xff] }
  0xcb   :  { %v3723_v11 = vcombine.high %v551_v6, %v555_v7  ;;  %v3722_v17 = vcombine.low %v551_v6, %v555_v7  ;;  %v3763_v6 = vcombine.high %v591_v56, %v595_v57 }
  0xd0   :  { %2151 = vmatmul.mubr.bf16.gmra.mxu0 %v3656_v10  ;;  %2456 = vmatmul.mubr.bf16.gmra.mxu1 %v3658_v13  ;;  %v3721_v10 = vcombine.high %v550_v62, %v554_v63  ;;  %v562_v13 = vld [vmem:[#allocation5 + $0x5e0] sm:$0xff] }
  0xd1   :  { %2158 = vmatprep.mubr.bf16.mxu0 %v3665_v14  ;;  %2463 = vmatprep.mubr.bf16.mxu1 %v3667_v15  ;;  %v559_v14 = vld [vmem:[#allocation5 + $0x5c8] sm:$0xff]  ;;  %v3728_v24 = vcombine.low %v558_v12, %v562_v13 }
  0xd2   :  { %v563_v15 = vld [vmem:[#allocation5 + $0x5e8] sm:$0xff] }
  0xd3   :  { %v3731_v19 = vcombine.high %v559_v14, %v563_v15  ;;  %v3730_v25 = vcombine.low %v559_v14, %v563_v15  ;;  %v599_v15 = vld [vmem:[#allocation5 + $0x708] sm:$0xff] }
  0xd8   :  { %2159 = vmatmul.mubr.bf16.gmra.mxu0 %v3664_v18  ;;  %2464 = vmatmul.mubr.bf16.gmra.mxu1 %v3666_v21  ;;  %v3729_v18 = vcombine.high %v558_v12, %v562_v13  ;;  %v570_v21 = vld [vmem:[#allocation5 + $0x620] sm:$0xff] }
  0xd9   :  { %2166 = vmatprep.mubr.bf16.mxu0 %v3673_v22  ;;  %2471 = vmatprep.mubr.bf16.mxu1 %v3675_v23  ;;  %v567_v22 = vld [vmem:[#allocation5 + $0x608] sm:$0xff]  ;;  %v3736_v3 = vcombine.low %v566_v20, %v570_v21  ;;  %v598_v12 = vld [vmem:[#allocation5 + $0x700] sm:$0xff] }
  0xda   :  { %v571_v23 = vld [vmem:[#allocation5 + $0x628] sm:$0xff]  ;;  %v602_v13 = vld [vmem:[#allocation5 + $0x720] sm:$0xff] }
  0xdb   :  { %v3739_v27 = vcombine.high %v567_v22, %v571_v23  ;;  %v3738_v4 = vcombine.low %v567_v22, %v571_v23 }
  0xe0   :  { %2167 = vmatmul.mubr.bf16.gmra.mxu0 %v3672_v26  ;;  %2472 = vmatmul.mubr.bf16.gmra.mxu1 %v3674_v29  ;;  %v3737_v26 = vcombine.high %v566_v20, %v570_v21  ;;  %v578_v29 = vld [vmem:[#allocation5 + $0x660] sm:$0xff]  ;;  %v3762_v20 = vcombine.low %v591_v56, %v595_v57  ;;  %v3769_v21 = vcombine.high %v598_v12, %v602_v13 }
  0xe1   :  { %2174 = vmatprep.mubr.bf16.mxu0 %v3681_v30  ;;  %2479 = vmatprep.mubr.bf16.mxu1 %v3683_v31  ;;  %v575_v30 = vld [vmem:[#allocation5 + $0x648] sm:$0xff] }
  0xe2   :  { %v579_v31 = vld [vmem:[#allocation5 + $0x668] sm:$0xff] }
  0xe3   :  { %v3747_v33 = vcombine.high %v575_v30, %v579_v31  ;;  %v3746_v44 = vcombine.low %v575_v30, %v579_v31  ;;  %v606_v30 = vld [vmem:[#allocation5 + $0x740] sm:$0xff] }
  0xe4   :  { %v610_v31 = vld [vmem:[#allocation5 + $0x760] sm:$0xff] }
  0xe8   :  { %2175 = vmatmul.mubr.bf16.gmra.mxu0 %v3680_v32  ;;  %2480 = vmatmul.mubr.bf16.gmra.mxu1 %v3682_v35  ;;  %v3745_v32 = vcombine.high %v574_v28, %v578_v29 }
  0xe9   :  { %2182 = vmatprep.mubr.bf16.mxu0 %v3689_v36  ;;  %2487 = vmatprep.mubr.bf16.mxu1 %v3691_v37  ;;  %v582_v36 = vld [vmem:[#allocation5 + $0x680] sm:$0xff] }
  0xea   :  { %v586_v37 = vld [vmem:[#allocation5 + $0x6a0] sm:$0xff] }
  0xf0   :  { %2183 = vmatmul.mubr.bf16.gmra.mxu0 %v3688_v42  ;;  %2488 = vmatmul.mubr.bf16.gmra.mxu1 %v3690_v45  ;;  %v3744_v42 = vcombine.low %v574_v28, %v578_v29  ;;  %v3753_v45 = vcombine.high %v582_v36, %v586_v37 }
  0xf1   :  { %2190 = vmatprep.mubr.bf16.mxu0 %v3697_v46  ;;  %2495 = vmatprep.mubr.bf16.mxu1 %v3699_v47 }
  0xf8   :  { %2191 = vmatmul.mubr.bf16.gmra.mxu0 %v3696_v51  ;;  %2496 = vmatmul.mubr.bf16.gmra.mxu1 %v3698_v52 }
  0xf9   :  { %2198 = vmatprep.mubr.bf16.mxu0 %v3705_v53  ;;  %2503 = vmatprep.mubr.bf16.mxu1 %v3707_v54  ;;  %v590_v53 = vld [vmem:[#allocation5 + $0x6c0] sm:$0xff] }
  0xfa   :  { %v594_v54 = vld [vmem:[#allocation5 + $0x6e0] sm:$0xff] }
 0x100   :  { %2199 = vmatmul.mubr.bf16.gmra.mxu0 %v3704_v58  ;;  %2504 = vmatmul.mubr.bf16.gmra.mxu1 %v3706_v59  ;;  %v3752_v58 = vcombine.low %v582_v36, %v586_v37  ;;  %v3777_v36 = vcombine.high %v606_v30, %v610_v31 }
 0x101   :  { %2206 = vmatprep.mubr.bf16.mxu0 %v3713_v60  ;;  %2511 = vmatprep.mubr.bf16.mxu1 %v3715_v61  ;;  %v3754_v60 = vcombine.low %v583_v39, %v587_v40  ;;  %v3761_v61 = vcombine.high %v590_v53, %v594_v54 }
 0x108   :  { %2207 = vmatmul.mubr.bf16.gmra.mxu0 %v3712_v8  ;;  %2512 = vmatmul.mubr.bf16.gmra.mxu1 %v3714_v9 }
 0x109   :  { %2214 = vmatprep.mubr.bf16.mxu0 %v3721_v10  ;;  %2519 = vmatprep.mubr.bf16.mxu1 %v3723_v11 }
 0x110   :  { %2215 = vmatmul.mubr.bf16.gmra.mxu0 %v3720_v16  ;;  %2520 = vmatmul.mubr.bf16.gmra.mxu1 %v3722_v17  ;;  %v603_v16 = vld [vmem:[#allocation5 + $0x728] sm:$0xff] }
 0x111   :  { %2222 = vmatprep.mubr.bf16.mxu0 %v3729_v18  ;;  %2527 = vmatprep.mubr.bf16.mxu1 %v3731_v19  ;;  %v3760_v18 = vcombine.low %v590_v53, %v594_v54 }
 0x118   :  { %2223 = vmatmul.mubr.bf16.gmra.mxu0 %v3728_v24  ;;  %2528 = vmatmul.mubr.bf16.gmra.mxu1 %v3730_v25  ;;  %v3771_v24 = vcombine.high %v599_v15, %v603_v16 }
 0x119   :  { %2230 = vmatprep.mubr.bf16.mxu0 %v3737_v26  ;;  %2535 = vmatprep.mubr.bf16.mxu1 %v3739_v27 }
 0x120   :  { %v2040_v34 = vpop.f32.mrf.mxu0  ;;  %2231 = vmatmul.mubr.bf16.gmra.mxu0 %v3736_v3  ;;  %v2345_v1 = vpop.f32.mrf.mxu1  ;;  %2536 = vmatmul.mubr.bf16.gmra.mxu1 %v3738_v4  ;;  %v607_v4 = vld [vmem:[#allocation5 + $0x748] sm:$0xff] }
 0x121   :  { %2238 = vmatprep.mubr.bf16.mxu0 %v3745_v32  ;;  %v4397_v2 = vadd.f32 %v2345_v1, %v2040_v34  ;;  %2543 = vmatprep.mubr.bf16.mxu1 %v3747_v33  ;;  %v611_v32 = vld [vmem:[#allocation5 + $0x768] sm:$0xff]  ;;  %v3768_v34 = vcombine.low %v598_v12, %v602_v13 }
 0x122   :  { %v2042_v35 = vpop.f32.mrf.mxu0  ;;  %v2347_v38 = vpop.f32.mrf.mxu1  ;;  %v3779_v39 = vcombine.high %v607_v4, %v611_v32  ;;  %v3778_v54 = vcombine.low %v607_v4, %v611_v32 }
 0x123   :  { %v3770_v35 = vcombine.low %v599_v15, %v603_v16 }
 0x124   :  { %v2043_v41 = vpop.f32.mrf.mxu0  ;;  %v2348_v43 = vpop.f32.mrf.mxu1 }
 0x125   :  { %v4399_v46 = vadd.f32 %v2348_v43, %v2043_v41 }
 0x126   :  { %v2045_v47 = vpop.f32.mrf.mxu0  ;;  %v2350_v49 = vpop.f32.mrf.mxu1 }
 0x127   :  { %v618_v47 = vld [vmem:[#allocation5 + $0x7a0] sm:$0xff]  ;;  %v615_v49 = vld [vmem:[#allocation5 + $0x788] sm:$0xff] }
 0x128   :  { %v2048_v0 = vpop.f32.mrf.mxu0  ;;  %2239 = vmatmul.mubr.bf16.gmra.mxu0 %v3744_v42  ;;  %v2353_v50 = vpop.f32.mrf.mxu1  ;;  %2544 = vmatmul.mubr.bf16.gmra.mxu1 %v3746_v44 }
 0x129   :  { %2246 = vmatprep.mubr.bf16.mxu0 %v3753_v45  ;;  %v4401_v51 = vadd.f32 %v2353_v50, %v2048_v0  ;;  %2551 = vmatprep.mubr.bf16.mxu1 %v3755_v48  ;;  %v614_v45 = vld [vmem:[#allocation5 + $0x780] sm:$0xff]  ;;  %v619_v0 = vld [vmem:[#allocation5 + $0x7a8] sm:$0xff] }
 0x12a   :  { %v2050_v52 = vpop.f32.mrf.mxu0  ;;  %v2355_v55 = vpop.f32.mrf.mxu1  ;;  %v3784_v13 = vcombine.low %v614_v45, %v618_v47  ;;  %v3786_v15 = vcombine.low %v615_v49, %v619_v0 }
 0x12b   :  { %v3776_v52 = vcombine.low %v606_v30, %v610_v31  ;;  %v3785_v55 = vcombine.high %v614_v45, %v618_v47  ;;  %v631_v30 = vld [vmem:[#allocation5 + $0x808] sm:$0xff]  ;;  %v642_v45 = vld [vmem:[#allocation5 + $0x860] sm:$0xff] }
 0x12c   :  { %v2051_v5 = vpop.f32.mrf.mxu0  ;;  %v2356_v59 = vpop.f32.mrf.mxu1  ;;  %v635_v31 = vld [vmem:[#allocation5 + $0x828] sm:$0xff] }
 0x12d   :  { %v4403_v62 = vadd.f32 %v2356_v59, %v2051_v5  ;;  %v3787_v5 = vcombine.high %v615_v49, %v619_v0  ;;  %v643_v49 = vld [vmem:[#allocation5 + $0x868] sm:$0xff] }
 0x12e   :  { %v2053_v63 = vpop.f32.mrf.mxu0  ;;  %v2358_v7 = vpop.f32.mrf.mxu1 }
 0x12f   :  { %v626_v7 = vld [vmem:[#allocation5 + $0x7e0] sm:$0xff] }
 0x130   :  { %v2056_v8 = vpop.f32.mrf.mxu0  ;;  %2247 = vmatmul.mubr.bf16.gmra.mxu0 %v3752_v58  ;;  %v2361_v9 = vpop.f32.mrf.mxu1  ;;  %2552 = vmatmul.mubr.bf16.gmra.mxu1 %v3754_v60 }
 0x131   :  { %2254 = vmatprep.mubr.bf16.mxu0 %v3761_v61  ;;  %v4405_v10 = vadd.f32 %v2361_v9, %v2056_v8  ;;  %2559 = vmatprep.mubr.bf16.mxu1 %v3763_v6  ;;  %v622_v6 = vld [vmem:[#allocation5 + $0x7c0] sm:$0xff]  ;;  %v623_v9 = vld [vmem:[#allocation5 + $0x7c8] sm:$0xff] }
 0x132   :  { %v2058_v11 = vpop.f32.mrf.mxu0  ;;  %v2363_v14 = vpop.f32.mrf.mxu1  ;;  %v3793_v16 = vcombine.high %v622_v6, %v626_v7  ;;  %v3792_v4 = vcombine.low %v622_v6, %v626_v7  ;;  %v376_v7 = vld [vmem:[#allocation5 + $0x10] sm:$0xff] }
 0x133   :  { %v627_v11 = vld [vmem:[#allocation5 + $0x7e8] sm:$0xff] }
 0x134   :  { %v2059_v17 = vpop.f32.mrf.mxu0  ;;  %v2364_v19 = vpop.f32.mrf.mxu1 }
 0x135   :  { %v4407_v22 = vadd.f32 %v2364_v19, %v2059_v17  ;;  %v3795_v19 = vcombine.high %v623_v9, %v627_v11 }
 0x136   :  { %v2061_v23 = vpop.f32.mrf.mxu0  ;;  %v2366_v25 = vpop.f32.mrf.mxu1 }
 0x138   :  { %v2064_v26 = vpop.f32.mrf.mxu0  ;;  %2255 = vmatmul.mubr.bf16.gmra.mxu0 %v3760_v18  ;;  %v2369_v27 = vpop.f32.mrf.mxu1  ;;  %2560 = vmatmul.mubr.bf16.gmra.mxu1 %v3762_v20 }
 0x139   :  { %2262 = vmatprep.mubr.bf16.mxu0 %v3769_v21  ;;  %v4409_v28 = vadd.f32 %v2369_v27, %v2064_v26  ;;  %2567 = vmatprep.mubr.bf16.mxu1 %v3771_v24  ;;  %v630_v26 = vld [vmem:[#allocation5 + $0x800] sm:$0xff] }
 0x13a   :  { %v2066_v29 = vpop.f32.mrf.mxu0  ;;  %v2371_v3 = vpop.f32.mrf.mxu1  ;;  %v634_v27 = vld [vmem:[#allocation5 + $0x820] sm:$0xff] }
 0x13c   :  { %v2067_v33 = vpop.f32.mrf.mxu0  ;;  %v2372_v1 = vpop.f32.mrf.mxu1 }
 0x13d   :  { %v4411_v37 = vadd.f32 %v2372_v1, %v2067_v33  ;;  %v3794_v33 = vcombine.low %v623_v9, %v627_v11  ;;  %v377_v11 = vld [vmem:[#allocation5 + $0x18] sm:$0xff] }
 0x13e   :  { %v2069_v38 = vpop.f32.mrf.mxu0  ;;  %v2374_v40 = vpop.f32.mrf.mxu1 }
 0x140   :  { %v2072_v41 = vpop.f32.mrf.mxu0  ;;  %2263 = vmatmul.mubr.bf16.gmra.mxu0 %v3768_v34  ;;  %v2377_v42 = vpop.f32.mrf.mxu1  ;;  %2568 = vmatmul.mubr.bf16.gmra.mxu1 %v3770_v35  ;;  %v3801_v34 = vcombine.high %v630_v26, %v634_v27 }
 0x141   :  { %2270 = vmatprep.mubr.bf16.mxu0 %v3777_v36  ;;  %v4413_v43 = vadd.f32 %v2377_v42, %v2072_v41  ;;  %2575 = vmatprep.mubr.bf16.mxu1 %v3779_v39  ;;  %v3803_v36 = vcombine.high %v631_v30, %v635_v31 }
 0x142   :  { %v2074_v44 = vpop.f32.mrf.mxu0  ;;  %v2379_v48 = vpop.f32.mrf.mxu1 }
 0x143   :  { %v638_v44 = vld [vmem:[#allocation5 + $0x840] sm:$0xff]  ;;  %v639_v48 = vld [vmem:[#allocation5 + $0x848] sm:$0xff] }
 0x144   :  { %v2075_v50 = vpop.f32.mrf.mxu0  ;;  %v2380_v53 = vpop.f32.mrf.mxu1 }
 0x145   :  { %v4415_v56 = vadd.f32 %v2380_v53, %v2075_v50  ;;  %v3800_v50 = vcombine.low %v630_v26, %v634_v27  ;;  %v3802_v53 = vcombine.low %v631_v30, %v635_v31  ;;  %v384_v30 = vld [vmem:[#allocation5 + $0x50] sm:$0xff] }
 0x146   :  { %v2077_v57 = vpop.f32.mrf.mxu0  ;;  %v2382_v58 = vpop.f32.mrf.mxu1  ;;  %v388_v31 = vld [vmem:[#allocation5 + $0x70] sm:$0xff] }
 0x148   :  { %v2080_v59 = vpop.f32.mrf.mxu0  ;;  %2271 = vmatmul.mubr.bf16.gmra.mxu0 %v3776_v52  ;;  %v2385_v60 = vpop.f32.mrf.mxu1  ;;  %2576 = vmatmul.mubr.bf16.gmra.mxu1 %v3778_v54  ;;  %v3809_v54 = vcombine.high %v638_v44, %v642_v45 }
 0x149   :  { %2278 = vmatprep.mubr.bf16.mxu0 %v3785_v55  ;;  %v4417_v61 = vadd.f32 %v2385_v60, %v2080_v59  ;;  %2583 = vmatprep.mubr.bf16.mxu1 %v3787_v5  ;;  %v3811_v5 = vcombine.high %v639_v48, %v643_v49 }
 0x14a   :  { %v2082_v63 = vpop.f32.mrf.mxu0  ;;  %v2387_v8 = vpop.f32.mrf.mxu1 }
 0x14b   :  { %v380_v8 = vld [vmem:[#allocation5 + $0x30] sm:$0xff] }
 0x14c   :  { %v2083_v12 = vpop.f32.mrf.mxu0  ;;  %v2388_v14 = vpop.f32.mrf.mxu1 }
 0x14d   :  { %v4419_v17 = vadd.f32 %v2388_v14, %v2083_v12  ;;  %v381_v12 = vld [vmem:[#allocation5 + $0x38] sm:$0xff]  ;;  %v3808_v14 = vcombine.low %v638_v44, %v642_v45 }
 0x14e   :  { %v2085_v18 = vpop.f32.mrf.mxu0  ;;  %v2390_v20 = vpop.f32.mrf.mxu1 }
 0x14f   :  { %v3549_v18 = vcombine.high %v376_v7, %v380_v8 }
 0x150   :  { %v2088_v21 = vpop.f32.mrf.mxu0  ;;  %2279 = vmatmul.mubr.bf16.gmra.mxu0 %v3784_v13  ;;  %v2393_v23 = vpop.f32.mrf.mxu1  ;;  %2584 = vmatmul.mubr.bf16.gmra.mxu1 %v3786_v15 }
 0x151   :  { %2286 = vmatprep.mubr.bf16.mxu0 %v3793_v16  ;;  %v4421_v24 = vadd.f32 %v2393_v23, %v2088_v21  ;;  %2591 = vmatprep.mubr.bf16.mxu1 %v3795_v19  ;;  %v3810_v16 = vcombine.low %v639_v48, %v643_v49  ;;  %v3551_v21 = vcombine.high %v377_v11, %v381_v12 }
 0x152   :  { %v2090_v25 = vpop.f32.mrf.mxu0  ;;  %v2395_v29 = vpop.f32.mrf.mxu1 }
 0x154   :  { %v2091_v3 = vpop.f32.mrf.mxu0  ;;  %v2396_v32 = vpop.f32.mrf.mxu1 }
 0x155   :  { %v4423_v1 = vadd.f32 %v2396_v32, %v2091_v3  ;;  %v389_v32 = vld [vmem:[#allocation5 + $0x78] sm:$0xff] }
 0x156   :  { %v2093_v35 = vpop.f32.mrf.mxu0  ;;  %v2398_v38 = vpop.f32.mrf.mxu1 }
 0x157   :  { %v3557_v38 = vcombine.high %v384_v30, %v388_v31 }
 0x158   :  { %v2096_v39 = vpop.f32.mrf.mxu0  ;;  %2287 = vmatmul.mubr.bf16.gmra.mxu0 %v3792_v4  ;;  %v2401_v40 = vpop.f32.mrf.mxu1  ;;  %2592 = vmatmul.mubr.bf16.gmra.mxu1 %v3794_v33  ;;  %v385_v4 = vld [vmem:[#allocation5 + $0x58] sm:$0xff] }
 0x159   :  { %2294 = vmatprep.mubr.bf16.mxu0 %v3801_v34  ;;  %v4425_v41 = vadd.f32 %v2401_v40, %v2096_v39  ;;  %2599 = vmatprep.mubr.bf16.mxu1 %v3803_v36  ;;  %v3548_v34 = vcombine.low %v376_v7, %v380_v8  ;;  %v3550_v36 = vcombine.low %v377_v11, %v381_v12 }
 0x15a   :  { %v2098_v42 = vpop.f32.mrf.mxu0  ;;  %v2403_v47 = vpop.f32.mrf.mxu1 }
 0x15b   :  { %v3559_v42 = vcombine.high %v385_v4, %v389_v32 }
 0x15c   :  { %v2099_v0 = vpop.f32.mrf.mxu0  ;;  %v2404_v52 = vpop.f32.mrf.mxu1 }
 0x15d   :  { %v4427_v55 = vadd.f32 %v2404_v52, %v2099_v0  ;;  %v392_v0 = vld [vmem:[#allocation5 + $0x90] sm:$0xff] }
 0x15e   :  { %v2101_v57 = vpop.f32.mrf.mxu0  ;;  %v2406_v58 = vpop.f32.mrf.mxu1 }
 0x160   :  { %v2104_v59 = vpop.f32.mrf.mxu0  ;;  %2295 = vmatmul.mubr.bf16.gmra.mxu0 %v3800_v50  ;;  %v2409_v60 = vpop.f32.mrf.mxu1  ;;  %2600 = vmatmul.mubr.bf16.gmra.mxu1 %v3802_v53  ;;  %v396_v50 = vld [vmem:[#allocation5 + $0xb0] sm:$0xff]  ;;  %v393_v53 = vld [vmem:[#allocation5 + $0x98] sm:$0xff] }
 0x161   :  { %2302 = vmatprep.mubr.bf16.mxu0 %v3809_v54  ;;  %v4429_v63 = vadd.f32 %v2409_v60, %v2104_v59  ;;  %2607 = vmatprep.mubr.bf16.mxu1 %v3811_v5  ;;  %v397_v54 = vld [vmem:[#allocation5 + $0xb8] sm:$0xff]  ;;  %v3556_v5 = vcombine.low %v384_v30, %v388_v31  ;;  %v3558_v59 = vcombine.low %v385_v4, %v389_v32 }
 0x162   :  { %v2106_v6 = vpop.f32.mrf.mxu0  ;;  %v2411_v9 = vpop.f32.mrf.mxu1  ;;  %v3565_v60 = vcombine.high %v392_v0, %v396_v50  ;;  %v3567_v8 = vcombine.high %v393_v53, %v397_v54 }
 0x164   :  { %v2107_v13 = vpop.f32.mrf.mxu0  ;;  %v2412_v15 = vpop.f32.mrf.mxu1 }
 0x165   :  { %v4431_v19 = vadd.f32 %v2412_v15, %v2107_v13  ;;  %v400_v15 = vld [vmem:[#allocation5 + $0xd0] sm:$0xff] }
 0x166   :  { %v2109_v20 = vpop.f32.mrf.mxu0  ;;  %v2414_v23 = vpop.f32.mrf.mxu1 }
 0x167   :  { %v401_v20 = vld [vmem:[#allocation5 + $0xd8] sm:$0xff] }
 0x168   :  { %v2112_v25 = vpop.f32.mrf.mxu0  ;;  %2303 = vmatmul.mubr.bf16.gmra.mxu0 %v3808_v14  ;;  %v2417_v26 = vpop.f32.mrf.mxu1  ;;  %2608 = vmatmul.mubr.bf16.gmra.mxu1 %v3810_v16  ;;  %v404_v16 = vld [vmem:[#allocation5 + $0xf0] sm:$0xff] }
 0x169   :  { %2648 = vmatprep.mubr.bf16.mxu0 %v3549_v18  ;;  %v4433_v27 = vadd.f32 %v2417_v26, %v2112_v25  ;;  %2953 = vmatprep.mubr.bf16.mxu1 %v3551_v21  ;;  %v405_v21 = vld [vmem:[#allocation5 + $0xf8] sm:$0xff]  ;;  %v3564_v25 = vcombine.low %v392_v0, %v396_v50  ;;  %v3573_v30 = vcombine.high %v400_v15, %v404_v16 }
 0x16a   :  { %v2114_v29 = vpop.f32.mrf.mxu0  ;;  %v2419_v3 = vpop.f32.mrf.mxu1  ;;  %v3575_v4 = vcombine.high %v401_v20, %v405_v21  ;;  %v3574_v50 = vcombine.low %v401_v20, %v405_v21 }
 0x16b   :  { %v3566_v29 = vcombine.low %v393_v53, %v397_v54 }
 0x16c   :  { %v2115_v33 = vpop.f32.mrf.mxu0  ;;  %v2420_v35 = vpop.f32.mrf.mxu1 }
 0x16d   :  { %v4435_v39 = vadd.f32 %v2420_v35, %v2115_v33 }
 0x16e   :  { %v2117_v40 = vpop.f32.mrf.mxu0  ;;  %v2422_v44 = vpop.f32.mrf.mxu1 }
 0x16f   :  { %v412_v40 = vld [vmem:[#allocation5 + $0x130] sm:$0xff]  ;;  %v409_v44 = vld [vmem:[#allocation5 + $0x118] sm:$0xff] }
 0x170   :  { %v2120_v45 = vpop.f32.mrf.mxu0  ;;  %2649 = vmatmul.mubr.bf16.vlgmr.msra.gmra.mxu0 %v3548_v34  ;;  %v2425_v47 = vpop.f32.mrf.mxu1  ;;  %2954 = vmatmul.mubr.bf16.vlgmr.msra.gmra.mxu1 %v3550_v36 }
 0x171   :  { %2656 = vmatprep.mubr.bf16.mxu0 %v3557_v38  ;;  %v4437_v48 = vadd.f32 %v2425_v47, %v2120_v45  ;;  %2961 = vmatprep.mubr.bf16.mxu1 %v3559_v42  ;;  %v408_v38 = vld [vmem:[#allocation5 + $0x110] sm:$0xff]  ;;  %v413_v45 = vld [vmem:[#allocation5 + $0x138] sm:$0xff] }
 0x172   :  { %v2122_v49 = vpop.f32.mrf.mxu0  ;;  %v2427_v52 = vpop.f32.mrf.mxu1  ;;  %v3582_v20 = vcombine.low %v409_v44, %v413_v45 }
 0x173   :  { %v3572_v49 = vcombine.low %v400_v15, %v404_v16  ;;  %v3581_v52 = vcombine.high %v408_v38, %v412_v40  ;;  %v3580_v16 = vcombine.low %v408_v38, %v412_v40  ;;  %v425_v38 = vld [vmem:[#allocation5 + $0x198] sm:$0xff] }
 0x174   :  { %v2123_v57 = vpop.f32.mrf.mxu0  ;;  %v2428_v58 = vpop.f32.mrf.mxu1  ;;  %v429_v40 = vld [vmem:[#allocation5 + $0x1b8] sm:$0xff] }
 0x175   :  { %v4439_v6 = vadd.f32 %v2428_v58, %v2123_v57  ;;  %v3583_v57 = vcombine.high %v409_v44, %v413_v45 }
 0x176   :  { %v2125_v7 = vpop.f32.mrf.mxu0  ;;  %v2430_v9 = vpop.f32.mrf.mxu1 }
 0x177   :  { %v420_v9 = vld [vmem:[#allocation5 + $0x170] sm:$0xff] }
 0x178   :  { %v2128_v11 = vpop.f32.mrf.mxu0  ;;  %2657 = vmatmul.mubr.bf16.gmra.mxu0 %v3556_v5  ;;  %v2433_v12 = vpop.f32.mrf.mxu1  ;;  %2962 = vmatmul.mubr.bf16.gmra.mxu1 %v3558_v59 }
 0x179   :  { %2664 = vmatprep.mubr.bf16.mxu0 %v3565_v60  ;;  %v4441_v13 = vadd.f32 %v2433_v12, %v2128_v11  ;;  %2969 = vmatprep.mubr.bf16.mxu1 %v3567_v8  ;;  %v416_v8 = vld [vmem:[#allocation5 + $0x150] sm:$0xff]  ;;  %v417_v12 = vld [vmem:[#allocation5 + $0x158] sm:$0xff] }
 0x17a   :  { %v2130_v14 = vpop.f32.mrf.mxu0  ;;  %v2435_v18 = vpop.f32.mrf.mxu1  ;;  %v3589_v21 = vcombine.high %v416_v8, %v420_v9  ;;  %v3588_v44 = vcombine.low %v416_v8, %v420_v9  ;;  %v433_v9 = vld [vmem:[#allocation5 + $0x1d8] sm:$0xff] }
 0x17b   :  { %v421_v14 = vld [vmem:[#allocation5 + $0x178] sm:$0xff] }
 0x17c   :  { %v2131_v23 = vpop.f32.mrf.mxu0  ;;  %v2436_v26 = vpop.f32.mrf.mxu1 }
 0x17d   :  { %v4443_v31 = vadd.f32 %v2436_v26, %v2131_v23  ;;  %v3591_v26 = vcombine.high %v417_v12, %v421_v14 }
 0x17e   :  { %v2133_v3 = vpop.f32.mrf.mxu0  ;;  %v2438_v32 = vpop.f32.mrf.mxu1 }
 0x180   :  { %v2136_v33 = vpop.f32.mrf.mxu0  ;;  %2665 = vmatmul.mubr.bf16.gmra.mxu0 %v3564_v25  ;;  %v2441_v34 = vpop.f32.mrf.mxu1  ;;  %2970 = vmatmul.mubr.bf16.gmra.mxu1 %v3566_v29 }
 0x181   :  { %2672 = vmatprep.mubr.bf16.mxu0 %v3573_v30  ;;  %v4445_v35 = vadd.f32 %v2441_v34, %v2136_v33  ;;  %2977 = vmatprep.mubr.bf16.mxu1 %v3575_v4  ;;  %v424_v33 = vld [vmem:[#allocation5 + $0x190] sm:$0xff] }
 0x182   :  { %v2138_v36 = vpop.f32.mrf.mxu0  ;;  %v2443_v42 = vpop.f32.mrf.mxu1  ;;  %v428_v34 = vld [vmem:[#allocation5 + $0x1b0] sm:$0xff] }
 0x184   :  { %v2139_v47 = vpop.f32.mrf.mxu0  ;;  %v2444_v0 = vpop.f32.mrf.mxu1 }
 0x185   :  { %v4447_v53 = vadd.f32 %v2444_v0, %v2139_v47  ;;  %v3590_v47 = vcombine.low %v417_v12, %v421_v14  ;;  %v437_v12 = vld [vmem:[#allocation5 + $0x1f8] sm:$0xff] }
 0x186   :  { %v2141_v54 = vpop.f32.mrf.mxu0  ;;  %v2446_v5 = vpop.f32.mrf.mxu1 }
 0x188   :  { %v2144_v58 = vpop.f32.mrf.mxu0  ;;  %2673 = vmatmul.mubr.bf16.gmra.mxu0 %v3572_v49  ;;  %v2449_v59 = vpop.f32.mrf.mxu1  ;;  %2978 = vmatmul.mubr.bf16.gmra.mxu1 %v3574_v50  ;;  %v3597_v49 = vcombine.high %v424_v33, %v428_v34 }
 0x189   :  { %2680 = vmatprep.mubr.bf16.mxu0 %v3581_v52  ;;  %v4449_v60 = vadd.f32 %v2449_v59, %v2144_v58  ;;  %2985 = vmatprep.mubr.bf16.mxu1 %v3583_v57  ;;  %v3599_v52 = vcombine.high %v425_v38, %v429_v40 }
 0x18a   :  { %v2146_v7 = vpop.f32.mrf.mxu0  ;;  %v2451_v11 = vpop.f32.mrf.mxu1 }
 0x18b   :  { %v432_v7 = vld [vmem:[#allocation5 + $0x1d0] sm:$0xff] }
 0x18c   :  { %v2147_v15 = vpop.f32.mrf.mxu0  ;;  %v2452_v18 = vpop.f32.mrf.mxu1  ;;  %v436_v11 = vld [vmem:[#allocation5 + $0x1f0] sm:$0xff] }
 0x18d   :  { %v4451_v23 = vadd.f32 %v2452_v18, %v2147_v15  ;;  %v3596_v15 = vcombine.low %v424_v33, %v428_v34  ;;  %v3598_v18 = vcombine.low %v425_v38, %v429_v40  ;;  %v441_v34 = vld [vmem:[#allocation5 + $0x218] sm:$0xff] }
 0x18e   :  { %v2149_v25 = vpop.f32.mrf.mxu0  ;;  %v2454_v29 = vpop.f32.mrf.mxu1  ;;  %v445_v38 = vld [vmem:[#allocation5 + $0x238] sm:$0xff] }
 0x190   :  { %v2152_v30 = vpop.f32.mrf.mxu0  ;;  %2681 = vmatmul.mubr.bf16.gmra.mxu0 %v3580_v16  ;;  %v2457_v3 = vpop.f32.mrf.mxu1  ;;  %2986 = vmatmul.mubr.bf16.gmra.mxu1 %v3582_v20  ;;  %v3605_v20 = vcombine.high %v432_v7, %v436_v11 }
 0x191   :  { %2688 = vmatprep.mubr.bf16.mxu0 %v3589_v21  ;;  %v4453_v4 = vadd.f32 %v2457_v3, %v2152_v30  ;;  %2993 = vmatprep.mubr.bf16.mxu1 %v3591_v26  ;;  %v3607_v26 = vcombine.high %v433_v9, %v437_v12 }
 0x192   :  { %v2154_v32 = vpop.f32.mrf.mxu0  ;;  %v2459_v36 = vpop.f32.mrf.mxu1 }
 0x194   :  { %v2155_v42 = vpop.f32.mrf.mxu0  ;;  %v2460_v45 = vpop.f32.mrf.mxu1 }
 0x195   :  { %v4455_v0 = vadd.f32 %v2460_v45, %v2155_v42  ;;  %v440_v42 = vld [vmem:[#allocation5 + $0x210] sm:$0xff]  ;;  %v3604_v45 = vcombine.low %v432_v7, %v436_v11  ;;  %v449_v11 = vld [vmem:[#allocation5 + $0x258] sm:$0xff] }
 0x196   :  { %v2157_v50 = vpop.f32.mrf.mxu0  ;;  %v2462_v54 = vpop.f32.mrf.mxu1 }
 0x198   :  { %v2160_v57 = vpop.f32.mrf.mxu0  ;;  %2689 = vmatmul.mubr.bf16.gmra.mxu0 %v3588_v44  ;;  %v2465_v5 = vpop.f32.mrf.mxu1  ;;  %2994 = vmatmul.mubr.bf16.gmra.mxu1 %v3590_v47  ;;  %v444_v44 = vld [vmem:[#allocation5 + $0x230] sm:$0xff] }
 0x199   :  { %2696 = vmatprep.mubr.bf16.mxu0 %v3597_v49  ;;  %v4457_v58 = vadd.f32 %v2465_v5, %v2160_v57  ;;  %3001 = vmatprep.mubr.bf16.mxu1 %v3599_v52  ;;  %v3606_v49 = vcombine.low %v433_v9, %v437_v12  ;;  %v3613_v50 = vcombine.high %v440_v42, %v444_v44  ;;  %v453_v9 = vld [vmem:[#allocation5 + $0x278] sm:$0xff] }
 0x19a   :  { %v2162_v59 = vpop.f32.mrf.mxu0  ;;  %v2467_v8 = vpop.f32.mrf.mxu1  ;;  %v3615_v57 = vcombine.high %v441_v34, %v445_v38 }
 0x19c   :  { %v2163_v14 = vpop.f32.mrf.mxu0  ;;  %v2468_v16 = vpop.f32.mrf.mxu1 }
 0x19d   :  { %v4459_v21 = vadd.f32 %v2468_v16, %v2163_v14  ;;  %v448_v16 = vld [vmem:[#allocation5 + $0x250] sm:$0xff] }
 0x19e   :  { %v2165_v25 = vpop.f32.mrf.mxu0  ;;  %v2470_v29 = vpop.f32.mrf.mxu1 }
 0x1a0   :  { %v2168_v30 = vpop.f32.mrf.mxu0  ;;  %2697 = vmatmul.mubr.bf16.gmra.mxu0 %v3596_v15  ;;  %v2473_v3 = vpop.f32.mrf.mxu1  ;;  %3002 = vmatmul.mubr.bf16.gmra.mxu1 %v3598_v18  ;;  %v452_v18 = vld [vmem:[#allocation5 + $0x270] sm:$0xff] }
 0x1a1   :  { %2704 = vmatprep.mubr.bf16.mxu0 %v3605_v20  ;;  %v4461_v32 = vadd.f32 %v2473_v3, %v2168_v30  ;;  %3009 = vmatprep.mubr.bf16.mxu1 %v3607_v26  ;;  %v3612_v20 = vcombine.low %v440_v42, %v444_v44  ;;  %v3614_v26 = vcombine.low %v441_v34, %v445_v38  ;;  %v457_v44 = vld [vmem:[#allocation5 + $0x298] sm:$0xff] }
 0x1a2   :  { %v2170_v36 = vpop.f32.mrf.mxu0  ;;  %v2475_v33 = vpop.f32.mrf.mxu1  ;;  %v3621_v29 = vcombine.high %v448_v16, %v452_v18  ;;  %v461_v34 = vld [vmem:[#allocation5 + $0x2b8] sm:$0xff] }
 0x1a3   :  { %v3623_v36 = vcombine.high %v449_v11, %v453_v9 }
 0x1a4   :  { %v2171_v40 = vpop.f32.mrf.mxu0  ;;  %v2476_v47 = vpop.f32.mrf.mxu1 }
 0x1a5   :  { %v4463_v52 = vadd.f32 %v2476_v47, %v2171_v40 }
 0x1a6   :  { %v2173_v54 = vpop.f32.mrf.mxu0  ;;  %v2478_v5 = vpop.f32.mrf.mxu1 }
 0x1a7   :  { %v460_v54 = vld [vmem:[#allocation5 + $0x2b0] sm:$0xff] }
 0x1a8   :  { %v2176_v59 = vpop.f32.mrf.mxu0  ;;  %2705 = vmatmul.mubr.bf16.gmra.mxu0 %v3604_v45  ;;  %v2481_v8 = vpop.f32.mrf.mxu1  ;;  %3010 = vmatmul.mubr.bf16.gmra.mxu1 %v3606_v49 }
 0x1a9   :  { %2712 = vmatprep.mubr.bf16.mxu0 %v3613_v50  ;;  %v4465_v14 = vadd.f32 %v2481_v8, %v2176_v59  ;;  %3017 = vmatprep.mubr.bf16.mxu1 %v3615_v57  ;;  %v456_v50 = vld [vmem:[#allocation5 + $0x290] sm:$0xff]  ;;  %v3620_v57 = vcombine.low %v448_v16, %v452_v18  ;;  %v3622_v59 = vcombine.low %v449_v11, %v453_v9  ;;  %v465_v18 = vld [vmem:[#allocation5 + $0x2d8] sm:$0xff] }
 0x1aa   :  { %v2178_v15 = vpop.f32.mrf.mxu0  ;;  %v2483_v7 = vpop.f32.mrf.mxu1  ;;  %v3629_v8 = vcombine.high %v456_v50, %v460_v54  ;;  %v469_v11 = vld [vmem:[#allocation5 + $0x2f8] sm:$0xff] }
 0x1ac   :  { %v2179_v12 = vpop.f32.mrf.mxu0  ;;  %v2484_v25 = vpop.f32.mrf.mxu1 }
 0x1ad   :  { %v4467_v30 = vadd.f32 %v2484_v25, %v2179_v12  ;;  %v3631_v12 = vcombine.high %v457_v44, %v461_v34 }
 0x1ae   :  { %v2181_v3 = vpop.f32.mrf.mxu0  ;;  %v2486_v33 = vpop.f32.mrf.mxu1 }
 0x1af   :  { %v468_v33 = vld [vmem:[#allocation5 + $0x2f0] sm:$0xff] }
 0x1b0   :  { %v2184_v40 = vpop.f32.mrf.mxu0  ;;  %2713 = vmatmul.mubr.bf16.gmra.mxu0 %v3612_v20  ;;  %v2489_v45 = vpop.f32.mrf.mxu1  ;;  %3018 = vmatmul.mubr.bf16.gmra.mxu1 %v3614_v26 }
 0x1b1   :  { %2720 = vmatprep.mubr.bf16.mxu0 %v3621_v29  ;;  %v4469_v47 = vadd.f32 %v2489_v45, %v2184_v40  ;;  %3025 = vmatprep.mubr.bf16.mxu1 %v3623_v36  ;;  %v464_v36 = vld [vmem:[#allocation5 + $0x2d0] sm:$0xff]  ;;  %v3628_v40 = vcombine.low %v456_v50, %v460_v54  ;;  %v473_v54 = vld [vmem:[#allocation5 + $0x318] sm:$0xff] }
 0x1b2   :  { %v2186_v49 = vpop.f32.mrf.mxu0  ;;  %v2491_v42 = vpop.f32.mrf.mxu1 }
 0x1b3   :  { %v3630_v49 = vcombine.low %v457_v44, %v461_v34  ;;  %v3637_v42 = vcombine.high %v464_v36, %v468_v33  ;;  %v477_v44 = vld [vmem:[#allocation5 + $0x338] sm:$0xff] }
 0x1b4   :  { %v2187_v38 = vpop.f32.mrf.mxu0  ;;  %v2492_v5 = vpop.f32.mrf.mxu1 }
 0x1b5   :  { %v4471_v15 = vadd.f32 %v2492_v5, %v2187_v38  ;;  %v3639_v5 = vcombine.high %v465_v18, %v469_v11 }
 0x1b6   :  { %v2189_v7 = vpop.f32.mrf.mxu0  ;;  %v2494_v20 = vpop.f32.mrf.mxu1 }
 0x1b8   :  { %v2192_v25 = vpop.f32.mrf.mxu0  ;;  %2721 = vmatmul.mubr.bf16.gmra.mxu0 %v3620_v57  ;;  %v2497_v26 = vpop.f32.mrf.mxu1  ;;  %3026 = vmatmul.mubr.bf16.gmra.mxu1 %v3622_v59 }
 0x1b9   :  { %2728 = vmatprep.mubr.bf16.mxu0 %v3629_v8  ;;  %v4473_v29 = vadd.f32 %v2497_v26, %v2192_v25  ;;  %3033 = vmatprep.mubr.bf16.mxu1 %v3631_v12  ;;  %v472_v25 = vld [vmem:[#allocation5 + $0x310] sm:$0xff] }
 0x1ba   :  { %v2194_v3 = vpop.f32.mrf.mxu0  ;;  %v2499_v16 = vpop.f32.mrf.mxu1  ;;  %v476_v26 = vld [vmem:[#allocation5 + $0x330] sm:$0xff] }
 0x1bb   :  { %v3636_v3 = vcombine.low %v464_v36, %v468_v33  ;;  %v481_v33 = vld [vmem:[#allocation5 + $0x358] sm:$0xff] }
 0x1bc   :  { %v2195_v9 = vpop.f32.mrf.mxu0  ;;  %v2500_v45 = vpop.f32.mrf.mxu1 }
 0x1bd   :  { %v4475_v38 = vadd.f32 %v2500_v45, %v2195_v9  ;;  %v3638_v9 = vcombine.low %v465_v18, %v469_v11  ;;  %v3645_v45 = vcombine.high %v472_v25, %v476_v26  ;;  %v485_v18 = vld [vmem:[#allocation5 + $0x378] sm:$0xff] }
 0x1be   :  { %v2197_v57 = vpop.f32.mrf.mxu0  ;;  %v2502_v59 = vpop.f32.mrf.mxu1 }
 0x1bf   :  { %v3647_v59 = vcombine.high %v473_v54, %v477_v44 }
 0x1c0   :  { %v2200_v8 = vpop.f32.mrf.mxu0  ;;  %2729 = vmatmul.mubr.bf16.gmra.mxu0 %v3628_v40  ;;  %v2505_v7 = vpop.f32.mrf.mxu1  ;;  %3034 = vmatmul.mubr.bf16.gmra.mxu1 %v3630_v49 }
 0x1c1   :  { %2736 = vmatprep.mubr.bf16.mxu0 %v3637_v42  ;;  %v4477_v12 = vadd.f32 %v2505_v7, %v2200_v8  ;;  %3041 = vmatprep.mubr.bf16.mxu1 %v3639_v5 }
 0x1c2   :  { %v2202_v20 = vpop.f32.mrf.mxu0  ;;  %v2507_v50 = vpop.f32.mrf.mxu1 }
 0x1c3   :  { %4720 = vst [vmem:[#allocation11_spill] sm:$0xff] %v4477_v12  ;;  %v480_v20 = vld [vmem:[#allocation5 + $0x350] sm:$0xff]  ;;  %v3655_v12 = vcombine.high %v481_v33, %v485_v18 }
 0x1c4   :  { %v2203_v34 = vpop.f32.mrf.mxu0  ;;  %v2508_v16 = vpop.f32.mrf.mxu1  ;;  %v484_v50 = vld [vmem:[#allocation5 + $0x370] sm:$0xff] }
 0x1c5   :  { %v4479_v57 = vadd.f32 %v2508_v16, %v2203_v34  ;;  %v3644_v34 = vcombine.low %v472_v25, %v476_v26  ;;  %v489_v26 = vld [vmem:[#allocation5 + $0x398] sm:$0xff] }
 0x1c6   :  { %v2205_v40 = vpop.f32.mrf.mxu0  ;;  %v2510_v49 = vpop.f32.mrf.mxu1 }
 0x1c7   :  { %4721 = vst [vmem:[#allocation12_spill] sm:$0xff] %v4479_v57  ;;  %v3646_v40 = vcombine.low %v473_v54, %v477_v44  ;;  %v3653_v57 = vcombine.high %v480_v20, %v484_v50  ;;  %v493_v54 = vld [vmem:[#allocation5 + $0x3b8] sm:$0xff] }
 0x1c8   :  { %v2208_v42 = vpop.f32.mrf.mxu0  ;;  %2737 = vmatmul.mubr.bf16.gmra.mxu0 %v3636_v3  ;;  %v2513_v8 = vpop.f32.mrf.mxu1  ;;  %3042 = vmatmul.mubr.bf16.gmra.mxu1 %v3638_v9 }
 0x1c9   :  { %2744 = vmatprep.mubr.bf16.mxu0 %v3645_v45  ;;  %v4481_v5 = vadd.f32 %v2513_v8, %v2208_v42  ;;  %3049 = vmatprep.mubr.bf16.mxu1 %v3647_v59 }
 0x1ca   :  { %v2210_v7 = vpop.f32.mrf.mxu0  ;;  %v2515_v36 = vpop.f32.mrf.mxu1 }
 0x1cb   :  { %4722 = vst [vmem:[#allocation13_spill] sm:$0xff] %v4481_v5  ;;  %v488_v7 = vld [vmem:[#allocation5 + $0x390] sm:$0xff]  ;;  %v3663_v5 = vcombine.high %v489_v26, %v493_v54 }
 0x1cc   :  { %v2211_v11 = vpop.f32.mrf.mxu0  ;;  %v2516_v16 = vpop.f32.mrf.mxu1  ;;  %v492_v36 = vld [vmem:[#allocation5 + $0x3b0] sm:$0xff] }
 0x1cd   :  { %v4483_v49 = vadd.f32 %v2516_v16, %v2211_v11  ;;  %v3652_v11 = vcombine.low %v480_v20, %v484_v50  ;;  %v497_v50 = vld [vmem:[#allocation5 + $0x3d8] sm:$0xff] }
 0x1ce   :  { %v2213_v3 = vpop.f32.mrf.mxu0  ;;  %v2518_v9 = vpop.f32.mrf.mxu1 }
 0x1cf   :  { %4723 = vst [vmem:[#allocation14_spill] sm:$0xff] %v4483_v49  ;;  %v3654_v3 = vcombine.low %v481_v33, %v485_v18  ;;  %v3661_v49 = vcombine.high %v488_v7, %v492_v36  ;;  %v501_v33 = vld [vmem:[#allocation5 + $0x3f8] sm:$0xff] }
 0x1d0   :  { %v2216_v45 = vpop.f32.mrf.mxu0  ;;  %2745 = vmatmul.mubr.bf16.gmra.mxu0 %v3644_v34  ;;  %v2521_v42 = vpop.f32.mrf.mxu1  ;;  %3050 = vmatmul.mubr.bf16.gmra.mxu1 %v3646_v40 }
 0x1d1   :  { %2752 = vmatprep.mubr.bf16.mxu0 %v3653_v57  ;;  %v4485_v59 = vadd.f32 %v2521_v42, %v2216_v45  ;;  %3057 = vmatprep.mubr.bf16.mxu1 %v3655_v12 }
 0x1d2   :  { %v2218_v8 = vpop.f32.mrf.mxu0  ;;  %v2523_v25 = vpop.f32.mrf.mxu1 }
 0x1d3   :  { %4724 = vst [vmem:[#allocation15_spill] sm:$0xff] %v4485_v59  ;;  %v496_v8 = vld [vmem:[#allocation5 + $0x3d0] sm:$0xff]  ;;  %v3671_v59 = vcombine.high %v497_v50, %v501_v33 }
 0x1d4   :  { %v2219_v44 = vpop.f32.mrf.mxu0  ;;  %v2524_v16 = vpop.f32.mrf.mxu1  ;;  %v500_v25 = vld [vmem:[#allocation5 + $0x3f0] sm:$0xff] }
 0x1d5   :  { %v4487_v9 = vadd.f32 %v2524_v16, %v2219_v44  ;;  %v3660_v44 = vcombine.low %v488_v7, %v492_v36  ;;  %v505_v36 = vld [vmem:[#allocation5 + $0x418] sm:$0xff] }
 0x1d6   :  { %v2221_v34 = vpop.f32.mrf.mxu0  ;;  %v2526_v40 = vpop.f32.mrf.mxu1 }
 0x1d7   :  { %4725 = vst [vmem:[#allocation16_spill] sm:$0xff] %v4487_v9  ;;  %v3662_v34 = vcombine.low %v489_v26, %v493_v54  ;;  %v3669_v9 = vcombine.high %v496_v8, %v500_v25  ;;  %v509_v26 = vld [vmem:[#allocation5 + $0x438] sm:$0xff] }
 0x1d8   :  { %v2224_v57 = vpop.f32.mrf.mxu0  ;;  %2753 = vmatmul.mubr.bf16.gmra.mxu0 %v3652_v11  ;;  %v2529_v45 = vpop.f32.mrf.mxu1  ;;  %3058 = vmatmul.mubr.bf16.gmra.mxu1 %v3654_v3 }
 0x1d9   :  { %2760 = vmatprep.mubr.bf16.mxu0 %v3661_v49  ;;  %v4489_v12 = vadd.f32 %v2529_v45, %v2224_v57  ;;  %3065 = vmatprep.mubr.bf16.mxu1 %v3663_v5 }
 0x1da   :  { %v2226_v42 = vpop.f32.mrf.mxu0  ;;  %v2531_v20 = vpop.f32.mrf.mxu1 }
 0x1db   :  { %4726 = vst [vmem:[#allocation17_spill] sm:$0xff] %v4489_v12  ;;  %v504_v42 = vld [vmem:[#allocation5 + $0x410] sm:$0xff]  ;;  %v3679_v12 = vcombine.high %v505_v36, %v509_v26 }
 0x1dc   :  { %v2227_v18 = vpop.f32.mrf.mxu0  ;;  %v2532_v16 = vpop.f32.mrf.mxu1  ;;  %v508_v20 = vld [vmem:[#allocation5 + $0x430] sm:$0xff] }
 0x1dd   :  { %v4491_v40 = vadd.f32 %v2532_v16, %v2227_v18  ;;  %v3668_v18 = vcombine.low %v496_v8, %v500_v25  ;;  %v513_v25 = vld [vmem:[#allocation5 + $0x458] sm:$0xff] }
 0x1de   :  { %v2229_v11 = vpop.f32.mrf.mxu0  ;;  %v2534_v3 = vpop.f32.mrf.mxu1 }
 0x1df   :  { %4727 = vst [vmem:[#allocation18_spill] sm:$0xff] %v4491_v40  ;;  %v3670_v11 = vcombine.low %v497_v50, %v501_v33  ;;  %v3677_v40 = vcombine.high %v504_v42, %v508_v20  ;;  %v517_v50 = vld [vmem:[#allocation5 + $0x478] sm:$0xff] }
 0x1e0   :  { %v2232_v49 = vpop.f32.mrf.mxu0  ;;  %2761 = vmatmul.mubr.bf16.gmra.mxu0 %v3660_v44  ;;  %v2537_v57 = vpop.f32.mrf.mxu1  ;;  %3066 = vmatmul.mubr.bf16.gmra.mxu1 %v3662_v34 }
 0x1e1   :  { %2768 = vmatprep.mubr.bf16.mxu0 %v3669_v9  ;;  %v4493_v5 = vadd.f32 %v2537_v57, %v2232_v49  ;;  %3073 = vmatprep.mubr.bf16.mxu1 %v3671_v59 }
 0x1e2   :  { %v2234_v45 = vpop.f32.mrf.mxu0  ;;  %v2539_v7 = vpop.f32.mrf.mxu1 }
 0x1e3   :  { %4728 = vst [vmem:[#allocation19_spill] sm:$0xff] %v4493_v5  ;;  %v512_v45 = vld [vmem:[#allocation5 + $0x450] sm:$0xff]  ;;  %v3687_v5 = vcombine.high %v513_v25, %v517_v50 }
 0x1e4   :  { %v2235_v54 = vpop.f32.mrf.mxu0  ;;  %v2540_v16 = vpop.f32.mrf.mxu1  ;;  %v516_v7 = vld [vmem:[#allocation5 + $0x470] sm:$0xff] }
 0x1e5   :  { %v4495_v3 = vadd.f32 %v2540_v16, %v2235_v54  ;;  %v3676_v54 = vcombine.low %v504_v42, %v508_v20  ;;  %v521_v20 = vld [vmem:[#allocation5 + $0x498] sm:$0xff] }
 0x1e6   :  { %v2237_v44 = vpop.f32.mrf.mxu0  ;;  %v2542_v34 = vpop.f32.mrf.mxu1 }
 0x1e7   :  { %4729 = vst [vmem:[#allocation20_spill] sm:$0xff] %v4495_v3  ;;  %v3678_v44 = vcombine.low %v505_v36, %v509_v26  ;;  %v3685_v3 = vcombine.high %v512_v45, %v516_v7  ;;  %v525_v36 = vld [vmem:[#allocation5 + $0x4b8] sm:$0xff] }
 0x1e8   :  { %v2240_v9 = vpop.f32.mrf.mxu0  ;;  %2769 = vmatmul.mubr.bf16.gmra.mxu0 %v3668_v18  ;;  %v2545_v49 = vpop.f32.mrf.mxu1  ;;  %3074 = vmatmul.mubr.bf16.gmra.mxu1 %v3670_v11 }
 0x1e9   :  { %2776 = vmatprep.mubr.bf16.mxu0 %v3677_v40  ;;  %v4497_v59 = vadd.f32 %v2545_v49, %v2240_v9  ;;  %3081 = vmatprep.mubr.bf16.mxu1 %v3679_v12 }
 0x1ea   :  { %v2242_v57 = vpop.f32.mrf.mxu0  ;;  %v2547_v8 = vpop.f32.mrf.mxu1 }
 0x1eb   :  { %4730 = vst [vmem:[#allocation21_spill] sm:$0xff] %v4497_v59  ;;  %v520_v57 = vld [vmem:[#allocation5 + $0x490] sm:$0xff]  ;;  %v3695_v59 = vcombine.high %v521_v20, %v525_v36 }
 0x1ec   :  { %v2243_v33 = vpop.f32.mrf.mxu0  ;;  %v2548_v16 = vpop.f32.mrf.mxu1  ;;  %v524_v8 = vld [vmem:[#allocation5 + $0x4b0] sm:$0xff] }
 0x1ed   :  { %v4499_v34 = vadd.f32 %v2548_v16, %v2243_v33  ;;  %v3684_v33 = vcombine.low %v512_v45, %v516_v7  ;;  %v529_v7 = vld [vmem:[#allocation5 + $0x4d8] sm:$0xff] }
 0x1ee   :  { %v2245_v18 = vpop.f32.mrf.mxu0  ;;  %v2550_v11 = vpop.f32.mrf.mxu1 }
 0x1ef   :  { %4731 = vst [vmem:[#allocation22_spill] sm:$0xff] %v4499_v34  ;;  %v3686_v18 = vcombine.low %v513_v25, %v517_v50  ;;  %v3693_v34 = vcombine.high %v520_v57, %v524_v8  ;;  %v533_v25 = vld [vmem:[#allocation5 + $0x4f8] sm:$0xff] }
 0x1f0   :  { %v2248_v40 = vpop.f32.mrf.mxu0  ;;  %2777 = vmatmul.mubr.bf16.gmra.mxu0 %v3676_v54  ;;  %v2553_v9 = vpop.f32.mrf.mxu1  ;;  %3082 = vmatmul.mubr.bf16.gmra.mxu1 %v3678_v44 }
 0x1f1   :  { %2784 = vmatprep.mubr.bf16.mxu0 %v3685_v3  ;;  %v4501_v12 = vadd.f32 %v2553_v9, %v2248_v40  ;;  %3089 = vmatprep.mubr.bf16.mxu1 %v3687_v5 }
 0x1f2   :  { %v2250_v49 = vpop.f32.mrf.mxu0  ;;  %v2555_v42 = vpop.f32.mrf.mxu1 }
 0x1f3   :  { %4732 = vst [vmem:[#allocation23_spill] sm:$0xff] %v4501_v12  ;;  %v528_v49 = vld [vmem:[#allocation5 + $0x4d0] sm:$0xff]  ;;  %v3703_v12 = vcombine.high %v529_v7, %v533_v25 }
 0x1f4   :  { %v2251_v26 = vpop.f32.mrf.mxu0  ;;  %v2556_v16 = vpop.f32.mrf.mxu1  ;;  %v532_v42 = vld [vmem:[#allocation5 + $0x4f0] sm:$0xff] }
 0x1f5   :  { %v4503_v11 = vadd.f32 %v2556_v16, %v2251_v26  ;;  %v3692_v26 = vcombine.low %v520_v57, %v524_v8  ;;  %v537_v8 = vld [vmem:[#allocation5 + $0x518] sm:$0xff] }
 0x1f6   :  { %v2253_v54 = vpop.f32.mrf.mxu0  ;;  %v2558_v44 = vpop.f32.mrf.mxu1 }
 0x1f7   :  { %4733 = vst [vmem:[#allocation24_spill] sm:$0xff] %v4503_v11  ;;  %v3694_v54 = vcombine.low %v521_v20, %v525_v36  ;;  %v3701_v11 = vcombine.high %v528_v49, %v532_v42  ;;  %v541_v20 = vld [vmem:[#allocation5 + $0x538] sm:$0xff] }
 0x1f8   :  { %v2256_v3 = vpop.f32.mrf.mxu0  ;;  %2785 = vmatmul.mubr.bf16.gmra.mxu0 %v3684_v33  ;;  %v2561_v40 = vpop.f32.mrf.mxu1  ;;  %3090 = vmatmul.mubr.bf16.gmra.mxu1 %v3686_v18 }
 0x1f9   :  { %2792 = vmatprep.mubr.bf16.mxu0 %v3693_v34  ;;  %v4505_v5 = vadd.f32 %v2561_v40, %v2256_v3  ;;  %3097 = vmatprep.mubr.bf16.mxu1 %v3695_v59 }
 0x1fa   :  { %v2258_v9 = vpop.f32.mrf.mxu0  ;;  %v2563_v45 = vpop.f32.mrf.mxu1 }
 0x1fb   :  { %4734 = vst [vmem:[#allocation25_spill] sm:$0xff] %v4505_v5  ;;  %v536_v9 = vld [vmem:[#allocation5 + $0x510] sm:$0xff]  ;;  %v3711_v5 = vcombine.high %v537_v8, %v541_v20 }
 0x1fc   :  { %v2259_v50 = vpop.f32.mrf.mxu0  ;;  %v2564_v16 = vpop.f32.mrf.mxu1  ;;  %v540_v45 = vld [vmem:[#allocation5 + $0x530] sm:$0xff] }
 0x1fd   :  { %v4507_v44 = vadd.f32 %v2564_v16, %v2259_v50  ;;  %v3700_v50 = vcombine.low %v528_v49, %v532_v42  ;;  %v545_v42 = vld [vmem:[#allocation5 + $0x558] sm:$0xff] }
 0x1fe   :  { %v2261_v33 = vpop.f32.mrf.mxu0  ;;  %v2566_v18 = vpop.f32.mrf.mxu1 }
 0x1ff   :  { %4735 = vst [vmem:[#allocation26_spill] sm:$0xff] %v4507_v44  ;;  %v3702_v33 = vcombine.low %v529_v7, %v533_v25  ;;  %v3709_v44 = vcombine.high %v536_v9, %v540_v45  ;;  %v549_v7 = vld [vmem:[#allocation5 + $0x578] sm:$0xff] }
 0x200   :  { %v2264_v34 = vpop.f32.mrf.mxu0  ;;  %2793 = vmatmul.mubr.bf16.gmra.mxu0 %v3692_v26  ;;  %v2569_v3 = vpop.f32.mrf.mxu1  ;;  %3098 = vmatmul.mubr.bf16.gmra.mxu1 %v3694_v54 }
 0x201   :  { %2800 = vmatprep.mubr.bf16.mxu0 %v3701_v11  ;;  %v4509_v59 = vadd.f32 %v2569_v3, %v2264_v34  ;;  %3105 = vmatprep.mubr.bf16.mxu1 %v3703_v12 }
 0x202   :  { %v2266_v40 = vpop.f32.mrf.mxu0  ;;  %v2571_v57 = vpop.f32.mrf.mxu1 }
 0x203   :  { %4736 = vst [vmem:[#allocation27_spill] sm:$0xff] %v4509_v59  ;;  %v544_v40 = vld [vmem:[#allocation5 + $0x550] sm:$0xff]  ;;  %v3719_v59 = vcombine.high %v545_v42, %v549_v7 }
 0x204   :  { %v2267_v36 = vpop.f32.mrf.mxu0  ;;  %v2572_v16 = vpop.f32.mrf.mxu1  ;;  %v548_v57 = vld [vmem:[#allocation5 + $0x570] sm:$0xff] }
 0x205   :  { %v4511_v18 = vadd.f32 %v2572_v16, %v2267_v36  ;;  %v3708_v36 = vcombine.low %v536_v9, %v540_v45  ;;  %v553_v45 = vld [vmem:[#allocation5 + $0x598] sm:$0xff] }
 0x206   :  { %v2269_v26 = vpop.f32.mrf.mxu0  ;;  %v2574_v54 = vpop.f32.mrf.mxu1 }
 0x207   :  { %4737 = vst [vmem:[#allocation28_spill] sm:$0xff] %v4511_v18  ;;  %v3710_v26 = vcombine.low %v537_v8, %v541_v20  ;;  %v3717_v18 = vcombine.high %v544_v40, %v548_v57  ;;  %v557_v8 = vld [vmem:[#allocation5 + $0x5b8] sm:$0xff] }
 0x208   :  { %v2272_v11 = vpop.f32.mrf.mxu0  ;;  %2801 = vmatmul.mubr.bf16.gmra.mxu0 %v3700_v50  ;;  %v2577_v34 = vpop.f32.mrf.mxu1  ;;  %3106 = vmatmul.mubr.bf16.gmra.mxu1 %v3702_v33 }
 0x209   :  { %2808 = vmatprep.mubr.bf16.mxu0 %v3709_v44  ;;  %v4513_v12 = vadd.f32 %v2577_v34, %v2272_v11  ;;  %3113 = vmatprep.mubr.bf16.mxu1 %v3711_v5 }
 0x20a   :  { %v2274_v3 = vpop.f32.mrf.mxu0  ;;  %v2579_v49 = vpop.f32.mrf.mxu1 }
 0x20b   :  { %4738 = vst [vmem:[#allocation29_spill] sm:$0xff] %v4513_v12  ;;  %v552_v3 = vld [vmem:[#allocation5 + $0x590] sm:$0xff]  ;;  %v3727_v12 = vcombine.high %v553_v45, %v557_v8 }
 0x20c   :  { %v2275_v25 = vpop.f32.mrf.mxu0  ;;  %v2580_v16 = vpop.f32.mrf.mxu1  ;;  %v556_v49 = vld [vmem:[#allocation5 + $0x5b0] sm:$0xff] }
 0x20d   :  { %v4515_v54 = vadd.f32 %v2580_v16, %v2275_v25  ;;  %v3716_v25 = vcombine.low %v544_v40, %v548_v57  ;;  %v561_v57 = vld [vmem:[#allocation5 + $0x5d8] sm:$0xff] }
 0x20e   :  { %v2277_v50 = vpop.f32.mrf.mxu0  ;;  %v2582_v33 = vpop.f32.mrf.mxu1 }
 0x20f   :  { %4739 = vst [vmem:[#allocation30_spill] sm:$0xff] %v4515_v54  ;;  %v3718_v50 = vcombine.low %v545_v42, %v549_v7  ;;  %v3725_v54 = vcombine.high %v552_v3, %v556_v49  ;;  %v565_v42 = vld [vmem:[#allocation5 + $0x5f8] sm:$0xff] }
 0x210   :  { %v2280_v44 = vpop.f32.mrf.mxu0  ;;  %2809 = vmatmul.mubr.bf16.gmra.mxu0 %v3708_v36  ;;  %v2585_v11 = vpop.f32.mrf.mxu1  ;;  %3114 = vmatmul.mubr.bf16.gmra.mxu1 %v3710_v26 }
 0x211   :  { %2816 = vmatprep.mubr.bf16.mxu0 %v3717_v18  ;;  %v4517_v5 = vadd.f32 %v2585_v11, %v2280_v44  ;;  %3121 = vmatprep.mubr.bf16.mxu1 %v3719_v59 }
 0x212   :  { %v2282_v34 = vpop.f32.mrf.mxu0  ;;  %v2587_v9 = vpop.f32.mrf.mxu1 }
 0x213   :  { %4740 = vst [vmem:[#allocation31_spill] sm:$0xff] %v4517_v5  ;;  %v560_v34 = vld [vmem:[#allocation5 + $0x5d0] sm:$0xff]  ;;  %v3735_v5 = vcombine.high %v561_v57, %v565_v42 }
 0x214   :  { %v2283_v20 = vpop.f32.mrf.mxu0  ;;  %v2588_v16 = vpop.f32.mrf.mxu1  ;;  %v564_v9 = vld [vmem:[#allocation5 + $0x5f0] sm:$0xff] }
 0x215   :  { %v4519_v33 = vadd.f32 %v2588_v16, %v2283_v20  ;;  %v3724_v20 = vcombine.low %v552_v3, %v556_v49  ;;  %v569_v49 = vld [vmem:[#allocation5 + $0x618] sm:$0xff] }
 0x216   :  { %v2285_v36 = vpop.f32.mrf.mxu0  ;;  %v2590_v26 = vpop.f32.mrf.mxu1 }
 0x217   :  { %4741 = vst [vmem:[#allocation32_spill] sm:$0xff] %v4519_v33  ;;  %v3726_v36 = vcombine.low %v553_v45, %v557_v8  ;;  %v3733_v33 = vcombine.high %v560_v34, %v564_v9  ;;  %v573_v45 = vld [vmem:[#allocation5 + $0x638] sm:$0xff] }
 0x218   :  { %v2288_v18 = vpop.f32.mrf.mxu0  ;;  %2817 = vmatmul.mubr.bf16.gmra.mxu0 %v3716_v25  ;;  %v2593_v44 = vpop.f32.mrf.mxu1  ;;  %3122 = vmatmul.mubr.bf16.gmra.mxu1 %v3718_v50 }
 0x219   :  { %2824 = vmatprep.mubr.bf16.mxu0 %v3725_v54  ;;  %v4521_v59 = vadd.f32 %v2593_v44, %v2288_v18  ;;  %3129 = vmatprep.mubr.bf16.mxu1 %v3727_v12 }
 0x21a   :  { %v2290_v11 = vpop.f32.mrf.mxu0  ;;  %v2595_v40 = vpop.f32.mrf.mxu1 }
 0x21b   :  { %4742 = vst [vmem:[#allocation33_spill] sm:$0xff] %v4521_v59  ;;  %v568_v11 = vld [vmem:[#allocation5 + $0x610] sm:$0xff]  ;;  %v3743_v59 = vcombine.high %v569_v49, %v573_v45 }
 0x21c   :  { %v2291_v7 = vpop.f32.mrf.mxu0  ;;  %v2596_v16 = vpop.f32.mrf.mxu1  ;;  %v572_v40 = vld [vmem:[#allocation5 + $0x630] sm:$0xff] }
 0x21d   :  { %v4523_v26 = vadd.f32 %v2596_v16, %v2291_v7  ;;  %v3732_v7 = vcombine.low %v560_v34, %v564_v9  ;;  %v577_v9 = vld [vmem:[#allocation5 + $0x658] sm:$0xff] }
 0x21e   :  { %v2293_v25 = vpop.f32.mrf.mxu0  ;;  %v2598_v50 = vpop.f32.mrf.mxu1 }
 0x21f   :  { %4743 = vst [vmem:[#allocation34_spill] sm:$0xff] %v4523_v26  ;;  %v3734_v25 = vcombine.low %v561_v57, %v565_v42  ;;  %v3741_v26 = vcombine.high %v568_v11, %v572_v40  ;;  %v581_v57 = vld [vmem:[#allocation5 + $0x678] sm:$0xff] }
 0x220   :  { %v2296_v54 = vpop.f32.mrf.mxu0  ;;  %2825 = vmatmul.mubr.bf16.gmra.mxu0 %v3724_v20  ;;  %v2601_v18 = vpop.f32.mrf.mxu1  ;;  %3130 = vmatmul.mubr.bf16.gmra.mxu1 %v3726_v36 }
 0x221   :  { %2832 = vmatprep.mubr.bf16.mxu0 %v3733_v33  ;;  %v4525_v12 = vadd.f32 %v2601_v18, %v2296_v54  ;;  %3137 = vmatprep.mubr.bf16.mxu1 %v3735_v5 }
 0x222   :  { %v2298_v44 = vpop.f32.mrf.mxu0  ;;  %v2603_v3 = vpop.f32.mrf.mxu1 }
 0x223   :  { %4744 = vst [vmem:[#allocation35_spill] sm:$0xff] %v4525_v12  ;;  %v576_v44 = vld [vmem:[#allocation5 + $0x650] sm:$0xff]  ;;  %v3751_v12 = vcombine.high %v577_v9, %v581_v57 }
 0x224   :  { %v2299_v8 = vpop.f32.mrf.mxu0  ;;  %v2604_v16 = vpop.f32.mrf.mxu1  ;;  %v580_v3 = vld [vmem:[#allocation5 + $0x670] sm:$0xff] }
 0x225   :  { %v4527_v50 = vadd.f32 %v2604_v16, %v2299_v8  ;;  %v3740_v8 = vcombine.low %v568_v11, %v572_v40  ;;  %v584_v40 = vld [vmem:[#allocation5 + $0x690] sm:$0xff] }
 0x226   :  { %v2301_v20 = vpop.f32.mrf.mxu0  ;;  %v2606_v36 = vpop.f32.mrf.mxu1 }
 0x227   :  { %4745 = vst [vmem:[#allocation36_spill] sm:$0xff] %v4527_v50  ;;  %v3742_v20 = vcombine.low %v569_v49, %v573_v45  ;;  %v3749_v50 = vcombine.high %v576_v44, %v580_v3  ;;  %v588_v49 = vld [vmem:[#allocation5 + $0x6b0] sm:$0xff]  ;;  %v585_v45 = vld [vmem:[#allocation5 + $0x698] sm:$0xff] }
 0x228   :  { %v2304_v33 = vpop.f32.mrf.mxu0  ;;  %2833 = vmatmul.mubr.bf16.gmra.mxu0 %v3732_v7  ;;  %v2609_v54 = vpop.f32.mrf.mxu1  ;;  %3138 = vmatmul.mubr.bf16.gmra.mxu1 %v3734_v25 }
 0x229   :  { %2840 = vmatprep.mubr.bf16.mxu0 %v3741_v26  ;;  %v4529_v5 = vadd.f32 %v2609_v54, %v2304_v33  ;;  %3145 = vmatprep.mubr.bf16.mxu1 %v3743_v59  ;;  %v3292_v26 = vld [vmem:[%s4716_s2 + $0x10] sm:$0xff] }
 0x22a   :  { %v2306_v18 = vpop.f32.mrf.mxu0  ;;  %v2611_v34 = vpop.f32.mrf.mxu1  ;;  %3306 = vperm.xlu0 %3987, %v3292_v26  }
 0x22c   :  { %v2307_v42 = vpop.f32.mrf.mxu0  ;;  %v2612_v16 = vpop.f32.mrf.mxu1 }
 0x22d   :  { %v4531_v36 = vadd.f32 %v2612_v16, %v2307_v42  ;;  %v589_v42 = vld [vmem:[#allocation5 + $0x6b8] sm:$0xff] }
 0x22e   :  { %v2309_v7 = vpop.f32.mrf.mxu0  ;;  %v2614_v25 = vpop.f32.mrf.mxu1  ;;  %v3293_v16 = vld [vmem:[%s4716_s2 + $0x18] sm:$0xff] }
 0x22f   :  { %4746 = vst [vmem:[#allocation37_spill] sm:$0xff] %v4531_v36  ;;  %3311 = vperm.xlu0 %3987, %v3293_v16   ;;  %v3750_v7 = vcombine.low %v577_v9, %v581_v57  ;;  %v3757_v25 = vcombine.high %v584_v40, %v588_v49  ;;  %v596_v16 = vld [vmem:[#allocation5 + $0x6f0] sm:$0xff] }
 0x230   :  { %v2650_v59 = vpop.f32.mrf.mxu0  ;;  %2841 = vmatmul.mubr.bf16.gmra.mxu0 %v3740_v8  ;;  %v2955_v54 = vpop.f32.mrf.mxu1  ;;  %3146 = vmatmul.mubr.bf16.gmra.mxu1 %v3742_v20  ;;  %v3748_v20 = vcombine.low %v576_v44, %v580_v3  ;;  %v3291_v44 = vld [vmem:[%s4716_s2 + $0x8] sm:$0xff] }
 0x231   :  { %v2651_v33 = vadd.f32 %v2650_v59, %v4397_v2  ;;  %2848 = vmatprep.mubr.bf16.mxu0 %v3749_v50  ;;  %3153 = vmatprep.mubr.bf16.mxu1 %v3751_v12  ;;  %v3290_v2 = vld [vmem:[%s4716_s2] sm:$0xff]  ;;  %v3759_v59 = vcombine.high %v585_v45, %v589_v42 }
 0x232   :  { %v2652_v11 = vpop.f32.mrf.mxu0  ;;  %v2957_v34 = vpop.f32.mrf.mxu1  ;;  %3296 = vperm.xlu1 %3988, %v3290_v2   ;;  %v593_v2 = vld [vmem:[#allocation5 + $0x6d8] sm:$0xff] }
 0x233   :  { %v4537_v18 = vadd.f32 %v2955_v54, %v2651_v33  ;;  %v3336_v11 = vld [vmem:[%s4718_s4 + $0x20] sm:$0xff]  ;;  %v592_v34 = vld [vmem:[#allocation5 + $0x6d0] sm:$0xff] }
 0x234   :  { %v2653_v8 = vpop.f32.mrf.mxu0  ;;  %v2958_v50 = vpop.f32.mrf.mxu1  ;;  %3362 = vperm.xlu0 %3987, %v3336_v11   ;;  %v3765_v11 = vcombine.high %v592_v34, %v596_v16 }
 0x235   :  { %v2654_v12 = vadd.f32 %v2653_v8, %v4399_v46 }
 0x236   :  { %v2655_v26 = vpop.f32.mrf.mxu0  ;;  %v2960_v54 = vpop.f32.mrf.mxu1  ;;  %3301 = vperm.xlu1 %3988, %v3291_v44  }
 0x237   :  { %v4546_v33 = vadd.f32 %v2958_v50, %v2654_v12  ;;  %v597_v50 = vld [vmem:[#allocation5 + $0x6f8] sm:$0xff]  ;;  %v3758_v54 = vcombine.low %v585_v45, %v589_v42 }
 0x238   :  { %v2658_v3 = vpop.f32.mrf.mxu0  ;;  %2849 = vmatmul.mubr.bf16.gmra.mxu0 %v3748_v20  ;;  %v2963_v9 = vpop.f32.mrf.mxu1  ;;  %3154 = vmatmul.mubr.bf16.gmra.mxu1 %v3750_v7  ;;  %v3338_v20 = vld [vmem:[%s4718_s4 + $0x30] sm:$0xff] }
 0x239   :  { %v2659_v46 = vadd.f32 %v2658_v3, %v4401_v51  ;;  %2856 = vmatprep.mubr.bf16.mxu0 %v3757_v25  ;;  %3161 = vmatprep.mubr.bf16.mxu1 %v3759_v59  ;;  %v3337_v51 = vld [vmem:[%s4718_s4 + $0x28] sm:$0xff]  ;;  %v3756_v25 = vcombine.low %v584_v40, %v588_v49  ;;  %v3767_v3 = vcombine.high %v593_v2, %v597_v50  ;;  %v3339_v40 = vld [vmem:[%s4718_s4 + $0x38] sm:$0xff] }
 0x23a   :  { %v2660_v57 = vpop.f32.mrf.mxu0  ;;  %v2965_v12 = vpop.f32.mrf.mxu1  ;;  %3372 = vperm.xlu0 %3987, %v3338_v20   ;;  %3367 = vperm.xlu1 %3988, %v3337_v51   ;;  %v604_v20 = vld [vmem:[#allocation5 + $0x730] sm:$0xff]  ;;  %v601_v51 = vld [vmem:[#allocation5 + $0x718] sm:$0xff] }
 0x23b   :  { %v4555_v8 = vadd.f32 %v2963_v9, %v2659_v46  ;;  %v3332_v57 = vld [vmem:[%s4718_s4] sm:$0xff]  ;;  %v600_v12 = vld [vmem:[#allocation5 + $0x710] sm:$0xff] }
 0x23c   :  { %v2661_v7 = vpop.f32.mrf.mxu0  ;;  %v2966_v59 = vpop.f32.mrf.mxu1 }
 0x23d   :  { %v2662_v26 = vadd.f32 %v2661_v7, %v4403_v62 }
 0x23e   :  { %v2663_v44 = vpop.f32.mrf.mxu0  ;;  %v2968_v9 = vpop.f32.mrf.mxu1  ;;  %3342 = vperm.xlu0 %3987, %v3332_v57   ;;  %3377 = vperm.xlu1 %3988, %v3339_v40   ;;  %v3766_v57 = vcombine.low %v593_v2, %v597_v50  ;;  %v3773_v40 = vcombine.high %v600_v12, %v604_v20  ;;  %v608_v2 = vld [vmem:[#allocation5 + $0x750] sm:$0xff] }
 0x23f   :  { %v4564_v46 = vadd.f32 %v2966_v59, %v2662_v26  ;;  %v605_v59 = vld [vmem:[#allocation5 + $0x738] sm:$0xff]  ;;  %v612_v50 = vld [vmem:[#allocation5 + $0x770] sm:$0xff] }
 0x240   :  { %v2666_v49 = vpop.f32.mrf.mxu0  ;;  %2857 = vmatmul.mubr.bf16.gmra.mxu0 %v3756_v25  ;;  %v2971_v45 = vpop.f32.mrf.mxu1  ;;  %3162 = vmatmul.mubr.bf16.gmra.mxu1 %v3758_v54  ;;  %v3334_v25 = vld [vmem:[%s4718_s4 + $0x10] sm:$0xff] }
 0x241   :  { %v2667_v62 = vadd.f32 %v2666_v49, %v4405_v10  ;;  %2864 = vmatprep.mubr.bf16.mxu0 %v3765_v11  ;;  %3169 = vmatprep.mubr.bf16.mxu1 %v3767_v3  ;;  %v3333_v10 = vld [vmem:[%s4718_s4 + $0x8] sm:$0xff]  ;;  %v3764_v11 = vcombine.low %v592_v34, %v596_v16 }
 0x242   :  { %v2668_v42 = vpop.f32.mrf.mxu0  ;;  %v2973_v26 = vpop.f32.mrf.mxu1  ;;  %3352 = vperm.xlu0 %3987, %v3334_v25   ;;  %3347 = vperm.xlu1 %3988, %v3333_v10   ;;  %v609_v10 = vld [vmem:[#allocation5 + $0x758] sm:$0xff] }
 0x243   :  { %v4573_v7 = vadd.f32 %v2971_v45, %v2667_v62  ;;  %v3775_v62 = vcombine.high %v601_v51, %v605_v59  ;;  %v3335_v26 = vld [vmem:[%s4718_s4 + $0x18] sm:$0xff] }
 0x244   :  { %v2669_v54 = vpop.f32.mrf.mxu0  ;;  %v2974_v9 = vpop.f32.mrf.mxu1 }
 0x245   :  { %v3226_v44 = vmax.f32 %v4537_v18, %v4573_v7  ;;  %v2670_v3 = vadd.f32 %v2669_v54, %v4407_v22  ;;  %v613_v54 = vld [vmem:[#allocation5 + $0x778] sm:$0xff] }
 0x246   :  { %v2671_v49 = vpop.f32.mrf.mxu0  ;;  %v2976_v42 = vpop.f32.mrf.mxu1  ;;  %3357 = vperm.xlu1 %3988, %v3335_v26  }
 0x247   :  { %v2975_v45 = vadd.f32 %v2974_v9, %v2670_v3  ;;  %v3772_v9 = vcombine.low %v600_v12, %v604_v20 }
 0x248   :  { %v2674_v36 = vpop.f32.mrf.mxu0  ;;  %2865 = vmatmul.mubr.bf16.gmra.mxu0 %v3764_v11  ;;  %v2979_v16 = vpop.f32.mrf.mxu1  ;;  %3170 = vmatmul.mubr.bf16.gmra.mxu1 %v3766_v57 }
 0x249   :  { %v3242_v34 = vmax.f32 %v4546_v33, %v2975_v45  ;;  %v2675_v18 = vadd.f32 %v2674_v36, %v4409_v28  ;;  %2872 = vmatprep.mubr.bf16.mxu0 %v3773_v40  ;;  %3177 = vmatprep.mubr.bf16.mxu1 %v3775_v62  ;;  %v3774_v28 = vcombine.low %v601_v51, %v605_v59  ;;  %v617_v59 = vld [vmem:[#allocation5 + $0x798] sm:$0xff] }
 0x24a   :  { %v2676_v22 = vpop.f32.mrf.mxu0  ;;  %v2981_v25 = vpop.f32.mrf.mxu1  ;;  %v3781_v36 = vcombine.high %v608_v2, %v612_v50  ;;  %v3783_v40 = vcombine.high %v609_v10, %v613_v54 }
 0x24b   :  { %v2980_v7 = vadd.f32 %v2979_v16, %v2675_v18  ;;  %v621_v22 = vld [vmem:[#allocation5 + $0x7b8] sm:$0xff]  ;;  %v3780_v25 = vcombine.low %v608_v2, %v612_v50  ;;  %v624_v2 = vld [vmem:[#allocation5 + $0x7d0] sm:$0xff] }
 0x24c   :  { %v2677_v3 = vpop.f32.mrf.mxu0  ;;  %v2982_v49 = vpop.f32.mrf.mxu1 }
 0x24d   :  { %v3258_v11 = vmax.f32 %v4555_v8, %v2980_v7  ;;  %v2678_v33 = vadd.f32 %v2677_v3, %v4411_v37  ;;  %v616_v8 = vld [vmem:[#allocation5 + $0x790] sm:$0xff] }
 0x24e   :  { %v2679_v57 = vpop.f32.mrf.mxu0  ;;  %v2984_v62 = vpop.f32.mrf.mxu1  ;;  %v620_v37 = vld [vmem:[#allocation5 + $0x7b0] sm:$0xff] }
 0x24f   :  { %v2983_v45 = vadd.f32 %v2982_v49, %v2678_v33  ;;  %v3782_v33 = vcombine.low %v609_v10, %v613_v54  ;;  %v625_v54 = vld [vmem:[#allocation5 + $0x7d8] sm:$0xff] }
 0x250   :  { %v2682_v42 = vpop.f32.mrf.mxu0  ;;  %2873 = vmatmul.mubr.bf16.gmra.mxu0 %v3772_v9  ;;  %v2987_v16 = vpop.f32.mrf.mxu1  ;;  %3178 = vmatmul.mubr.bf16.gmra.mxu1 %v3774_v28  ;;  %v3791_v28 = vcombine.high %v617_v59, %v621_v22 }
 0x251   :  { %v3274_v26 = vmax.f32 %v4564_v46, %v2983_v45  ;;  %v2683_v18 = vadd.f32 %v2682_v42, %v4413_v43  ;;  %2880 = vmatprep.mubr.bf16.mxu0 %v3781_v36  ;;  %3185 = vmatprep.mubr.bf16.mxu1 %v3783_v40  ;;  %v3789_v43 = vcombine.high %v616_v8, %v620_v37 }
 0x252   :  { %v2684_v12 = vpop.f32.mrf.mxu0  ;;  %v2989_v51 = vpop.f32.mrf.mxu1 }
 0x253   :  { %v2988_v20 = vadd.f32 %v2987_v16, %v2683_v18  ;;  %v629_v18 = vld [vmem:[#allocation5 + $0x7f8] sm:$0xff]  ;;  %v3788_v12 = vcombine.low %v616_v8, %v620_v37  ;;  %v632_v8 = vld [vmem:[#allocation5 + $0x810] sm:$0xff] }
 0x254   :  { %v2685_v7 = vpop.f32.mrf.mxu0  ;;  %v2990_v46 = vpop.f32.mrf.mxu1 }
 0x255   :  { %v4593_v3 = vmax.f32 %v3226_v44, %v2988_v20  ;;  %v2686_v9 = vadd.f32 %v2685_v7, %v4415_v56  ;;  %v628_v56 = vld [vmem:[#allocation5 + $0x7f0] sm:$0xff]  ;;  %v3790_v7 = vcombine.low %v617_v59, %v621_v22  ;;  %v633_v22 = vld [vmem:[#allocation5 + $0x818] sm:$0xff] }
 0x256   :  { %v2687_v49 = vpop.f32.mrf.mxu0  ;;  %v2992_v57 = vpop.f32.mrf.mxu1 }
 0x257   :  { %v2991_v36 = vadd.f32 %v2990_v46, %v2686_v9  ;;  %v3799_v9 = vcombine.high %v625_v54, %v629_v18  ;;  %v637_v57 = vld [vmem:[#allocation5 + $0x838] sm:$0xff] }
 0x258   :  { %v2690_v40 = vpop.f32.mrf.mxu0  ;;  %2881 = vmatmul.mubr.bf16.gmra.mxu0 %v3780_v25  ;;  %v2995_v42 = vpop.f32.mrf.mxu1  ;;  %3186 = vmatmul.mubr.bf16.gmra.mxu1 %v3782_v33 }
 0x259   :  { %v4596_v45 = vmax.f32 %v3242_v34, %v2991_v36  ;;  %v2691_v62 = vadd.f32 %v2690_v40, %v4417_v61  ;;  %2888 = vmatprep.mubr.bf16.mxu0 %v3789_v43  ;;  %3193 = vmatprep.mubr.bf16.mxu1 %v3791_v28  ;;  %v3797_v61 = vcombine.high %v624_v2, %v628_v56 }
 0x25a   :  { %v2692_v44 = vpop.f32.mrf.mxu0  ;;  %v2997_v10 = vpop.f32.mrf.mxu1 }
 0x25b   :  { %v2996_v50 = vadd.f32 %v2995_v42, %v2691_v62  ;;  %v3796_v62 = vcombine.low %v624_v2, %v628_v56 }
 0x25c   :  { %v2693_v16 = vpop.f32.mrf.mxu0  ;;  %v2998_v51 = vpop.f32.mrf.mxu1 }
 0x25d   :  { %v4599_v20 = vmax.f32 %v3258_v11, %v2996_v50  ;;  %v2694_v34 = vadd.f32 %v2693_v16, %v4419_v17  ;;  %v636_v17 = vld [vmem:[#allocation5 + $0x830] sm:$0xff]  ;;  %v3798_v50 = vcombine.low %v625_v54, %v629_v18  ;;  %v3807_v16 = vcombine.high %v633_v22, %v637_v57  ;;  %v641_v18 = vld [vmem:[#allocation5 + $0x858] sm:$0xff] }
 0x25e   :  { %v2695_v25 = vpop.f32.mrf.mxu0  ;;  %v3000_v33 = vpop.f32.mrf.mxu1 }
 0x25f   :  { %v2999_v46 = vadd.f32 %v2998_v51, %v2694_v34  ;;  %v3804_v33 = vcombine.low %v632_v8, %v636_v17 }
 0x260   :  { %v2698_v43 = vpop.f32.mrf.mxu0  ;;  %2889 = vmatmul.mubr.bf16.gmra.mxu0 %v3788_v12  ;;  %v3003_v36 = vpop.f32.mrf.mxu1  ;;  %3194 = vmatmul.mubr.bf16.gmra.mxu1 %v3790_v7 }
 0x261   :  { %v4602_v49 = vmax.f32 %v3274_v26, %v2999_v46  ;;  %v2699_v28 = vadd.f32 %v2698_v43, %v4421_v24  ;;  %2896 = vmatprep.mubr.bf16.mxu0 %v3797_v61  ;;  %3201 = vmatprep.mubr.bf16.mxu1 %v3799_v9  ;;  %v3805_v24 = vcombine.high %v632_v8, %v636_v17  ;;  %v645_v9 = vld [vmem:[#allocation5 + $0x878] sm:$0xff] }
 0x262   :  { %v2700_v11 = vpop.f32.mrf.mxu0  ;;  %v3005_v59 = vpop.f32.mrf.mxu1 }
 0x263   :  { %v3004_v37 = vadd.f32 %v3003_v36, %v2699_v28  ;;  %v3806_v36 = vcombine.low %v633_v22, %v637_v57 }
 0x264   :  { %v2701_v40 = vpop.f32.mrf.mxu0  ;;  %v3006_v44 = vpop.f32.mrf.mxu1 }
 0x265   :  { %v3228_v42 = vmax.f32 %v4593_v3, %v3004_v37  ;;  %v2702_v26 = vadd.f32 %v2701_v40, %v4423_v1  ;;  %v640_v3 = vld [vmem:[#allocation5 + $0x850] sm:$0xff]  ;;  %v3815_v37 = vcombine.high %v641_v18, %v645_v9 }
 0x266   :  { %v2703_v10 = vpop.f32.mrf.mxu0  ;;  %v3008_v34 = vpop.f32.mrf.mxu1  ;;  %v644_v1 = vld [vmem:[#allocation5 + $0x870] sm:$0xff] }
 0x267   :  { %v3007_v12 = vadd.f32 %v3006_v44, %v2702_v26  ;;  %v3812_v22 = vcombine.low %v640_v3, %v644_v1 }
 0x268   :  { %v2706_v51 = vpop.f32.mrf.mxu0  ;;  %2897 = vmatmul.mubr.bf16.gmra.mxu0 %v3796_v62  ;;  %v3011_v25 = vpop.f32.mrf.mxu1  ;;  %3202 = vmatmul.mubr.bf16.gmra.mxu1 %v3798_v50 }
 0x269   :  { %v3244_v7 = vmax.f32 %v4596_v45, %v3007_v12  ;;  %v2707_v61 = vadd.f32 %v2706_v51, %v4425_v41  ;;  %2904 = vmatprep.mubr.bf16.mxu0 %v3805_v24  ;;  %3209 = vmatprep.mubr.bf16.mxu1 %v3807_v16  ;;  %v3813_v41 = vcombine.high %v640_v3, %v644_v1 }
 0x26a   :  { %v2708_v2 = vpop.f32.mrf.mxu0  ;;  %v3013_v54 = vpop.f32.mrf.mxu1  ;;  %v3814_v16 = vcombine.low %v641_v18, %v645_v9 }
 0x26b   :  { %v3012_v56 = vadd.f32 %v3011_v25, %v2707_v61 }
 0x26c   :  { %v2709_v46 = vpop.f32.mrf.mxu0  ;;  %v3014_v45 = vpop.f32.mrf.mxu1 }
 0x26d   :  { %v3260_v43 = vmax.f32 %v4599_v20, %v3012_v56  ;;  %v2710_v28 = vadd.f32 %v2709_v46, %v4427_v55 }
 0x26e   :  { %v2711_v11 = vpop.f32.mrf.mxu0  ;;  %v3016_v40 = vpop.f32.mrf.mxu1 }
 0x26f   :  { %v3015_v59 = vadd.f32 %v3014_v45, %v2710_v28 }
 0x270   :  { %v2714_v62 = vpop.f32.mrf.mxu0  ;;  %2905 = vmatmul.mubr.bf16.gmra.mxu0 %v3804_v33  ;;  %v3019_v50 = vpop.f32.mrf.mxu1  ;;  %3210 = vmatmul.mubr.bf16.gmra.mxu1 %v3806_v36 }
 0x271   :  { %v3276_v26 = vmax.f32 %v4602_v49, %v3015_v59  ;;  %v2715_v44 = vadd.f32 %v2714_v62, %v4429_v63  ;;  %2912 = vmatprep.mubr.bf16.mxu0 %v3813_v41  ;;  %3217 = vmatprep.mubr.bf16.mxu1 %v3815_v37 }
 0x272   :  { %v2716_v8 = vpop.f32.mrf.mxu0  ;;  %v3021_v55 = vpop.f32.mrf.mxu1 }
 0x273   :  { %v3020_v20 = vadd.f32 %v3019_v50, %v2715_v44 }
 0x274   :  { %v2717_v17 = vpop.f32.mrf.mxu0  ;;  %v3022_v10 = vpop.f32.mrf.mxu1 }
 0x275   :  { %v3229_v57 = vmax.f32 %v3228_v42, %v3020_v20  ;;  %v2718_v24 = vadd.f32 %v2717_v17, %v4431_v19 }
 0x276   :  { %v2719_v12 = vpop.f32.mrf.mxu0  ;;  %v3024_v51 = vpop.f32.mrf.mxu1 }
 0x277   :  { %v3023_v34 = vadd.f32 %v3022_v10, %v2718_v24 }
 0x278   :  { %v2722_v49 = vpop.f32.mrf.mxu0  ;;  %2913 = vmatmul.mubr.bf16.gmra.mxu0 %v3812_v22  ;;  %v3027_v25 = vpop.f32.mrf.mxu1  ;;  %3218 = vmatmul.mubr.bf16.gmra.mxu1 %v3814_v16 }
 0x279   :  { %v3245_v63 = vmax.f32 %v3244_v7, %v3023_v34  ;;  %v2723_v61 = vadd.f32 %v2722_v49, %v4433_v27 }
 0x27a   :  { %v2724_v2 = vpop.f32.mrf.mxu0  ;;  %v3029_v54 = vpop.f32.mrf.mxu1 }
 0x27b   :  { %v3028_v56 = vadd.f32 %v3027_v25, %v2723_v61 }
 0x27c   :  { %v2725_v46 = vpop.f32.mrf.mxu0  ;;  %v3030_v19 = vpop.f32.mrf.mxu1 }
 0x27d   :  { %v3261_v3 = vmax.f32 %v3260_v43, %v3028_v56  ;;  %v2726_v42 = vadd.f32 %v2725_v46, %v4435_v39 }
 0x27e   :  { %v2727_v1 = vpop.f32.mrf.mxu0  ;;  %v3032_v9 = vpop.f32.mrf.mxu1 }
 0x27f   :  { %v3031_v18 = vadd.f32 %v3030_v19, %v2726_v42 }
 0x280   :  { %v2730_v33 = vpop.f32.mrf.mxu0  ;;  %v3035_v7 = vpop.f32.mrf.mxu1 }
 0x281   :  { %v3277_v28 = vmax.f32 %v3276_v26, %v3031_v18  ;;  %v2731_v45 = vadd.f32 %v2730_v33, %v4437_v48 }
 0x282   :  { %v2732_v36 = vpop.f32.mrf.mxu0  ;;  %v3037_v41 = vpop.f32.mrf.mxu1 }
 0x283   :  { %v3036_v27 = vadd.f32 %v3035_v7, %v2731_v45 }
 0x284   :  { %v2733_v11 = vpop.f32.mrf.mxu0  ;;  %v3038_v40 = vpop.f32.mrf.mxu1 }
 0x285   :  { %v3230_v37 = vmax.f32 %v3229_v57, %v3036_v27  ;;  %v2734_v59 = vadd.f32 %v2733_v11, %v4439_v6 }
 0x286   :  { %v2735_v43 = vpop.f32.mrf.mxu0  ;;  %v3040_v39 = vpop.f32.mrf.mxu1 }
 0x287   :  { %v3039_v62 = vadd.f32 %v3038_v40, %v2734_v59 }
 0x288   :  { %v2738_v44 = vpop.f32.mrf.mxu0  ;;  %v3043_v20 = vpop.f32.mrf.mxu1 }
 0x289   :  { %v3246_v50 = vmax.f32 %v3245_v63, %v3039_v62  ;;  %v2739_v8 = vadd.f32 %v2738_v44, %v4441_v13 }
 0x28a   :  { %v2740_v26 = vpop.f32.mrf.mxu0  ;;  %v3045_v48 = vpop.f32.mrf.mxu1 }
 0x28b   :  { %v3044_v55 = vadd.f32 %v3043_v20, %v2739_v8 }
 0x28c   :  { %v2741_v17 = vpop.f32.mrf.mxu0  ;;  %v3046_v10 = vpop.f32.mrf.mxu1 }
 0x28d   :  { %v3262_v22 = vmax.f32 %v3261_v3, %v3044_v55  ;;  %v2742_v24 = vadd.f32 %v2741_v17, %v4443_v31 }
 0x28e   :  { %v2743_v57 = vpop.f32.mrf.mxu0  ;;  %v3048_v6 = vpop.f32.mrf.mxu1 }
 0x28f   :  { %v3047_v16 = vadd.f32 %v3046_v10, %v2742_v24 }
 0x290   :  { %v2746_v12 = vpop.f32.mrf.mxu0  ;;  %v3051_v49 = vpop.f32.mrf.mxu1 }
 0x291   :  { %v3278_v34 = vmax.f32 %v3277_v28, %v3047_v16  ;;  %v2747_v51 = vadd.f32 %v2746_v12, %v4445_v35 }
 0x292   :  { %v2748_v63 = vpop.f32.mrf.mxu0  ;;  %v3053_v13 = vpop.f32.mrf.mxu1 }
 0x293   :  { %v3052_v61 = vadd.f32 %v3051_v49, %v2747_v51 }
 0x294   :  { %v2749_v25 = vpop.f32.mrf.mxu0  ;;  %v3054_v54 = vpop.f32.mrf.mxu1 }
 0x295   :  { %v3231_v2 = vmax.f32 %v3230_v37, %v3052_v61  ;;  %v2750_v56 = vadd.f32 %v2749_v25, %v4447_v53 }
 0x296   :  { %v2751_v46 = vpop.f32.mrf.mxu0  ;;  %v3056_v31 = vpop.f32.mrf.mxu1 }
 0x297   :  { %v3055_v3 = vadd.f32 %v3054_v54, %v2750_v56 }
 0x298   :  { %v2754_v42 = vpop.f32.mrf.mxu0  ;;  %v3059_v18 = vpop.f32.mrf.mxu1 }
 0x299   :  { %v3247_v19 = vmax.f32 %v3246_v50, %v3055_v3  ;;  %v2755_v1 = vadd.f32 %v2754_v42, %v4449_v60 }
 0x29a   :  { %v2756_v9 = vpop.f32.mrf.mxu0  ;;  %v3061_v35 = vpop.f32.mrf.mxu1 }
 0x29b   :  { %v3060_v33 = vadd.f32 %v3059_v18, %v2755_v1 }
 0x29c   :  { %v2757_v28 = vpop.f32.mrf.mxu0  ;;  %v3062_v36 = vpop.f32.mrf.mxu1 }
 0x29d   :  { %v3263_v45 = vmax.f32 %v3262_v22, %v3060_v33  ;;  %v2758_v7 = vadd.f32 %v2757_v28, %v4451_v23 }
 0x29e   :  { %v2759_v27 = vpop.f32.mrf.mxu0  ;;  %v3064_v53 = vpop.f32.mrf.mxu1 }
 0x29f   :  { %v3063_v41 = vadd.f32 %v3062_v36, %v2758_v7 }
 0x2a0   :  { %v2762_v11 = vpop.f32.mrf.mxu0  ;;  %v3067_v40 = vpop.f32.mrf.mxu1 }
 0x2a1   :  { %v3279_v37 = vmax.f32 %v3278_v34, %v3063_v41  ;;  %v2763_v59 = vadd.f32 %v2762_v11, %v4453_v4 }
 0x2a2   :  { %v2764_v43 = vpop.f32.mrf.mxu0  ;;  %v3069_v60 = vpop.f32.mrf.mxu1 }
 0x2a3   :  { %v3068_v62 = vadd.f32 %v3067_v40, %v2763_v59 }
 0x2a4   :  { %v2765_v39 = vpop.f32.mrf.mxu0  ;;  %v3070_v8 = vpop.f32.mrf.mxu1 }
 0x2a5   :  { %v3232_v44 = vmax.f32 %v3231_v2, %v3068_v62  ;;  %v2766_v50 = vadd.f32 %v2765_v39, %v4455_v0 }
 0x2a6   :  { %v2767_v20 = vpop.f32.mrf.mxu0  ;;  %v3072_v23 = vpop.f32.mrf.mxu1 }
 0x2a7   :  { %v3071_v26 = vadd.f32 %v3070_v8, %v2766_v50 }
 0x2a8   :  { %v2770_v55 = vpop.f32.mrf.mxu0  ;;  %v3075_v22 = vpop.f32.mrf.mxu1 }
 0x2a9   :  { %v3248_v48 = vmax.f32 %v3247_v19, %v3071_v26  ;;  %v2771_v17 = vadd.f32 %v2770_v55, %v4457_v58 }
 0x2aa   :  { %v2772_v24 = vpop.f32.mrf.mxu0  ;;  %v3077_v4 = vpop.f32.mrf.mxu1 }
 0x2ab   :  { %v3076_v10 = vadd.f32 %v3075_v22, %v2771_v17 }
 0x2ac   :  { %v2773_v57 = vpop.f32.mrf.mxu0  ;;  %v3078_v12 = vpop.f32.mrf.mxu1 }
 0x2ad   :  { %v3264_v16 = vmax.f32 %v3263_v45, %v3076_v10  ;;  %v2774_v6 = vadd.f32 %v2773_v57, %v4459_v21 }
 0x2ae   :  { %v2775_v34 = vpop.f32.mrf.mxu0  ;;  %v3080_v0 = vpop.f32.mrf.mxu1 }
 0x2af   :  { %v3079_v51 = vadd.f32 %v3078_v12, %v2774_v6 }
 0x2b0   :  { %v2778_v49 = vpop.f32.mrf.mxu0  ;;  %v3083_v13 = vpop.f32.mrf.mxu1 }
 0x2b1   :  { %v3280_v63 = vmax.f32 %v3279_v37, %v3079_v51  ;;  %v2779_v61 = vadd.f32 %v2778_v49, %v4461_v32 }
 0x2b2   :  { %v2780_v25 = vpop.f32.mrf.mxu0  ;;  %v3085_v58 = vpop.f32.mrf.mxu1 }
 0x2b3   :  { %v3084_v2 = vadd.f32 %v3083_v13, %v2779_v61 }
 0x2b4   :  { %v2781_v56 = vpop.f32.mrf.mxu0  ;;  %v3086_v3 = vpop.f32.mrf.mxu1 }
 0x2b5   :  { %v3233_v54 = vmax.f32 %v3232_v44, %v3084_v2  ;;  %v2782_v46 = vadd.f32 %v2781_v56, %v4463_v52  ;;  %v4748_v2 = vld [vmem:[#allocation12_spill] sm:$0xff] }
 0x2b6   :  { %v2783_v31 = vpop.f32.mrf.mxu0  ;;  %v3088_v21 = vpop.f32.mrf.mxu1 }
 0x2b7   :  { %v3087_v42 = vadd.f32 %v3086_v3, %v2782_v46  ;;  %v4749_v21 = vld [vmem:[#allocation13_spill] sm:$0xff] }
 0x2b8   :  { %v2786_v19 = vpop.f32.mrf.mxu0  ;;  %v3091_v9 = vpop.f32.mrf.mxu1 }
 0x2b9   :  { %v3249_v1 = vmax.f32 %v3248_v48, %v3087_v42  ;;  %v2787_v18 = vadd.f32 %v2786_v19, %v4465_v14 }
 0x2ba   :  { %v2788_v33 = vpop.f32.mrf.mxu0  ;;  %v3093_v32 = vpop.f32.mrf.mxu1 }
 0x2bb   :  { %v3092_v35 = vadd.f32 %v3091_v9, %v2787_v18 }
 0x2bc   :  { %v2789_v28 = vpop.f32.mrf.mxu0  ;;  %v3094_v36 = vpop.f32.mrf.mxu1 }
 0x2bd   :  { %v3265_v45 = vmax.f32 %v3264_v16, %v3092_v35  ;;  %v2790_v7 = vadd.f32 %v2789_v28, %v4467_v30  ;;  %v3990_v16 = vld [vmem:[%s4717_s3 + $0x10] sm:$0xff]   ;;  %v4750_v28 = vld [vmem:[#allocation14_spill] sm:$0xff] }
 0x2be   :  { %v2791_v27 = vpop.f32.mrf.mxu0  ;;  %v3096_v52 = vpop.f32.mrf.mxu1  ;;  %3970 = vmatprep.mubr.msk.bf16.mxu1 %vm3400_vm0, %v3990_v16 }
 0x2bf   :  { %v3095_v41 = vadd.f32 %v3094_v36, %v2790_v7 }
 0x2c0   :  { %v2794_v53 = vpop.f32.mrf.mxu0  ;;  %v3099_v59 = vpop.f32.mrf.mxu1 }
 0x2c1   :  { %v3281_v11 = vmax.f32 %v3280_v63, %v3095_v41  ;;  %v2795_v37 = vadd.f32 %v2794_v53, %v4469_v47 }
 0x2c2   :  { %v2796_v40 = vpop.f32.mrf.mxu0  ;;  %v3101_v14 = vpop.f32.mrf.mxu1 }
 0x2c3   :  { %v3100_v43 = vadd.f32 %v3099_v59, %v2795_v37 }
 0x2c4   :  { %v2797_v62 = vpop.f32.mrf.mxu0  ;;  %v3102_v44 = vpop.f32.mrf.mxu1 }
 0x2c5   :  { %v3234_v60 = vmax.f32 %v3233_v54, %v3100_v43  ;;  %v2798_v39 = vadd.f32 %v2797_v62, %v4471_v15  ;;  %v3989_v15 = vld [vmem:[%s4717_s3] sm:$0xff]  }
 0x2c6   :  { %v2799_v50 = vpop.f32.mrf.mxu0  ;;  %v3104_v30 = vpop.f32.mrf.mxu1  ;;  %3966 = vmatprep.mubr.msk.bf16.mxu0 %vm3400_vm0, %v3989_v15 }
 0x2c7   :  { %v3103_v8 = vadd.f32 %v3102_v44, %v2798_v39  ;;  %v4752_v39 = vld [vmem:[#allocation16_spill] sm:$0xff] }
 0x2c8   :  { %v2802_v20 = vpop.f32.mrf.mxu0  ;;  %v3107_v55 = vpop.f32.mrf.mxu1 }
 0x2c9   :  { %v3250_v26 = vmax.f32 %v3249_v1, %v3103_v8  ;;  %v2803_v23 = vadd.f32 %v2802_v20, %v4473_v29 }
 0x2ca   :  { %v2804_v48 = vpop.f32.mrf.mxu0  ;;  %v3109_v47 = vpop.f32.mrf.mxu1 }
 0x2cb   :  { %v3108_v17 = vadd.f32 %v3107_v55, %v2803_v23  ;;  %v4753_v55 = vld [vmem:[#allocation17_spill] sm:$0xff] }
 0x2cc   :  { %v2805_v22 = vpop.f32.mrf.mxu0  ;;  %v3110_v4 = vpop.f32.mrf.mxu1 }
 0x2cd   :  { %v3266_v24 = vmax.f32 %v3265_v45, %v3108_v17  ;;  %v2806_v10 = vadd.f32 %v2805_v22, %v4475_v38  ;;  %v4747_v38 = vld [vmem:[#allocation11_spill] sm:$0xff] }
 0x2ce   :  { %v2807_v57 = vpop.f32.mrf.mxu0  ;;  %v3112_v6 = vpop.f32.mrf.mxu1 }
 0x2cf   :  { %v3111_v29 = vadd.f32 %v3110_v4, %v2806_v10  ;;  %v4754_v57 = vld [vmem:[#allocation18_spill] sm:$0xff] }
 0x2d0   :  { %v2810_v12 = vpop.f32.mrf.mxu0  ;;  %v3115_v0 = vpop.f32.mrf.mxu1 }
 0x2d1   :  { %v3282_v34 = vmax.f32 %v3281_v11, %v3111_v29  ;;  %v2811_v51 = vadd.f32 %v2810_v12, %v4747_v38  ;;  %v4751_v11 = vld [vmem:[#allocation15_spill] sm:$0xff] }
 0x2d2   :  { %v2812_v49 = vpop.f32.mrf.mxu0  ;;  %v3117_v61 = vpop.f32.mrf.mxu1 }
 0x2d3   :  { %v3116_v63 = vadd.f32 %v3115_v0, %v2811_v51  ;;  %v4755_v51 = vld [vmem:[#allocation19_spill] sm:$0xff] }
 0x2d4   :  { %v2813_v13 = vpop.f32.mrf.mxu0  ;;  %v3118_v56 = vpop.f32.mrf.mxu1 }
 0x2d5   :  { %v3235_v25 = vmax.f32 %v3234_v60, %v3116_v63  ;;  %v2814_v58 = vadd.f32 %v2813_v13, %v4748_v2 }
 0x2d6   :  { %v2815_v54 = vpop.f32.mrf.mxu0  ;;  %v3120_v3 = vpop.f32.mrf.mxu1 }
 0x2d7   :  { %v3119_v46 = vadd.f32 %v3118_v56, %v2814_v58  ;;  %v4756_v58 = vld [vmem:[#allocation20_spill] sm:$0xff] }
 0x2d8   :  { %v2818_v31 = vpop.f32.mrf.mxu0  ;;  %v3123_v1 = vpop.f32.mrf.mxu1 }
 0x2d9   :  { %v3251_v42 = vmax.f32 %v3250_v26, %v3119_v46  ;;  %v2819_v19 = vadd.f32 %v2818_v31, %v4749_v21 }
 0x2da   :  { %v2820_v18 = vpop.f32.mrf.mxu0  ;;  %v3125_v33 = vpop.f32.mrf.mxu1 }
 0x2db   :  { %v3124_v9 = vadd.f32 %v3123_v1, %v2819_v19  ;;  %v4757_v19 = vld [vmem:[#allocation21_spill] sm:$0xff] }
 0x2dc   :  { %v2821_v35 = vpop.f32.mrf.mxu0  ;;  %v3126_v7 = vpop.f32.mrf.mxu1 }
 0x2dd   :  { %v3267_v32 = vmax.f32 %v3266_v24, %v3124_v9  ;;  %v2822_v45 = vadd.f32 %v2821_v35, %v4750_v28 }
 0x2de   :  { %v2823_v36 = vpop.f32.mrf.mxu0  ;;  %v3128_v41 = vpop.f32.mrf.mxu1 }
 0x2df   :  { %v3127_v27 = vadd.f32 %v3126_v7, %v2822_v45  ;;  %v4758_v45 = vld [vmem:[#allocation22_spill] sm:$0xff] }
 0x2e0   :  { %v2826_v52 = vpop.f32.mrf.mxu0  ;;  %v3131_v59 = vpop.f32.mrf.mxu1 }
 0x2e1   :  { %v3283_v53 = vmax.f32 %v3282_v34, %v3127_v27  ;;  %v2827_v37 = vadd.f32 %v2826_v52, %v4751_v11 }
 0x2e2   :  { %v2828_v40 = vpop.f32.mrf.mxu0  ;;  %v3133_v14 = vpop.f32.mrf.mxu1 }
 0x2e3   :  { %v3132_v43 = vadd.f32 %v3131_v59, %v2827_v37  ;;  %v4759_v37 = vld [vmem:[#allocation23_spill] sm:$0xff] }
 0x2e4   :  { %v2829_v62 = vpop.f32.mrf.mxu0  ;;  %v3134_v50 = vpop.f32.mrf.mxu1 }
 0x2e5   :  { %v3236_v60 = vmax.f32 %v3235_v25, %v3132_v43  ;;  %v2830_v44 = vadd.f32 %v2829_v62, %v4752_v39 }
 0x2e6   :  { %v2831_v8 = vpop.f32.mrf.mxu0  ;;  %v3136_v20 = vpop.f32.mrf.mxu1 }
 0x2e7   :  { %v3135_v30 = vadd.f32 %v3134_v50, %v2830_v44  ;;  %v4760_v44 = vld [vmem:[#allocation24_spill] sm:$0xff] }
 0x2e8   :  { %v2834_v26 = vpop.f32.mrf.mxu0  ;;  %v3139_v17 = vpop.f32.mrf.mxu1 }
 0x2e9   :  { %v3252_v23 = vmax.f32 %v3251_v42, %v3135_v30  ;;  %v2835_v48 = vadd.f32 %v2834_v26, %v4753_v55 }
 0x2ea   :  { %v2836_v47 = vpop.f32.mrf.mxu0  ;;  %v3141_v24 = vpop.f32.mrf.mxu1 }
 0x2eb   :  { %v3140_v22 = vadd.f32 %v3139_v17, %v2835_v48  ;;  %v4761_v48 = vld [vmem:[#allocation25_spill] sm:$0xff] }
 0x2ec   :  { %v2837_v10 = vpop.f32.mrf.mxu0  ;;  %v3142_v16 = vpop.f32.mrf.mxu1 }
 0x2ed   :  { %v3268_v4 = vmax.f32 %v3267_v32, %v3140_v22  ;;  %v2838_v15 = vadd.f32 %v2837_v10, %v4754_v57 }
 0x2ee   :  { %v2839_v29 = vpop.f32.mrf.mxu0  ;;  %v3144_v12 = vpop.f32.mrf.mxu1 }
 0x2ef   :  { %v3143_v6 = vadd.f32 %v3142_v16, %v2838_v15  ;;  %v4762_v15 = vld [vmem:[#allocation26_spill] sm:$0xff] }
 0x2f0   :  { %v2842_v34 = vpop.f32.mrf.mxu0  ;;  %v3147_v49 = vpop.f32.mrf.mxu1 }
 0x2f1   :  { %v3284_v38 = vmax.f32 %v3283_v53, %v3143_v6  ;;  %v2843_v0 = vadd.f32 %v2842_v34, %v4755_v51 }
 0x2f2   :  { %v2844_v63 = vpop.f32.mrf.mxu0  ;;  %v3149_v13 = vpop.f32.mrf.mxu1 }
 0x2f3   :  { %v3148_v61 = vadd.f32 %v3147_v49, %v2843_v0  ;;  %v4763_v0 = vld [vmem:[#allocation27_spill] sm:$0xff] }
 0x2f4   :  { %v2845_v25 = vpop.f32.mrf.mxu0  ;;  %v3150_v54 = vpop.f32.mrf.mxu1 }
 0x2f5   :  { %v3237_v2 = vmax.f32 %v3236_v60, %v3148_v61  ;;  %v2846_v56 = vadd.f32 %v2845_v25, %v4756_v58 }
 0x2f6   :  { %v2847_v46 = vpop.f32.mrf.mxu0  ;;  %v3152_v31 = vpop.f32.mrf.mxu1 }
 0x2f7   :  { %v3151_v3 = vadd.f32 %v3150_v54, %v2846_v56  ;;  %v4764_v56 = vld [vmem:[#allocation28_spill] sm:$0xff] }
 0x2f8   :  { %v2850_v42 = vpop.f32.mrf.mxu0  ;;  %v3155_v18 = vpop.f32.mrf.mxu1 }
 0x2f9   :  { %v3253_v21 = vmax.f32 %v3252_v23, %v3151_v3  ;;  %v2851_v1 = vadd.f32 %v2850_v42, %v4757_v19 }
 0x2fa   :  { %v2852_v9 = vpop.f32.mrf.mxu0  ;;  %v3157_v35 = vpop.f32.mrf.mxu1 }
 0x2fb   :  { %v3156_v33 = vadd.f32 %v3155_v18, %v2851_v1  ;;  %v4765_v1 = vld [vmem:[#allocation29_spill] sm:$0xff] }
 0x2fc   :  { %v2853_v32 = vpop.f32.mrf.mxu0  ;;  %v3158_v36 = vpop.f32.mrf.mxu1 }
 0x2fd   :  { %v3269_v28 = vmax.f32 %v3268_v4, %v3156_v33  ;;  %v2854_v7 = vadd.f32 %v2853_v32, %v4758_v45 }
 0x2fe   :  { %v2855_v27 = vpop.f32.mrf.mxu0  ;;  %v3160_v52 = vpop.f32.mrf.mxu1 }
 0x2ff   :  { %v3159_v41 = vadd.f32 %v3158_v36, %v2854_v7  ;;  %v4766_v7 = vld [vmem:[#allocation30_spill] sm:$0xff] }
 0x300   :  { %v2858_v53 = vpop.f32.mrf.mxu0  ;;  %v3163_v40 = vpop.f32.mrf.mxu1 }
 0x301   :  { %v3285_v11 = vmax.f32 %v3284_v38, %v3159_v41  ;;  %v2859_v59 = vadd.f32 %v2858_v53, %v4759_v37 }
 0x302   :  { %v2860_v43 = vpop.f32.mrf.mxu0  ;;  %v3165_v62 = vpop.f32.mrf.mxu1 }
 0x303   :  { %v3164_v14 = vadd.f32 %v3163_v40, %v2859_v59  ;;  %v4767_v59 = vld [vmem:[#allocation31_spill] sm:$0xff] }
 0x304   :  { %v2861_v60 = vpop.f32.mrf.mxu0  ;;  %v3166_v8 = vpop.f32.mrf.mxu1 }
 0x305   :  { %v3238_v39 = vmax.f32 %v3237_v2, %v3164_v14  ;;  %v2862_v50 = vadd.f32 %v2861_v60, %v4760_v44 }
 0x306   :  { %v2863_v30 = vpop.f32.mrf.mxu0  ;;  %v3168_v26 = vpop.f32.mrf.mxu1 }
 0x307   :  { %v3167_v20 = vadd.f32 %v3166_v8, %v2862_v50  ;;  %v4768_v50 = vld [vmem:[#allocation32_spill] sm:$0xff] }
 0x308   :  { %v2866_v23 = vpop.f32.mrf.mxu0  ;;  %v3171_v47 = vpop.f32.mrf.mxu1 }
 0x309   :  { %v3254_v55 = vmax.f32 %v3253_v21, %v3167_v20  ;;  %v2867_v17 = vadd.f32 %v2866_v23, %v4761_v48 }
 0x30a   :  { %v2868_v22 = vpop.f32.mrf.mxu0  ;;  %v3173_v10 = vpop.f32.mrf.mxu1 }
 0x30b   :  { %v3172_v24 = vadd.f32 %v3171_v47, %v2867_v17  ;;  %v4769_v17 = vld [vmem:[#allocation33_spill] sm:$0xff] }
 0x30c   :  { %v2869_v4 = vpop.f32.mrf.mxu0  ;;  %v3174_v29 = vpop.f32.mrf.mxu1 }
 0x30d   :  { %v3270_v57 = vmax.f32 %v3269_v28, %v3172_v24  ;;  %v2870_v16 = vadd.f32 %v2869_v4, %v4762_v15 }
 0x30e   :  { %v2871_v6 = vpop.f32.mrf.mxu0  ;;  %v3176_v34 = vpop.f32.mrf.mxu1 }
 0x30f   :  { %v3175_v12 = vadd.f32 %v3174_v29, %v2870_v16  ;;  %v4770_v16 = vld [vmem:[#allocation34_spill] sm:$0xff] }
 0x310   :  { %v2874_v38 = vpop.f32.mrf.mxu0  ;;  %v3179_v63 = vpop.f32.mrf.mxu1 }
 0x311   :  { %v3286_v51 = vmax.f32 %v3285_v11, %v3175_v12  ;;  %v2875_v49 = vadd.f32 %v2874_v38, %v4763_v0 }
 0x312   :  { %v2876_v61 = vpop.f32.mrf.mxu0  ;;  %v3181_v25 = vpop.f32.mrf.mxu1 }
 0x313   :  { %v3180_v13 = vadd.f32 %v3179_v63, %v2875_v49  ;;  %v4771_v49 = vld [vmem:[#allocation35_spill] sm:$0xff] }
 0x314   :  { %v2877_v2 = vpop.f32.mrf.mxu0  ;;  %v3182_v46 = vpop.f32.mrf.mxu1 }
 0x315   :  { %v3239_v58 = vmax.f32 %v3238_v39, %v3180_v13  ;;  %v2878_v54 = vadd.f32 %v2877_v2, %v4764_v56  ;;  %v4772_v56 = vld [vmem:[#allocation36_spill] sm:$0xff] }
 0x316   :  { %v2879_v3 = vpop.f32.mrf.mxu0  ;;  %v3184_v42 = vpop.f32.mrf.mxu1 }
 0x317   :  { %v3183_v31 = vadd.f32 %v3182_v46, %v2878_v54 }
 0x318   :  { %v2882_v21 = vpop.f32.mrf.mxu0  ;;  %v3187_v9 = vpop.f32.mrf.mxu1 }
 0x319   :  { %v3255_v19 = vmax.f32 %v3254_v55, %v3183_v31  ;;  %v2883_v18 = vadd.f32 %v2882_v21, %v4765_v1 }
 0x31a   :  { %v2884_v33 = vpop.f32.mrf.mxu0  ;;  %v3189_v32 = vpop.f32.mrf.mxu1 }
 0x31b   :  { %v3188_v35 = vadd.f32 %v3187_v9, %v2883_v18  ;;  %v3297_v33 = vpop.permute.xlu1 %3296 }
 0x31c   :  { %v2885_v28 = vpop.f32.mrf.mxu0  ;;  %v3190_v27 = vpop.f32.mrf.mxu1 }
 0x31d   :  { %v3271_v45 = vmax.f32 %v3270_v57, %v3188_v35  ;;  %v2886_v36 = vadd.f32 %v2885_v28, %v4766_v7 }
 0x31e   :  { %v2887_v41 = vpop.f32.mrf.mxu0  ;;  %v3192_v53 = vpop.f32.mrf.mxu1 }
 0x31f   :  { %v3191_v52 = vadd.f32 %v3190_v27, %v2886_v36  ;;  %v4773_v27 = vld [vmem:[#allocation37_spill] sm:$0xff] }
 0x320   :  { %v2890_v11 = vpop.f32.mrf.mxu0  ;;  %v3195_v43 = vpop.f32.mrf.mxu1 }
 0x321   :  { %v3287_v37 = vmax.f32 %v3286_v51, %v3191_v52  ;;  %v2891_v40 = vadd.f32 %v2890_v11, %v4767_v59  ;;  %v3302_v59 = vpop.permute.xlu1 %3301 }
 0x322   :  { %v2892_v14 = vpop.f32.mrf.mxu0  ;;  %v3197_v60 = vpop.f32.mrf.mxu1 }
 0x323   :  { %v3196_v62 = vadd.f32 %v3195_v43, %v2891_v40 }
 0x324   :  { %v2893_v39 = vpop.f32.mrf.mxu0  ;;  %v3198_v30 = vpop.f32.mrf.mxu1 }
 0x325   :  { %v3240_v44 = vmax.f32 %v3239_v58, %v3196_v62  ;;  %v2894_v8 = vadd.f32 %v2893_v39, %v4768_v50 }
 0x326   :  { %v2895_v20 = vpop.f32.mrf.mxu0  ;;  %v3200_v23 = vpop.f32.mrf.mxu1 }
 0x327   :  { %v3199_v26 = vadd.f32 %v3198_v30, %v2894_v8  ;;  %v3992_v23 = vld [vmem:[%s4717_s3 + $0x18] sm:$0xff]  }
 0x328   :  { %v2898_v55 = vpop.f32.mrf.mxu0  ;;  %v3203_v22 = vpop.f32.mrf.mxu1 }
 0x329   :  { %v3256_v48 = vmax.f32 %v3255_v19, %v3199_v26  ;;  %v2899_v47 = vadd.f32 %v2898_v55, %v4769_v17  ;;  %v3991_v26 = vld [vmem:[%s4717_s3 + $0x8] sm:$0xff]   ;;  %s4087_s3 = smov [#allocation7]  }
 0x32a   :  { %v2900_v24 = vpop.f32.mrf.mxu0  ;;  %v3205_v4 = vpop.f32.mrf.mxu1  ;;  %s3531_s10 = sshll.u32 %s4087_s3, 4  ;;  %s3532_s10 = int_to_ptr.vmem [resolvable:$true] %s3531_s10 }
 0x32b   :  { %v3204_v10 = vadd.f32 %v3203_v22, %v2899_v47  ;;  %s4053_s11 = scalar_lea.vmem %s3532_s10, 512  ;;  %p4058_p11 = scmp.lt.s32.totalorder %s3532_s10, %s3532_s10 }
 0x32c   :  { %v2901_v57 = vpop.f32.mrf.mxu0  ;;  %v3206_v6 = vpop.f32.mrf.mxu1  ;;  %p4054_p10 = scmp.ne.s32.totalorder %s3532_s10, %s4053_s11  ;;  %p4059_p12 = scmp.lt.s32.totalorder %s4053_s11, %s4053_s11 }
 0x32d   :  { %v3272_v15 = vmax.f32 %v3271_v45, %v3204_v10  ;;  %v2902_v29 = vadd.f32 %v2901_v57, %v4770_v16  ;;  %v3307_v45 = vpop.permute.xlu0 %3306 }
 0x32e   :  { %v2903_v12 = vpop.f32.mrf.mxu0  ;;  %v3208_v38 = vpop.f32.mrf.mxu1  ;;  %p4060_p13 = por %p4059_p12, %p4058_p11 }
 0x32f   :  { %v3207_v34 = vadd.f32 %v3206_v6, %v2902_v29 }
 0x330   :  { %v2906_v51 = vpop.f32.mrf.mxu0  ;;  %v3211_v61 = vpop.f32.mrf.mxu1  ;;  %p4061_p0 = pnand %p4060_p13, %p4054_p10 }
 0x331   :  { %v3288_v0 = vmax.f32 %v3287_v37, %v3207_v34  ;;  %v2907_v63 = vadd.f32 %v2906_v51, %v4771_v49  ;;  %v3312_v14 = vpop.permute.xlu0 %3311 }
 0x332   :  { %v2908_v13 = vpop.f32.mrf.mxu0  ;;  %v3213_v2 = vpop.f32.mrf.mxu1 }
 0x333   :  { %v3212_v25 = vadd.f32 %v3211_v61, %v2907_v63 }
 0x334   :  { %v2909_v58 = vpop.f32.mrf.mxu0  ;;  %v3214_v46 = vpop.f32.mrf.mxu1 }
 0x335   :  { %v2910_v54 = vadd.f32 %v2909_v58, %v4772_v56  ;;  %v3241_v3 = vmax.f32 %v3240_v44, %v3212_v25  ;;  %v3363_v55 = vpop.permute.xlu0 %3362 }
 0x336   :  { %v2911_v31 = vpop.f32.mrf.mxu0  ;;  %v3216_v21 = vpop.f32.mrf.mxu1 }
 0x337   :  { %v3215_v42 = vadd.f32 %v3214_v46, %v2910_v54  ;;  %v4676_v62 = vadd.f32 %v3297_v33, %v3241_v3 }
 0x338   :  { %v2914_v19 = vpop.f32.mrf.mxu0  ;;  %v3219_v18 = vpop.f32.mrf.mxu1 }
 0x339   :  { %v2915_v1 = vadd.f32 %v2914_v19, %v4529_v5  ;;  %v3257_v9 = vmax.f32 %v3256_v48, %v3215_v42  ;;  %v3318_v8 = vmax.f32 %v4676_v62, 0.0  ;;  %v3368_v48 = vpop.permute.xlu1 %3367  ;;  %v3373_v17 = vpop.permute.xlu0 %3372 }
 0x33a   :  { %v2916_v35 = vpop.f32.mrf.mxu0  ;;  %v3221_v28 = vpop.f32.mrf.mxu1 }
 0x33b   :  { %v3220_v32 = vadd.f32 %v3219_v18, %v2915_v1  ;;  %v4674_v43 = vadd.f32 %v3302_v59, %v3257_v9 }
 0x33c   :  { %v2917_v7 = vpop.f32.mrf.mxu0  ;;  %v3222_v52 = vpop.f32.mrf.mxu1 }
 0x33d   :  { %v3273_v36 = vmax.f32 %v3272_v15, %v3220_v32  ;;  %v2918_v41 = vadd.f32 %v2917_v7, %v4773_v27  ;;  %v3319_v44 = vmax.f32 %v4674_v43, 0.0  ;;  %v3378_v15 = vpop.permute.xlu1 %3377  ;;  %v3343_v2 = vpop.permute.xlu0 %3342 }
 0x33e   :  { %v2919_v53 = vpop.f32.mrf.mxu0  ;;  %v3224_v37 = vpop.f32.mrf.mxu1 }
 0x33f   :  { %v3223_v11 = vadd.f32 %v3222_v52, %v2918_v41  ;;  %v4672_v40 = vadd.f32 %v3307_v45, %v3273_v36  ;;  %v3330_v20 = vpack.c.bf16 %v3319_v44, %v3318_v8 }
 0x341   :  { %v3289_v5 = vmax.f32 %v3288_v0, %v3223_v11  ;;  %v3320_v39 = vmax.f32 %v4672_v40, 0.0  ;;  %v3348_v46 = vpop.permute.xlu1 %3347  ;;  %v3353_v3 = vpop.permute.xlu0 %3352 }
 0x343   :  { %v4678_v60 = vadd.f32 %v3312_v14, %v3289_v5 }
 0x345   :  { %v3321_v50 = vmax.f32 %v4678_v60, 0.0  ;;  %v3358_v18 = vpop.permute.xlu1 %3357 }
 0x347   :  { %v3331_v30 = vpack.c.bf16 %v3321_v50, %v3320_v39 }
 0x349   :  { %3962 = vmatprep.subr.bf16.mxu0 %v3331_v30  ;;  %3974 = vmatprep.subr.bf16.mxu1 %v3331_v30 }
 0x34a   :  { %3963 = vmatpush3.bf16.msra.mxu0 %v3331_v30  ;;  %3976 = vmatpush3.bf16.msra.mxu1 %v3331_v30 }
 0x34b   :  { %3964 = vmatprep.subr.bf16.mxu0 %v3330_v20  ;;  %3975 = vmatprep.subr.bf16.mxu1 %v3330_v20 }
 0x34e   :  { %3965 = vmatpush3.bf16.msra.mxu0 %v3330_v20  ;;  %3977 = vmatpush3.bf16.msra.mxu1 %v3330_v20 }
 0x351   :  { %3967 = vmatmul.mubr.msk.bf16.vlgmr.msra.gmra.mxu0 %vm3400_vm0, %v3991_v26  ;;  %3971 = vmatmul.mubr.msk.bf16.vlgmr.msra.gmra.mxu1 %vm3400_vm0, %v3992_v23 }
 0x411   :  { %v3972_v47 = vpop.f32.mrf.mxu1  ;;  %v3968_v61 = vpop.f32.mrf.mxu0 }
 0x412   :  { %v3472_v22 = vadd.f32 %v3972_v47, %v3373_v17  ;;  %v3456_v42 = vadd.f32 %v3968_v61, %v3353_v3 }
 0x413   :  { %v3463_v24 = vpop.f32.mrf.mxu1  ;;  %v3447_v54 = vpop.f32.mrf.mxu0 }
 0x414   :  { %v3954_v10 = vmul.f32 -1.442695, %v3472_v22  ;;  %v3464_v4 = vadd.f32 %v3463_v24, %v3363_v55  ;;  %v3448_v21 = vadd.f32 %v3447_v54, %v3343_v2  ;;  %v3480_v9 = vmax.f32 %v3456_v42, 0.0 }
 0x415   :  { %v3973_v57 = vpop.f32.mrf.mxu1  ;;  %v3969_v31 = vpop.f32.mrf.mxu0 }
 0x416   :  { %3993 = vpow2.f32 %v3954_v10  ;;  %v3952_v16 = vmul.f32 -1.442695, %v3464_v4  ;;  %v3475_v29 = vadd.f32 %v3973_v57, %v3378_v15  ;;  %v3478_v32 = vmax.f32 %v3448_v21, 0.0 }
 0x417   :  { %v3466_v6 = vpop.f32.mrf.mxu1  ;;  %v3450_v1 = vpop.f32.mrf.mxu0  ;;  %v3459_v28 = vadd.f32 %v3969_v31, %v3358_v18 }
 0x418   :  { %3995 = vpow2.f32 %v3952_v16  ;;  %v3467_v12 = vadd.f32 %v3466_v6, %v3368_v48  ;;  %v3955_v34 = vmul.f32 -1.442695, %v3475_v29  ;;  %v3451_v45 = vadd.f32 %v3450_v1, %v3348_v46 }
 0x419   :  { %v3481_v59 = vmax.f32 %v3459_v28, 0.0 }
 0x41a   :  { %v3953_v38 = vmul.f32 -1.442695, %v3467_v12  ;;  %3997 = vpow2.f32 %v3955_v34  ;;  %v3479_v14 = vmax.f32 %v3451_v45, 0.0 }
 0x41c   :  { %3999 = vpow2.f32 %v3953_v38 }
 0x423   :  { %v3994_v51 = vpop.eup %3993 }
 0x424   :  { %v3496_v0 = vadd.f32 1.0, %v3994_v51 }
 0x425   :  { %v3996_v49 = vpop.eup %3995 }
 0x426   :  { %4001 = vrcp.f32 %v3496_v0  ;;  %v3494_v63 = vadd.f32 1.0, %v3996_v49 }
 0x427   :  { %v3998_v13 = vpop.eup %3997 }
 0x428   :  { %4003 = vrcp.f32 %v3494_v63  ;;  %v3497_v58 = vadd.f32 1.0, %v3998_v13 }
 0x429   :  { %v4000_v25 = vpop.eup %3999 }
 0x42a   :  { %v3495_v56 = vadd.f32 1.0, %v4000_v25  ;;  %4005 = vrcp.f32 %v3497_v58 }
 0x42c   :  { %4007 = vrcp.f32 %v3495_v56 }
 0x433   :  { %v4002_v19 = vpop.eup %4001 }
 0x434   :  { %v3512_v33 = vsub.f32 1.0, %v4002_v19  ;;  %v3508_v7 = vmul.f32 %v4002_v19, %v3480_v9 }
 0x435   :  { %v4004_v35 = vpop.eup %4003 }
 0x436   :  { %v3510_v36 = vsub.f32 1.0, %v4004_v35  ;;  %v3516_v27 = vmul.f32 %v3512_v33, %v3320_v39  ;;  %v3506_v52 = vmul.f32 %v4004_v35, %v3478_v32 }
 0x437   :  { %v4006_v41 = vpop.eup %4005 }
 0x438   :  { %v3514_v53 = vmul.f32 %v3510_v36, %v3318_v8  ;;  %v3520_v11 = vadd.f32 %v3516_v27, %v3508_v7  ;;  %v3513_v5 = vsub.f32 1.0, %v4006_v41  ;;  %v3509_v26 = vmul.f32 %v4006_v41, %v3481_v59 }
 0x439   :  { %v4008_v37 = vpop.eup %4007 }
 0x43a   :  { %v3511_v30 = vsub.f32 1.0, %v4008_v37  ;;  %v3518_v20 = vadd.f32 %v3514_v53, %v3506_v52  ;;  %3524 = vst [vmem:[#allocation7 + $0x10] sm:$0xff] %v3520_v11  ;;  %v3517_v23 = vmul.f32 %v3513_v5, %v3321_v50  ;;  %v3507_v40 = vmul.f32 %v4008_v37, %v3479_v14 }
 0x43c   :  { %v3515_v39 = vmul.f32 %v3511_v30, %v3319_v44  ;;  %3522 = vst [vmem:[#allocation7] sm:$0xff] %v3518_v20  ;;  %v3521_v62 = vadd.f32 %v3517_v23, %v3509_v26 }
 0x43e   :  { %v3519_v8 = vadd.f32 %v3515_v39, %v3507_v40  ;;  %3525 = vst [vmem:[#allocation7 + $0x18] sm:$0xff] %v3521_v62 }
 0x440   :  { %3523 = vst [vmem:[#allocation7 + $0x8] sm:$0xff] %v3519_v8 }
 0x441   :  { %4064 = shalt.err (!%p4061_p0)
}
 0x442   :  { %3537 = dma.vmem_to_hbm [thread:$0]  %s3532_s10, 512, %s4719_s5, [#allocation4], %s4080_s21, %s4080_s21, %s4081_s22  }
 0x443   :  { %4077 = dma.done.wait [#allocation4], 512  }
 0x444   :  { %4078 = vsyncadd [#allocation4], 4294966784 }
 0x445   :  { %3541 = vsyncpa [#allocation3], 1 }
 0x446   :  { %3542 = vsyncpa [#allocation6], 1 }
 0x447   :  { %3543 = vsyncpa [#allocation4], 1 }

</bundles_post_ra>
